<compile_context>
chip_gen: v7x
topology: tpu7x:2x2x1
jax: 0.10.0
libtpu: 0.0.40
codegen_flags: <defaults>
</compile_context>

<pallas_src>
import functools

import jax
import jax.numpy as jnp
from jax.experimental import pallas as pl
from jax.experimental.pallas import tpu as pltpu


# ---------------------------------------------------------------------------
# Fused (x @ w + b) [+ ReLU] kernel.  Used for the im2col conv and all three
# classifier Linear layers.  Grid = (M-tiles, N-tiles, K-tiles); K is the
# reduction axis (last, "arbitrary"); the output tile stays resident in a VMEM
# f32 accumulator across the K loop and is written (with bias/ReLU) on the
# last K step.  Weights may be bf16 (activation tile is cast to match); the
# accumulation is always f32.
# ---------------------------------------------------------------------------
def _linear_kernel(x_ref, w_ref, b_ref, o_ref, acc_ref, *, relu):
    k = pl.program_id(2)

    @pl.when(k == 0)
    def _():
        acc_ref[...] = jnp.zeros_like(acc_ref)

    w = w_ref[...]
    x = x_ref[...].astype(w.dtype)          # bf16 path for classifier, f32 for conv
    acc_ref[...] += jnp.dot(x, w, preferred_element_type=jnp.float32)

    @pl.when(k == pl.num_programs(2) - 1)
    def _():
        y = acc_ref[...] + b_ref[...].astype(jnp.float32)
        if relu:
            y = jnp.maximum(y, 0.0)
        o_ref[...] = y.astype(o_ref.dtype)


def pallas_linear(x, w, b, *, relu=False, tm=None, tk=None, tn=None):
    """y = x @ w + b (optionally ReLU).  w stored as (K, N) (= PyTorch W^T)."""
    M, K = x.shape
    Kw, N = w.shape
    assert K == Kw
    tm = M if (tm is None or tm > M) else tm
    tk = K if (tk is None or tk > K) else tk
    tn = N if (tn is None or tn > N) else tn
    assert M % tm == 0 and K % tk == 0 and N % tn == 0
    grid = (M // tm, N // tn, K // tk)
    return pl.pallas_call(
        functools.partial(_linear_kernel, relu=relu),
        out_shape=jax.ShapeDtypeStruct((M, N), x.dtype),
        grid_spec=pltpu.PrefetchScalarGridSpec(
            num_scalar_prefetch=0,
            grid=grid,
            in_specs=[
                pl.BlockSpec((tm, tk), lambda i, j, k: (i, k)),
                pl.BlockSpec((tk, tn), lambda i, j, k: (k, j)),
                pl.BlockSpec((1, tn), lambda i, j, k: (0, j)),
            ],
            out_specs=pl.BlockSpec((tm, tn), lambda i, j, k: (i, j)),
            scratch_shapes=[pltpu.VMEM((tm, tn), jnp.float32)],
        ),
        compiler_params=pltpu.CompilerParams(
            dimension_semantics=("parallel", "parallel", "arbitrary"),
            vmem_limit_bytes=48 * 1024 * 1024),
    )(x, w, b.reshape(1, N))


def _largest_divisor_tile(n, cap, align=8):
    """Largest divisor of n that is a multiple of `align` and <= cap (else n)."""
    if n <= cap:
        return n
    t = cap - (cap % align)
    while t >= align:
        if n % t == 0:
            return t
        t -= align
    return n


# ---------------------------------------------------------------------------
# Fused MaxPool2d(2) + AdaptiveAvgPool2d((7,7)) kernel (NHWC), one image per
# grid step: 28x28 -> 14x14 (max, via VMEM scratch) -> 7x7 (exact 2x2 mean).
# Fusing the two pools removes the (N,14,14,C) f32 intermediate HBM round trip.
# TODO(synk): the stride-2 slices along W are sublane-strided loads; a
# lane-contiguous reduction form would be a small extra win (pool is mem-bound).
# ---------------------------------------------------------------------------
def _maxpool_adaptiveavg_kernel(x_ref, o_ref, m_ref):
    Hm, Wm = m_ref.shape[1], m_ref.shape[2]
    Ho, Wo = o_ref.shape[1], o_ref.shape[2]
    # MaxPool2d(kernel_size=2, stride=2)
    p00 = x_ref[:, pl.ds(0, Hm, 2), pl.ds(0, Wm, 2), :]
    p01 = x_ref[:, pl.ds(0, Hm, 2), pl.ds(1, Wm, 2), :]
    p10 = x_ref[:, pl.ds(1, Hm, 2), pl.ds(0, Wm, 2), :]
    p11 = x_ref[:, pl.ds(1, Hm, 2), pl.ds(1, Wm, 2), :]
    m_ref[...] = jnp.maximum(jnp.maximum(p00, p01), jnp.maximum(p10, p11))
    # AdaptiveAvgPool2d((7,7)) on an exact 14x14 input == 2x2 mean.
    q00 = m_ref[:, pl.ds(0, Ho, 2), pl.ds(0, Wo, 2), :]
    q01 = m_ref[:, pl.ds(0, Ho, 2), pl.ds(1, Wo, 2), :]
    q10 = m_ref[:, pl.ds(1, Ho, 2), pl.ds(0, Wo, 2), :]
    q11 = m_ref[:, pl.ds(1, Ho, 2), pl.ds(1, Wo, 2), :]
    o_ref[...] = ((q00 + q01) + (q10 + q11)) * 0.25


def pallas_maxpool_then_avgpool7(x):
    N, H, W, C = x.shape
    # AdaptiveAvgPool2d((7,7)) is only implemented for the exact-2x2-window case,
    # i.e. the feature map entering it (after MaxPool2d(2)) must be 14x14.
    assert H == 28 and W == 28, (
        "fused pool assumes MaxPool2d(2) output of exactly 14x14 "
        "(general AdaptiveAvgPool2d not implemented)")
    Hm, Wm, Ho, Wo = H // 2, W // 2, H // 4, W // 4
    return pl.pallas_call(
        _maxpool_adaptiveavg_kernel,
        out_shape=jax.ShapeDtypeStruct((N, Ho, Wo, C), x.dtype),
        grid_spec=pltpu.PrefetchScalarGridSpec(
            num_scalar_prefetch=0,
            grid=(N,),
            in_specs=[pl.BlockSpec((1, H, W, C), lambda n: (n, 0, 0, 0))],
            out_specs=pl.BlockSpec((1, Ho, Wo, C), lambda n: (n, 0, 0, 0)),
            scratch_shapes=[pltpu.VMEM((1, Hm, Wm, C), jnp.float32)],
        ),
        compiler_params=pltpu.CompilerParams(
            dimension_semantics=("parallel",)),
    )(x)


# ---------------------------------------------------------------------------
# Conv2d 3x3, stride 1, padding 1: im2col (plain-JAX glue) + Pallas matmul with
# fused bias + ReLU.  With Cin=3 the im2col buffer is tiny (~170 KB here).
# TODO(synk): for real 512->512 VGG conv layers the HBM-materialized im2col is
# the dominant traffic; replace with 9 shifted matmuls accumulated in VMEM
# (halo'd input block + pl.ds offsets) before reusing this for wide convs.
# ---------------------------------------------------------------------------
def conv3x3_relu(x_nhwc, w_oihw, b):
    N, H, W, Cin = x_nhwc.shape
    Cout = w_oihw.shape[0]
    xp = jnp.pad(x_nhwc, ((0, 0), (1, 1), (1, 1), (0, 0)))
    patches = jnp.concatenate(
        [xp[:, dy:dy + H, dx:dx + W, :] for dy in range(3) for dx in range(3)],
        axis=-1)                                     # (N,H,W,9*Cin), order [dy,dx,c]
    M = N * H * W
    patches = patches.reshape(M, 9 * Cin)
    w_mat = jnp.transpose(w_oihw, (2, 3, 1, 0)).reshape(9 * Cin, Cout)
    tm = _largest_divisor_tile(M, cap=1024, align=8)
    y = pallas_linear(patches, w_mat, b, relu=True, tm=tm, tk=9 * Cin, tn=512)
    return y.reshape(N, H, W, Cout)


# ---------------------------------------------------------------------------
# Parameters (deterministic, matching the module's _initialize_weights):
#   Conv2d: kaiming_normal_(fan_out, relu) -> N(0, sqrt(2/fan_out)), bias 0
#   Linear: N(0, 0.01), bias 0
# Classifier weights are stored bf16 (weight-streaming is the classifier's
# bottleneck); accumulation stays f32 inside the kernel.
# ---------------------------------------------------------------------------
def init_params(key, c_in=3, num_classes=5):
    kc, k1, k2, k3 = jax.random.split(key, 4)
    c_feat = 512
    fan_out = c_feat * 3 * 3
    conv_w = jax.random.normal(kc, (c_feat, c_in, 3, 3), jnp.float32) \
        * jnp.sqrt(2.0 / fan_out)
    conv_b = jnp.zeros((c_feat,), jnp.float32)
    d_in = 512 * 7 * 7
    w1 = (jax.random.normal(k1, (d_in, 4096), jnp.float32) * 0.01).astype(jnp.bfloat16)
    b1 = jnp.zeros((4096,), jnp.float32)
    w2 = (jax.random.normal(k2, (4096, 4096), jnp.float32) * 0.01).astype(jnp.bfloat16)
    b2 = jnp.zeros((4096,), jnp.float32)
    n_pad = 128  # pad num_classes (5) up to a lane-aligned 128; sliced after the kernel
    w3 = jnp.zeros((4096, n_pad), jnp.float32)
    w3 = w3.at[:, :num_classes].set(
        jax.random.normal(k3, (4096, num_classes), jnp.float32) * 0.01)
    w3 = w3.astype(jnp.bfloat16)
    b3 = jnp.zeros((n_pad,), jnp.float32)
    return dict(conv_w=conv_w, conv_b=conv_b, w1=w1, b1=b1, w2=w2, b2=b2,
                w3=w3, b3=b3, num_classes=num_classes)


def vgg_forward(x_nchw, params):
    # features: Conv3x3(Cin->512) + ReLU + MaxPool2d(2)
    x = jnp.transpose(x_nchw, (0, 2, 3, 1))                  # NCHW -> NHWC
    x = conv3x3_relu(x, params["conv_w"], params["conv_b"])  # (N, 28, 28, 512)
    # MaxPool2d(2) + AdaptiveAvgPool2d((7,7)) fused: (N,28,28,512) -> (N,7,7,512)
    x = pallas_maxpool_then_avgpool7(x)
    # flatten in PyTorch NCHW order: (N, 512, 7, 7) -> (N, 25088)
    x = jnp.transpose(x, (0, 3, 1, 2)).reshape(x.shape[0], -1)
    # classifier: Linear->ReLU->Dropout->Linear->ReLU->Dropout->Linear
    # TODO(synk): Dropout layers are identity (inference / eval-mode semantics).
    x = pallas_linear(x, params["w1"], params["b1"], relu=True, tk=3584, tn=1024)
    x = pallas_linear(x, params["w2"], params["b2"], relu=True, tk=4096, tn=1024)
    x = pallas_linear(x, params["w3"], params["b3"], relu=False, tk=4096, tn=128)
    return x[:, :params["num_classes"]]


if __name__ == "__main__":
    key = jax.random.PRNGKey(0)
    kx, kp = jax.random.split(key)
    # small but shape-consistent: 28x28 input -> conv 28 -> maxpool 14 -> avgpool 7
    N, C_in, H, W = 2, 3, 28, 28
    x = jax.random.normal(kx, (N, C_in, H, W), jnp.float32)
    params = init_params(kp, c_in=C_in, num_classes=5)
    out = vgg_forward(x, params)
    out = jax.block_until_ready(out)
    assert out.shape == (N, 5) and out.dtype == jnp.float32
    print("KERNEL_OK")
</pallas_src>

<mosaic_0001>
module attributes {stable_mosaic.version = 11 : i64} {
  func.func @_linear_kernel(%arg0: i32, %arg1: i32, %arg2: i32, %arg3: memref<784x27xf32, #tpu.memory_space<vmem>>, %arg4: memref<27x512xf32, #tpu.memory_space<vmem>>, %arg5: memref<1x512xf32, #tpu.memory_space<vmem>>, %arg6: memref<784x512xf32, #tpu.memory_space<vmem>>, %arg7: memref<784x512xf32, #tpu.memory_space<vmem>>) attributes {dimension_semantics = [#tpu.dimension_semantics<parallel>, #tpu.dimension_semantics<parallel>, #tpu.dimension_semantics<arbitrary>], iteration_bounds = array<i64: 2, 1, 1>, scalar_prefetch = 0 : i64, scratch_operands = 1 : i64, tpu.core_type = #tpu.core_type<tc>, window_params = [{transform_indices = @transform_0, window_bounds = array<i64: 784, 27>}, {transform_indices = @transform_1, window_bounds = array<i64: 27, 512>}, {transform_indices = @transform_2, window_bounds = array<i64: 1, 512>}, {transform_indices = @transform_3, window_bounds = array<i64: 784, 512>}]} {
    %c0_i32 = arith.constant 0 : i32
    %0 = arith.cmpi eq, %arg2, %c0_i32 : i32
    %1 = arith.extui %0 : i1 to i32
    %c0_i32_0 = arith.constant 0 : i32
    %2 = arith.cmpi ne, %1, %c0_i32_0 : i32
    scf.if %2 {
      %cst_10 = arith.constant 0.000000e+00 : f32
      %12 = vector.broadcast %cst_10 : f32 to vector<784x512xf32>
      %c0_11 = arith.constant 0 : index
      %c0_12 = arith.constant 0 : index
      %13 = vector.load %arg7[%c0_11, %c0_12] : memref<784x512xf32, #tpu.memory_space<vmem>>, vector<784x512xf32>
      tpu.vector_store %arg7[%c0_11, %c0_12], %12 {strides = array<i32>} : memref<784x512xf32, #tpu.memory_space<vmem>>, vector<784x512xf32>,
    } else {
    }
    %c0 = arith.constant 0 : index
    %c0_1 = arith.constant 0 : index
    %3 = vector.load %arg4[%c0, %c0_1] : memref<27x512xf32, #tpu.memory_space<vmem>>, vector<27x512xf32>
    %c0_2 = arith.constant 0 : index
    %c0_3 = arith.constant 0 : index
    %4 = vector.load %arg3[%c0_2, %c0_3] : memref<784x27xf32, #tpu.memory_space<vmem>>, vector<784x27xf32>
    %c0_4 = arith.constant 0 : index
    %c0_5 = arith.constant 0 : index
    %5 = vector.load %arg7[%c0_4, %c0_5] : memref<784x512xf32, #tpu.memory_space<vmem>>, vector<784x512xf32>
    %cst = arith.constant dense<0.000000e+00> : vector<784x512xf32>
    %6 = tpu.matmul %4, %3, %cst {dimension_numbers = #tpu.dot_dimension_numbers<[1], [0], [0], [1], [0, 0, 1, 1], [], []>} : vector<784x27xf32>, vector<27x512xf32>, vector<784x512xf32> -> vector<784x512xf32>
    %7 = arith.addf %5, %6 : vector<784x512xf32>
    %c0_6 = arith.constant 0 : index
    %c0_7 = arith.constant 0 : index
    %8 = vector.load %arg7[%c0_6, %c0_7] : memref<784x512xf32, #tpu.memory_space<vmem>>, vector<784x512xf32>
    tpu.vector_store %arg7[%c0_6, %c0_7], %7 {strides = array<i32>} : memref<784x512xf32, #tpu.memory_space<vmem>>, vector<784x512xf32>,
    %c0_i32_8 = arith.constant 0 : i32
    %9 = arith.cmpi eq, %arg2, %c0_i32_8 : i32
    %10 = arith.extui %9 : i1 to i32
    %c0_i32_9 = arith.constant 0 : i32
    %11 = arith.cmpi ne, %10, %c0_i32_9 : i32
    scf.if %11 {
      %c0_10 = arith.constant 0 : index
      %c0_11 = arith.constant 0 : index
      %12 = vector.load %arg7[%c0_10, %c0_11] : memref<784x512xf32, #tpu.memory_space<vmem>>, vector<784x512xf32>
      %c0_12 = arith.constant 0 : index
      %c0_13 = arith.constant 0 : index
      %13 = vector.load %arg5[%c0_12, %c0_13] : memref<1x512xf32, #tpu.memory_space<vmem>>, vector<1x512xf32>
      %14 = vector.broadcast %13 : vector<1x512xf32> to vector<784x512xf32>
      %15 = arith.addf %12, %14 : vector<784x512xf32>
      %cst_14 = arith.constant 0.000000e+00 : f32
      %16 = vector.broadcast %cst_14 : f32 to vector<784x512xf32>
      %17 = arith.maximumf %15, %16 : vector<784x512xf32>
      %c0_15 = arith.constant 0 : index
      %c0_16 = arith.constant 0 : index
      %18 = vector.load %arg6[%c0_15, %c0_16] : memref<784x512xf32, #tpu.memory_space<vmem>>, vector<784x512xf32>
      tpu.vector_store %arg6[%c0_15, %c0_16], %17 {strides = array<i32>} : memref<784x512xf32, #tpu.memory_space<vmem>>, vector<784x512xf32>,
    } else {
    }
    return
  }
  func.func @transform_0(%arg0: i32, %arg1: i32, %arg2: i32) -> (i32, i32) {
    %c0_i32 = arith.constant 0 : i32
    return %arg0, %arg2 : i32, i32
  }
  func.func @transform_1(%arg0: i32, %arg1: i32, %arg2: i32) -> (i32, i32) {
    %c0_i32 = arith.constant 0 : i32
    return %arg2, %arg1 : i32, i32
  }
  func.func @transform_2(%arg0: i32, %arg1: i32, %arg2: i32) -> (i32, i32) {
    %c0_i32 = arith.constant 0 : i32
    %c0_i32_0 = arith.constant 0 : i32
    return %c0_i32, %arg1 : i32, i32
  }
  func.func @transform_3(%arg0: i32, %arg1: i32, %arg2: i32) -> (i32, i32) {
    %c0_i32 = arith.constant 0 : i32
    return %arg0, %arg1 : i32, i32
  }
}

</mosaic_0001>

<bundles_post_ra>
// kernel: tpu_custom_call.1
= control target key start
LH: loop header
LB: loop body
LE: loop exit
PB: predicated region body
PF: predicated region fallthrough
CT: control target
= control target key end

     0   :  { %8 = vsyncpa [#allocation4], 0  ;;  %s7263_s0 = inlined_call_operand.vmem [shape: f32[1568,27], index: 0, kind: input, shape index: {}]   ;;  %s7264_s1 = inlined_call_operand.hbm [shape: f32[27,512], index: 1, kind: input, shape index: {}]   ;;  %s7265_s2 = inlined_call_operand.hbm [shape: f32[1,512], index: 2, kind: input, shape index: {}]   ;;  %s7266_s3 = inlined_call_operand.hbm [shape: f32[1568,512], index: 3, kind: output, shape index: {}]  }
   0x1   :  { %9 = vsyncpa [#allocation7], 0 }
   0x2   :  { %10 = vsyncpa [#allocation5], 0 }
   0x3   :  { %12 = vsyncpa [#allocation5 + $0x1], 0  ;;  %s5768_s12 = smov 0   ;;  %s5770_s13 = smov 0  }
   0x4   :  { %s5772_s14 = smov 0   ;;  %s5774_s15 = smov 0  }
   0x5   :  { %s5776_s16 = smov 0   ;;  %s5778_s17 = smov 0  }
   0x6 LB: > { %s5275_s18 = sadd.s32 4294967295, %s5737_s17   ;;  %s5276_s19 = sadd.s32 4294967294, %s5737_s17   ;;  %s5737_s17 = sphi %s5778_s17, %s18_s17   ;;  %s5733_s16 = sphi %s5776_s16, %s7286_s16   ;;  %s5729_s15 = sphi %s5774_s15, %s7285_s15   ;;  %s5725_s14 = sphi %s5772_s14, %s7284_s14   ;;  %s5721_s13 = sphi %s5770_s13, %s7283_s13   ;;  %s5717_s12 = sphi %s5768_s12, %s7282_s12  }
   0x7   : > { %s37_s20 = sadd.s32 1, %s5733_s16  ;;  %s128_s21 = sadd.s32 1, %s5725_s14 }
   0x8   : > { %p39_p0 = scmp.ge.s32.totalorder %s37_s20, 2  ;;  %p138_p1 = scmp.ne.s32.totalorder %s5725_s14, %s5721_s13 }
   0x9   : > { %p139_p2 = scmp.eq.s32.totalorder %s5275_s18, 1  ;;  %p144_p3 = scmp.ne.s32.totalorder %s5721_s13, %s5717_s12 }
   0xa   : > { %s7288_s20 = smov (%p39_p0, %s37_s20), 0  ;;  %p145_p5 = scmp.eq.s32.totalorder %s5276_s19, 1 }
   0xb   : > { %p5808_p4 = por %p139_p2, %p138_p1  ;;  %s123_s23 = ssub.s32 %s5733_s16, %s7288_s20 }
   0xc   : > { %p5277_p6 = scmp.ge.s32.totalorder %s5737_s17, 1  ;;  %p126_p7 = scmp.eq.s32.totalorder %s123_s23, 0 }
   0xd   : > { %s7271_s22 = scalar_select %p5808_p4, 1, 0 }
   0xe   : > { %p5815_p8 = por %p145_p5, %p144_p3  ;;  %p152_p9 = scmp.lt.s32.totalorder %s5737_s17, 3 }
   0xf   : > { %s5821_s25 = scalar_select %p126_p7, %s5725_s14, %s128_s21  }
  0x10   : > { %s7272_s24 = scalar_select %p5815_p8, 1, 0 }
  0x11   : > { %p5823_p10 = pnand %p5277_p6, %p152_p9  ;;  %p5827_p11 = scmp.eq.s32.totalorder %s5275_s18, 0 }
  0x12   : > { %s5739_s28 = smov [#allocation3]   ;;  %s5740_s4 = smov [#allocation6]  }
  0x13   : > { %s7273_s26 = scalar_select %p5823_p10, 1, 0 }
  0x14   : > { %s7274_s27 = scalar_select %p5827_p11, 1, 0 }
  0x15   : > { %p5523_p12 = pneg %p5823_p10  ;;  %s170_s29 = sshll.u32 %s5739_s28, 4  ;;  %s171_s29 = int_to_ptr.vmem [resolvable:$true] %s170_s29 }
  0x16   : > { %s187_s5 = sshll.u32 %s5740_s4, 4  ;;  %s5595_s8 = scalar_lea.hbm %s7264_s1, 2048  ;;  %s5839_s5 = int_to_ptr.vmem [resolvable:$true] %s187_s5 }
  0x17   : > { %p5835_p13 = pnand %p5827_p11, %p5523_p12  ;;  %p5596_p0 = scmp.ne.s32.totalorder %s7264_s1, %s5595_s8 }
  0x18   : > { %p5602_p5 = scmp.lt.u32.totalorder %s5595_s8, %s7264_s1 }
  0x19   : > { %p5597_p1 = pneg %p5835_p13 }
  0x1b   : > { %p5598_p2 = pnand %p5597_p1, %p5596_p0 }
  0x1d   : > { %p5599_p3 = pneg %p5598_p2 }
  0x1f   : > { %p5604_p6 = pnand %p5602_p5, %p5599_p3 }
  0x21   : > { %5607 = shalt.err (!%p5604_p6)
}
  0x22   : > { %s5608_s19 = scalar_lea.vmem %s171_s29, 2048  ;;  %p5616_p8 = scmp.lt.s32.totalorder %s171_s29, %s171_s29 }
  0x23   : > { %p5609_p7 = scmp.ne.s32.totalorder %s171_s29, %s5608_s19  ;;  %p5617_p4 = scmp.lt.s32.totalorder %s5608_s19, %s5608_s19 }
  0x25   : > { %p5611_p9 = pnand %p5609_p7, %p5597_p1  ;;  %p5618_p11 = por %p5617_p4, %p5616_p8 }
  0x27   : > { %p5612_p12 = pneg %p5611_p9 }
  0x29   : > { %p5619_p10 = pnand %p5618_p11, %p5612_p12 }
  0x2b   : > { %5622 = shalt.err (!%p5619_p10)
}
  0x2c   : > { %s5741_s21 = smov 512   ;;  %s5742_s23 = smov 32  }
  0x2d   : > { %5526 = dma.hbm_to_vmem [thread:$0]  (!%p5835_p13), %s7264_s1, 2048, %s171_s29, [#allocation4], %s5741_s21, %s5741_s21, %s5742_s23  }
  0x2e   : > { %s5623_s8 = scalar_lea.hbm %s7265_s2, 64 }
  0x2f   : > { %p5624_p0 = scmp.ne.s32.totalorder %s7265_s2, %s5623_s8  ;;  %p5630_p10 = scmp.lt.u32.totalorder %s5623_s8, %s7265_s2 }
  0x31   : > { %p5626_p4 = pnand %p5624_p0, %p5597_p1 }
  0x33   : > { %p5627_p8 = pneg %p5626_p4 }
  0x35   : > { %p5632_p11 = pnand %p5630_p10, %p5627_p8 }
  0x37   : > { %5635 = shalt.err (!%p5632_p11)
}
  0x38   : > { %s5636_s29 = scalar_lea.vmem %s5839_s5, 64  ;;  %p5644_p6 = scmp.lt.s32.totalorder %s5839_s5, %s5839_s5 }
  0x39   : > { %p5637_p2 = scmp.ne.s32.totalorder %s5839_s5, %s5636_s29  ;;  %p5645_p7 = scmp.lt.s32.totalorder %s5636_s29, %s5636_s29 }
  0x3b   : > { %p5639_p3 = pnand %p5637_p2, %p5597_p1  ;;  %p5646_p9 = por %p5645_p7, %p5644_p6 }
  0x3d   : > { %p5640_p5 = pneg %p5639_p3 }
  0x3f   : > { %p5647_p12 = pnand %p5646_p9, %p5640_p5 }
  0x41   : > { %5650 = shalt.err (!%p5647_p12)
}
  0x42   : > { %5529 = dma.hbm_to_vmem [thread:$0]  (!%p5835_p13), %s7265_s2, 64, %s5839_s5, [#allocation7]  }
  0x43   : > { %p7276_p0 = scmp.ne.s32.totalorder %s7273_s26, 0 }
  0x44   : > { %p7277_p4 = scmp.ne.s32.totalorder (!%p7276_p0), %s7274_s27, 0 }
  0x45   : > { %212 = sbr.rel (%p7276_p0) target bundleno = 713 (0x2c9), region = 32 }
  0x4c   : > { %5704 = dma.done.wait (%p7277_p4), [#allocation4], 2048  }
  0x4d   : > { %5706 = vsyncadd (%p7277_p4), [#allocation4], 4294965248 }
  0x4e   : > { %5708 = dma.done.wait (%p7277_p4), [#allocation7], 64  }
  0x4f   : > { %5710 = vsyncadd (%p7277_p4), [#allocation7], 4294967232  ;;  %s243_s30 = smul.u32 98, %s5729_s15  ;;  %v5743_v0 = vmov 0.0   ;;  %vm1454_vm0 = vcmask 1042432   ;;  %vm5744_vm1 = vmmov 1  }
  0x50   : > { %1531 = vmatprep.mubr.f32.mxu0 %v5743_v0  ;;  %2184 = vmatprep.mubr.f32.mxu1 %v5743_v0  ;;  %vm5903_vm2 = vmpackc.low %vm1454_vm0, %vm5744_vm1  ;;  %v654_v2 = vld [vmem:[#allocation3 + $0x8] sm:$0xff]  ;;  %v656_v4 = vld [vmem:[#allocation3 + $0x18] sm:$0xff]  ;;  %vm1159_vm3 = vcmask 220160   ;;  %s240_s28 = sand.u32 1, %s5721_s13   ;;  %s5491_s7 = smul.u32 50176, %s5729_s15 }
  0x51   : > { %p244_p13 = scmp.lt.s32.totalorder %s243_s30, 195  ;;  %v658_v3 = vld [vmem:[#allocation3 + $0x28] sm:$0xff]  ;;  %v660_v6 = vld [vmem:[#allocation3 + $0x38] sm:$0xff]  ;;  %v653_v7 = vld [vmem:[#allocation3] sm:$0xff]  ;;  %s5512_s4 = smul.u32 3136, %s240_s28 }
  0x52   : > { %v5492_v5 = vpack.c.bf16 %v658_v3, %v654_v2  ;;  %v657_v8 = vld [vmem:[#allocation3 + $0x20] sm:$0xff]  ;;  %v5502_v9 = vpack.c.bf16 %v660_v6, %v656_v4  ;;  %v655_v11 = vld [vmem:[#allocation3 + $0x10] sm:$0xff]  ;;  %v662_v13 = vld [vmem:[#allocation3 + $0x48] sm:$0xff]  ;;  %s7207_s10 = scalar_lea.hbm %s7266_s3, %s5491_s7  ;;  %s7217_s11 = scalar_lea.sflag [#allocation5], %s240_s28 }
  0x53   : > { %s7290_s30 = smov (!%p244_p13, %s243_s30), 195  ;;  %v5494_v10 = vpack.c.bf16 %v657_v8, %v653_v7  ;;  %v659_v12 = vld [vmem:[#allocation3 + $0x30] sm:$0xff]  ;;  %v666_v15 = vld [vmem:[#allocation3 + $0x68] sm:$0x7]  ;;  %v664_v16 = vld [vmem:[#allocation3 + $0x58] sm:$0xff]  ;;  %s6207_s6 = scalar_lea.vmem [#allocation8], %s5512_s4 }
  0x54   : > { %s5284_s26 = sshll.u32 %s7290_s30, 3  ;;  %5493 = vmatprep.subr.bf16.mxu0 %v5492_v5  ;;  %v5504_v14 = vpack.c.bf16 %v659_v12, %v655_v11  ;;  %v668_v17 = vld [vmem:[#allocation3 + $0x78] sm:$0x7]  ;;  %5503 = vmatprep.subr.bf16.mxu1 %v5502_v9  ;;  %v5496_v18 = vpack.c.bf16 %v666_v15, %v662_v13  ;;  %v661_v20 = vld [vmem:[#allocation3 + $0x40] sm:$0xff]  ;;  %v663_v22 = vld [vmem:[#allocation3 + $0x50] sm:$0xff]  ;;  %v3954_v13 = vlaneseq  ;;  %s5167_s8 = sshll.u32 %s6207_s6, 4  ;;  %s7209_s8 = int_to_ptr.vmem [resolvable:$true] %s5167_s8 }
  0x55   : > { %5495 = vmatpush1.bf16.msra.mxu0 %v5494_v10  ;;  %v5506_v19 = vpack.c.bf16 %v668_v17, %v664_v16  ;;  %v665_v21 = vld [vmem:[#allocation3 + $0x60] sm:$0x7]  ;;  %v667_v24 = vld [vmem:[#allocation3 + $0x70] sm:$0x7]  ;;  %s5911_s23 = scalar_lea.vmem %s7263_s0, %s5284_s26  ;;  %s5651_s18 = scalar_lea.vmem %s7209_s8, 50176 }
  0x56   : > { %5505 = vmatpush1.bf16.msra.mxu1 %v5504_v14  ;;  %v5499_v23 = vpack.c.bf16 %v665_v21, %v661_v20  ;;  %5498 = vmatprep.subr.msk.bf16.mxu0 %vm5903_vm2, %v5496_v18  ;;  %v5509_v25 = vpack.c.bf16 %v667_v24, %v663_v22  ;;  %v669_v26 = vld [vmem:[%s5911_s23] sm:$0xff]  ;;  %v670_v27 = vld [vmem:[%s5911_s23 + $0x8] sm:$0xff]  ;;  %v671_v28 = vld [vmem:[%s5911_s23 + $0x10] sm:$0xff]  ;;  %v3955_v15 = vshrl.u32 %v3954_v13, 7  ;;  %p5652_p1 = scmp.ne.s32.totalorder %s7209_s8, %s5651_s18  ;;  %p7280_p8 = scmp.ne.s32.totalorder %s7271_s22, 0 }
  0x57   : > { %5508 = vmatprep.subr.msk.bf16.mxu1 %vm5903_vm2, %v5506_v19  ;;  %v672_v29 = vld [vmem:[%s5911_s23 + $0x18] sm:$0xff]  ;;  %v673_v30 = vld [vmem:[%s5911_s23 + $0x20] sm:$0xff]  ;;  %v674_v31 = vld [vmem:[%s5911_s23 + $0x28] sm:$0xff]  ;;  %s5745_s29 = smov [#allocation8]  }
  0x58   : > { %v675_v32 = vld [vmem:[%s5911_s23 + $0x30] sm:$0xff]  ;;  %v676_v33 = vld [vmem:[%s5911_s23 + $0x38] sm:$0xff]  ;;  %v677_v34 = vld [vmem:[%s5911_s23 + $0x40] sm:$0xff]  ;;  %v3956_v17 = vsub.s32 0, %v3955_v15  ;;  %v3964_v20 = vsub.s32 2, %v3955_v15  ;;  %v3960_v21 = vsub.s32 1, %v3955_v15  ;;  %p5653_p10 = pnand %p5652_p1, %p7280_p8 }
  0x59   : > { %5501 = vmatpush1.bf16.msk.msra.mxu0 %vm5903_vm2, %v5499_v23  ;;  %v678_v35 = vld [vmem:[%s5911_s23 + $0x48] sm:$0xff]  ;;  %v679_v36 = vld [vmem:[%s5911_s23 + $0x50] sm:$0xff]  ;;  %v680_v37 = vld [vmem:[%s5911_s23 + $0x58] sm:$0xff]  ;;  %v3968_v22 = vsub.s32 3, %v3955_v15  ;;  %s5655_s19 = sshll.u32 %s5745_s29, 4  ;;  %s5656_s19 = int_to_ptr.vmem [resolvable:$false] %s5655_s19 }
  0x5a   : > { %5511 = vmatpush1.bf16.msk.msra.mxu1 %vm5903_vm2, %v5509_v25  ;;  %v681_v38 = vld [vmem:[%s5911_s23 + $0x60] sm:$0xff]  ;;  %v682_v39 = vld [vmem:[%s5911_s23 + $0x68] sm:$0xff]  ;;  %v683_v40 = vld [vmem:[%s5911_s23 + $0x70] sm:$0xff]  ;;  %p5654_p11 = pneg %p5653_p10  ;;  %s5657_s21 = scalar_lea.vmem %s5656_s19, 100352 }
  0x5b   : > { %v684_v41 = vld [vmem:[%s5911_s23 + $0x78] sm:$0xff]  ;;  %v685_v42 = vld [vmem:[%s5911_s23 + $0x80] sm:$0xff]  ;;  %v686_v43 = vld [vmem:[%s5911_s23 + $0x88] sm:$0xff]  ;;  %p5658_p2 = scmp.lt.s32.totalorder %s7209_s8, %s5656_s19  ;;  %p5659_p3 = scmp.lt.s32.totalorder %s5657_s21, %s5651_s18 }
  0x5c   : > { %5287 = vmatmul.mubr.msk.f32.vlgmr.msra.gmra.mrb[0].mxu0 %vm1159_vm3, %v669_v26  ;;  %v687_v44 = vld [vmem:[%s5911_s23 + $0x90] sm:$0xff]  ;;  %v688_v45 = vld [vmem:[%s5911_s23 + $0x98] sm:$0xff]  ;;  %v689_v46 = vld [vmem:[%s5911_s23 + $0xa0] sm:$0xff] }
  0x5d   : > { %5387 = vmatmul.mubr.msk.f32.vlgmr.msra.gmra.mrb[0].mxu1 %vm1159_vm3, %v669_v26  ;;  %1537 = vmatprep.mubr.f32.mxu0 %v5743_v0  ;;  %v690_v47 = vld [vmem:[%s5911_s23 + $0xa8] sm:$0xff]  ;;  %v691_v48 = vld [vmem:[%s5911_s23 + $0xb0] sm:$0xff]  ;;  %v692_v49 = vld [vmem:[%s5911_s23 + $0xb8] sm:$0xff]  ;;  %p5660_p5 = por %p5659_p3, %p5658_p2 }
  0x5e   : > { %2190 = vmatprep.mubr.f32.mxu1 %v5743_v0  ;;  %v693_v50 = vld [vmem:[%s5911_s23 + $0xc0] sm:$0xff]  ;;  %v694_v51 = vld [vmem:[%s5911_s23 + $0xc8] sm:$0xff]  ;;  %v695_v52 = vld [vmem:[%s5911_s23 + $0xd0] sm:$0xff] }
  0x5f   : > { %v696_v53 = vld [vmem:[%s5911_s23 + $0xd8] sm:$0xff]  ;;  %v697_v54 = vld [vmem:[%s5911_s23 + $0xe0] sm:$0xff]  ;;  %v698_v55 = vld [vmem:[%s5911_s23 + $0xe8] sm:$0xff]  ;;  %p5661_p6 = pnand %p5660_p5, %p5654_p11 }
  0x60   : > { %5288 = vmatmul.mubr.msk.f32.gmra.mrb[2].mxu0 %vm1159_vm3, %v670_v27  ;;  %v699_v56 = vld [vmem:[%s5911_s23 + $0xf0] sm:$0xff]  ;;  %v700_v57 = vld [vmem:[%s5911_s23 + $0xf8] sm:$0xff]  ;;  %v701_v58 = vld [vmem:[%s5911_s23 + $0x100] sm:$0xff] }
  0x61   : > { %5388 = vmatmul.mubr.msk.f32.gmra.mrb[2].mxu1 %vm1159_vm3, %v670_v27  ;;  %1543 = vmatprep.mubr.f32.mxu0 %v5743_v0  ;;  %v702_v59 = vld [vmem:[%s5911_s23 + $0x108] sm:$0xff]  ;;  %v703_v60 = vld [vmem:[%s5911_s23 + $0x110] sm:$0xff]  ;;  %v704_v61 = vld [vmem:[%s5911_s23 + $0x118] sm:$0xff] }
  0x62   : > { %2196 = vmatprep.mubr.f32.mxu1 %v5743_v0  ;;  %v705_v62 = vld [vmem:[%s5911_s23 + $0x120] sm:$0xff]  ;;  %v706_v63 = vld [vmem:[%s5911_s23 + $0x128] sm:$0xff]  ;;  %v707_v1 = vld [vmem:[%s5911_s23 + $0x130] sm:$0xff] }
  0x63   : > { %v708_v2 = vld [vmem:[%s5911_s23 + $0x138] sm:$0xff]  ;;  %v709_v3 = vld [vmem:[%s5911_s23 + $0x140] sm:$0xff]  ;;  %v710_v4 = vld [vmem:[%s5911_s23 + $0x148] sm:$0xff] }
  0x64   : > { %5289 = vmatmul.mubr.msk.f32.gmra.mrb[4].mxu0 %vm1159_vm3, %v671_v28  ;;  %v711_v5 = vld [vmem:[%s5911_s23 + $0x150] sm:$0xff]  ;;  %v712_v6 = vld [vmem:[%s5911_s23 + $0x158] sm:$0xff]  ;;  %v713_v7 = vld [vmem:[%s5911_s23 + $0x160] sm:$0xff] }
  0x65   : > { %5389 = vmatmul.mubr.msk.f32.gmra.mrb[4].mxu1 %vm1159_vm3, %v671_v28  ;;  %1549 = vmatprep.mubr.f32.mxu0 %v5743_v0  ;;  %v714_v8 = vld [vmem:[%s5911_s23 + $0x168] sm:$0xff]  ;;  %v715_v9 = vld [vmem:[%s5911_s23 + $0x170] sm:$0xff]  ;;  %v716_v10 = vld [vmem:[%s5911_s23 + $0x178] sm:$0xff] }
  0x66   : > { %2202 = vmatprep.mubr.f32.mxu1 %v5743_v0  ;;  %v717_v11 = vld [vmem:[%s5911_s23 + $0x180] sm:$0xff]  ;;  %v718_v12 = vld [vmem:[%s5911_s23 + $0x188] sm:$0xff]  ;;  %v719_v14 = vld [vmem:[%s5911_s23 + $0x190] sm:$0xff] }
  0x67   : > { %v720_v16 = vld [vmem:[%s5911_s23 + $0x198] sm:$0xff]  ;;  %v721_v18 = vld [vmem:[%s5911_s23 + $0x1a0] sm:$0xff]  ;;  %v722_v26 = vld [vmem:[%s5911_s23 + $0x1a8] sm:$0xff] }
  0x68   : > { %5290 = vmatmul.mubr.msk.f32.gmra.mrb[6].mxu0 %vm1159_vm3, %v672_v29  ;;  %v3952_v19 = vld [vmem:[#allocation6] sm:$0xf] }
  0x69   : > { %5390 = vmatmul.mubr.msk.f32.gmra.mrb[6].mxu1 %vm1159_vm3, %v672_v29  ;;  %1555 = vmatprep.mubr.f32.mxu0 %v5743_v0  ;;  %v6184_v23 = vrot.slane %v3952_v19, %v3956_v17  ;;  %v6190_v24 = vrot.slane %v3952_v19, %v3964_v20  ;;  %v6192_v25 = vrot.slane %v3952_v19, %v3960_v21 }
  0x6a   : > { %2208 = vmatprep.mubr.f32.mxu1 %v5743_v0  ;;  %v6196_v27 = vrot.slane %v3952_v19, %v3968_v22 }
  0x6c   : > { %5291 = vmatmul.mubr.msk.f32.gmra.mrb[8].mxu0 %vm1159_vm3, %v673_v30 }
  0x6d   : > { %5391 = vmatmul.mubr.msk.f32.gmra.mrb[8].mxu1 %vm1159_vm3, %v673_v30  ;;  %1561 = vmatprep.mubr.f32.mxu0 %v5743_v0 }
  0x6e   : > { %2214 = vmatprep.mubr.f32.mxu1 %v5743_v0 }
  0x70   : > { %5292 = vmatmul.mubr.msk.f32.gmra.mrb[10].mxu0 %vm1159_vm3, %v674_v31 }
  0x71   : > { %5392 = vmatmul.mubr.msk.f32.gmra.mrb[10].mxu1 %vm1159_vm3, %v674_v31  ;;  %1567 = vmatprep.mubr.f32.mxu0 %v5743_v0 }
  0x72   : > { %2220 = vmatprep.mubr.f32.mxu1 %v5743_v0 }
  0x74   : > { %5293 = vmatmul.mubr.msk.f32.gmra.mrb[12].mxu0 %vm1159_vm3, %v675_v32 }
  0x75   : > { %5393 = vmatmul.mubr.msk.f32.gmra.mrb[12].mxu1 %vm1159_vm3, %v675_v32  ;;  %1573 = vmatprep.mubr.f32.mxu0 %v5743_v0 }
  0x76   : > { %2226 = vmatprep.mubr.f32.mxu1 %v5743_v0 }
  0x78   : > { %5294 = vmatmul.mubr.msk.f32.gmra.mrb[14].mxu0 %vm1159_vm3, %v676_v33 }
  0x79   : > { %5394 = vmatmul.mubr.msk.f32.gmra.mrb[14].mxu1 %vm1159_vm3, %v676_v33  ;;  %1579 = vmatprep.mubr.f32.mxu0 %v5743_v0 }
  0x7a   : > { %2232 = vmatprep.mubr.f32.mxu1 %v5743_v0 }
  0x7c   : > { %5295 = vmatmul.mubr.msk.f32.gmra.mrb[16].mxu0 %vm1159_vm3, %v677_v34 }
  0x7d   : > { %5395 = vmatmul.mubr.msk.f32.gmra.mrb[16].mxu1 %vm1159_vm3, %v677_v34  ;;  %1585 = vmatprep.mubr.f32.mxu0 %v5743_v0 }
  0x7e   : > { %2238 = vmatprep.mubr.f32.mxu1 %v5743_v0 }
  0x80   : > { %5296 = vmatmul.mubr.msk.f32.gmra.mrb[18].mxu0 %vm1159_vm3, %v678_v35 }
  0x81   : > { %5396 = vmatmul.mubr.msk.f32.gmra.mrb[18].mxu1 %vm1159_vm3, %v678_v35  ;;  %1591 = vmatprep.mubr.f32.mxu0 %v5743_v0  ;;  %v723_v35 = vld [vmem:[%s5911_s23 + $0x1b0] sm:$0xff] }
  0x82   : > { %2244 = vmatprep.mubr.f32.mxu1 %v5743_v0 }
  0x84   : > { %5297 = vmatmul.mubr.msk.f32.gmra.mrb[20].mxu0 %vm1159_vm3, %v679_v36 }
  0x85   : > { %5397 = vmatmul.mubr.msk.f32.gmra.mrb[20].mxu1 %vm1159_vm3, %v679_v36  ;;  %1597 = vmatprep.mubr.f32.mxu0 %v5743_v0 }
  0x86   : > { %2250 = vmatprep.mubr.f32.mxu1 %v5743_v0 }
  0x88   : > { %5298 = vmatmul.mubr.msk.f32.gmra.mrb[22].mxu0 %vm1159_vm3, %v680_v37 }
  0x89   : > { %5398 = vmatmul.mubr.msk.f32.gmra.mrb[22].mxu1 %vm1159_vm3, %v680_v37  ;;  %1603 = vmatprep.mubr.f32.mxu0 %v5743_v0 }
  0x8a   : > { %2256 = vmatprep.mubr.f32.mxu1 %v5743_v0 }
  0x8c   : > { %5299 = vmatmul.mubr.msk.f32.gmra.mrb[24].mxu0 %vm1159_vm3, %v681_v38 }
  0x8d   : > { %5399 = vmatmul.mubr.msk.f32.gmra.mrb[24].mxu1 %vm1159_vm3, %v681_v38  ;;  %1609 = vmatprep.mubr.f32.mxu0 %v5743_v0 }
  0x8e   : > { %2262 = vmatprep.mubr.f32.mxu1 %v5743_v0 }
  0x90   : > { %5300 = vmatmul.mubr.msk.f32.gmra.mrb[26].mxu0 %vm1159_vm3, %v682_v39 }
  0x91   : > { %5400 = vmatmul.mubr.msk.f32.gmra.mrb[26].mxu1 %vm1159_vm3, %v682_v39  ;;  %1615 = vmatprep.mubr.f32.mxu0 %v5743_v0 }
  0x92   : > { %2268 = vmatprep.mubr.f32.mxu1 %v5743_v0 }
  0x94   : > { %5301 = vmatmul.mubr.msk.f32.gmra.mrb[28].mxu0 %vm1159_vm3, %v683_v40 }
  0x95   : > { %5401 = vmatmul.mubr.msk.f32.gmra.mrb[28].mxu1 %vm1159_vm3, %v683_v40  ;;  %1621 = vmatprep.mubr.f32.mxu0 %v5743_v0 }
  0x96   : > { %2274 = vmatprep.mubr.f32.mxu1 %v5743_v0 }
  0x98   : > { %5302 = vmatmul.mubr.msk.f32.gmra.mrb[30].mxu0 %vm1159_vm3, %v684_v41 }
  0x99   : > { %5402 = vmatmul.mubr.msk.f32.gmra.mrb[30].mxu1 %vm1159_vm3, %v684_v41  ;;  %1627 = vmatprep.mubr.f32.mxu0 %v5743_v0 }
  0x9a   : > { %2280 = vmatprep.mubr.f32.mxu1 %v5743_v0 }
  0x9c   : > { %5303 = vmatmul.mubr.msk.f32.gmra.mrb[32].mxu0 %vm1159_vm3, %v685_v42 }
  0x9d   : > { %5403 = vmatmul.mubr.msk.f32.gmra.mrb[32].mxu1 %vm1159_vm3, %v685_v42  ;;  %1633 = vmatprep.mubr.f32.mxu0 %v5743_v0 }
  0x9e   : > { %2286 = vmatprep.mubr.f32.mxu1 %v5743_v0 }
  0xa0   : > { %5304 = vmatmul.mubr.msk.f32.gmra.mrb[34].mxu0 %vm1159_vm3, %v686_v43 }
  0xa1   : > { %5404 = vmatmul.mubr.msk.f32.gmra.mrb[34].mxu1 %vm1159_vm3, %v686_v43  ;;  %1639 = vmatprep.mubr.f32.mxu0 %v5743_v0 }
  0xa2   : > { %2292 = vmatprep.mubr.f32.mxu1 %v5743_v0 }
  0xa4   : > { %5305 = vmatmul.mubr.msk.f32.gmra.mrb[36].mxu0 %vm1159_vm3, %v687_v44 }
  0xa5   : > { %5405 = vmatmul.mubr.msk.f32.gmra.mrb[36].mxu1 %vm1159_vm3, %v687_v44  ;;  %1645 = vmatprep.mubr.f32.mxu0 %v5743_v0 }
  0xa6   : > { %2298 = vmatprep.mubr.f32.mxu1 %v5743_v0 }
  0xa8   : > { %5306 = vmatmul.mubr.msk.f32.gmra.mrb[38].mxu0 %vm1159_vm3, %v688_v45 }
  0xa9   : > { %5406 = vmatmul.mubr.msk.f32.gmra.mrb[38].mxu1 %vm1159_vm3, %v688_v45  ;;  %1651 = vmatprep.mubr.f32.mxu0 %v5743_v0 }
  0xaa   : > { %2304 = vmatprep.mubr.f32.mxu1 %v5743_v0 }
  0xac   : > { %5307 = vmatmul.mubr.msk.f32.gmra.mrb[40].mxu0 %vm1159_vm3, %v689_v46 }
  0xad   : > { %5407 = vmatmul.mubr.msk.f32.gmra.mrb[40].mxu1 %vm1159_vm3, %v689_v46  ;;  %1657 = vmatprep.mubr.f32.mxu0 %v5743_v0 }
  0xae   : > { %2310 = vmatprep.mubr.f32.mxu1 %v5743_v0 }
  0xb0   : > { %5308 = vmatmul.mubr.msk.f32.gmra.mrb[42].mxu0 %vm1159_vm3, %v690_v47 }
  0xb1   : > { %5408 = vmatmul.mubr.msk.f32.gmra.mrb[42].mxu1 %vm1159_vm3, %v690_v47  ;;  %1663 = vmatprep.mubr.f32.mxu0 %v5743_v0 }
  0xb2   : > { %2316 = vmatprep.mubr.f32.mxu1 %v5743_v0 }
  0xb4   : > { %5309 = vmatmul.mubr.msk.f32.gmra.mrb[44].mxu0 %vm1159_vm3, %v691_v48 }
  0xb5   : > { %5409 = vmatmul.mubr.msk.f32.gmra.mrb[44].mxu1 %vm1159_vm3, %v691_v48  ;;  %1669 = vmatprep.mubr.f32.mxu0 %v5743_v0  ;;  %v724_v48 = vld [vmem:[%s5911_s23 + $0x1b8] sm:$0xff] }
  0xb6   : > { %2322 = vmatprep.mubr.f32.mxu1 %v5743_v0 }
  0xb8   : > { %5310 = vmatmul.mubr.msk.f32.gmra.mrb[46].mxu0 %vm1159_vm3, %v692_v49 }
  0xb9   : > { %5410 = vmatmul.mubr.msk.f32.gmra.mrb[46].mxu1 %vm1159_vm3, %v692_v49  ;;  %1675 = vmatprep.mubr.f32.mxu0 %v5743_v0 }
  0xba   : > { %2328 = vmatprep.mubr.f32.mxu1 %v5743_v0 }
  0xbc   : > { %5311 = vmatmul.mubr.msk.f32.gmra.mrb[48].mxu0 %vm1159_vm3, %v693_v50 }
  0xbd   : > { %5411 = vmatmul.mubr.msk.f32.gmra.mrb[48].mxu1 %vm1159_vm3, %v693_v50  ;;  %1681 = vmatprep.mubr.f32.mxu0 %v5743_v0 }
  0xbe   : > { %2334 = vmatprep.mubr.f32.mxu1 %v5743_v0 }
  0xc0   : > { %5312 = vmatmul.mubr.msk.f32.gmra.mrb[50].mxu0 %vm1159_vm3, %v694_v51 }
  0xc1   : > { %5412 = vmatmul.mubr.msk.f32.gmra.mrb[50].mxu1 %vm1159_vm3, %v694_v51  ;;  %1687 = vmatprep.mubr.f32.mxu0 %v5743_v0 }
  0xc2   : > { %2340 = vmatprep.mubr.f32.mxu1 %v5743_v0 }
  0xc4   : > { %5313 = vmatmul.mubr.msk.f32.gmra.mrb[52].mxu0 %vm1159_vm3, %v695_v52 }
  0xc5   : > { %5413 = vmatmul.mubr.msk.f32.gmra.mrb[52].mxu1 %vm1159_vm3, %v695_v52  ;;  %1693 = vmatprep.mubr.f32.mxu0 %v5743_v0 }
  0xc6   : > { %2346 = vmatprep.mubr.f32.mxu1 %v5743_v0 }
  0xc8   : > { %5314 = vmatmul.mubr.msk.f32.gmra.mrb[54].mxu0 %vm1159_vm3, %v696_v53 }
  0xc9   : > { %5414 = vmatmul.mubr.msk.f32.gmra.mrb[54].mxu1 %vm1159_vm3, %v696_v53  ;;  %1699 = vmatprep.mubr.f32.mxu0 %v5743_v0 }
  0xca   : > { %2352 = vmatprep.mubr.f32.mxu1 %v5743_v0 }
  0xcc   : > { %5315 = vmatmul.mubr.msk.f32.gmra.mrb[56].mxu0 %vm1159_vm3, %v697_v54 }
  0xcd   : > { %5415 = vmatmul.mubr.msk.f32.gmra.mrb[56].mxu1 %vm1159_vm3, %v697_v54  ;;  %1705 = vmatprep.mubr.f32.mxu0 %v5743_v0 }
  0xce   : > { %2358 = vmatprep.mubr.f32.mxu1 %v5743_v0 }
  0xd0   : > { %5316 = vmatmul.mubr.msk.f32.gmra.mrb[58].mxu0 %vm1159_vm3, %v698_v55 }
  0xd1   : > { %5416 = vmatmul.mubr.msk.f32.gmra.mrb[58].mxu1 %vm1159_vm3, %v698_v55  ;;  %1711 = vmatprep.mubr.f32.mxu0 %v5743_v0 }
  0xd2   : > { %2364 = vmatprep.mubr.f32.mxu1 %v5743_v0 }
  0xd4   : > { %5317 = vmatmul.mubr.msk.f32.gmra.mrb[60].mxu0 %vm1159_vm3, %v699_v56 }
  0xd5   : > { %5417 = vmatmul.mubr.msk.f32.gmra.mrb[60].mxu1 %vm1159_vm3, %v699_v56  ;;  %1717 = vmatprep.mubr.f32.mxu0 %v5743_v0 }
  0xd6   : > { %2370 = vmatprep.mubr.f32.mxu1 %v5743_v0 }
  0xd8   : > { %5318 = vmatmul.mubr.msk.f32.gmra.mrb[62].mxu0 %vm1159_vm3, %v700_v57 }
  0xd9   : > { %5418 = vmatmul.mubr.msk.f32.gmra.mrb[62].mxu1 %vm1159_vm3, %v700_v57  ;;  %1723 = vmatprep.mubr.f32.mxu0 %v5743_v0 }
  0xda   : > { %2376 = vmatprep.mubr.f32.mxu1 %v5743_v0 }
  0xdc   : > { %5319 = vmatmul.mubr.msk.f32.gmra.mrb[64].mxu0 %vm1159_vm3, %v701_v58 }
  0xdd   : > { %5419 = vmatmul.mubr.msk.f32.gmra.mrb[64].mxu1 %vm1159_vm3, %v701_v58  ;;  %1729 = vmatprep.mubr.f32.mxu0 %v5743_v0 }
  0xde   : > { %2382 = vmatprep.mubr.f32.mxu1 %v5743_v0 }
  0xe0   : > { %5320 = vmatmul.mubr.msk.f32.gmra.mrb[66].mxu0 %vm1159_vm3, %v702_v59 }
  0xe1   : > { %5420 = vmatmul.mubr.msk.f32.gmra.mrb[66].mxu1 %vm1159_vm3, %v702_v59  ;;  %1735 = vmatprep.mubr.f32.mxu0 %v5743_v0 }
  0xe2   : > { %2388 = vmatprep.mubr.f32.mxu1 %v5743_v0 }
  0xe4   : > { %5321 = vmatmul.mubr.msk.f32.gmra.mrb[68].mxu0 %vm1159_vm3, %v703_v60 }
  0xe5   : > { %5421 = vmatmul.mubr.msk.f32.gmra.mrb[68].mxu1 %vm1159_vm3, %v703_v60  ;;  %1741 = vmatprep.mubr.f32.mxu0 %v5743_v0 }
  0xe6   : > { %2394 = vmatprep.mubr.f32.mxu1 %v5743_v0 }
  0xe8   : > { %5322 = vmatmul.mubr.msk.f32.gmra.mrb[70].mxu0 %vm1159_vm3, %v704_v61 }
  0xe9   : > { %5422 = vmatmul.mubr.msk.f32.gmra.mrb[70].mxu1 %vm1159_vm3, %v704_v61  ;;  %1747 = vmatprep.mubr.f32.mxu0 %v5743_v0  ;;  %v725_v61 = vld [vmem:[%s5911_s23 + $0x1c0] sm:$0xff] }
  0xea   : > { %2400 = vmatprep.mubr.f32.mxu1 %v5743_v0 }
  0xec   : > { %5323 = vmatmul.mubr.msk.f32.gmra.mrb[72].mxu0 %vm1159_vm3, %v705_v62 }
  0xed   : > { %5423 = vmatmul.mubr.msk.f32.gmra.mrb[72].mxu1 %vm1159_vm3, %v705_v62  ;;  %1753 = vmatprep.mubr.f32.mxu0 %v5743_v0 }
  0xee   : > { %2406 = vmatprep.mubr.f32.mxu1 %v5743_v0 }
  0xf0   : > { %5324 = vmatmul.mubr.msk.f32.gmra.mrb[74].mxu0 %vm1159_vm3, %v706_v63 }
  0xf1   : > { %5424 = vmatmul.mubr.msk.f32.gmra.mrb[74].mxu1 %vm1159_vm3, %v706_v63  ;;  %1759 = vmatprep.mubr.f32.mxu0 %v5743_v0 }
  0xf2   : > { %2412 = vmatprep.mubr.f32.mxu1 %v5743_v0 }
  0xf4   : > { %5325 = vmatmul.mubr.msk.f32.gmra.mrb[76].mxu0 %vm1159_vm3, %v707_v1 }
  0xf5   : > { %5425 = vmatmul.mubr.msk.f32.gmra.mrb[76].mxu1 %vm1159_vm3, %v707_v1  ;;  %1765 = vmatprep.mubr.f32.mxu0 %v5743_v0 }
  0xf6   : > { %2418 = vmatprep.mubr.f32.mxu1 %v5743_v0 }
  0xf8   : > { %5326 = vmatmul.mubr.msk.f32.gmra.mrb[78].mxu0 %vm1159_vm3, %v708_v2 }
  0xf9   : > { %5426 = vmatmul.mubr.msk.f32.gmra.mrb[78].mxu1 %vm1159_vm3, %v708_v2  ;;  %1771 = vmatprep.mubr.f32.mxu0 %v5743_v0 }
  0xfa   : > { %2424 = vmatprep.mubr.f32.mxu1 %v5743_v0 }
  0xfc   : > { %5327 = vmatmul.mubr.msk.f32.gmra.mrb[80].mxu0 %vm1159_vm3, %v709_v3 }
  0xfd   : > { %5427 = vmatmul.mubr.msk.f32.gmra.mrb[80].mxu1 %vm1159_vm3, %v709_v3  ;;  %1777 = vmatprep.mubr.f32.mxu0 %v5743_v0 }
  0xfe   : > { %2430 = vmatprep.mubr.f32.mxu1 %v5743_v0 }
 0x100   : > { %5328 = vmatmul.mubr.msk.f32.gmra.mrb[82].mxu0 %vm1159_vm3, %v710_v4 }
 0x101   : > { %5428 = vmatmul.mubr.msk.f32.gmra.mrb[82].mxu1 %vm1159_vm3, %v710_v4  ;;  %1783 = vmatprep.mubr.f32.mxu0 %v5743_v0 }
 0x102   : > { %2436 = vmatprep.mubr.f32.mxu1 %v5743_v0 }
 0x104   : > { %5329 = vmatmul.mubr.msk.f32.gmra.mrb[84].mxu0 %vm1159_vm3, %v711_v5 }
 0x105   : > { %5429 = vmatmul.mubr.msk.f32.gmra.mrb[84].mxu1 %vm1159_vm3, %v711_v5  ;;  %1789 = vmatprep.mubr.f32.mxu0 %v5743_v0 }
 0x106   : > { %2442 = vmatprep.mubr.f32.mxu1 %v5743_v0 }
 0x108   : > { %5330 = vmatmul.mubr.msk.f32.gmra.mrb[86].mxu0 %vm1159_vm3, %v712_v6 }
 0x109   : > { %5430 = vmatmul.mubr.msk.f32.gmra.mrb[86].mxu1 %vm1159_vm3, %v712_v6  ;;  %1795 = vmatprep.mubr.f32.mxu0 %v5743_v0 }
 0x10a   : > { %2448 = vmatprep.mubr.f32.mxu1 %v5743_v0 }
 0x10c   : > { %5331 = vmatmul.mubr.msk.f32.gmra.mrb[88].mxu0 %vm1159_vm3, %v713_v7 }
 0x10d   : > { %5431 = vmatmul.mubr.msk.f32.gmra.mrb[88].mxu1 %vm1159_vm3, %v713_v7  ;;  %1801 = vmatprep.mubr.f32.mxu0 %v5743_v0 }
 0x10e   : > { %2454 = vmatprep.mubr.f32.mxu1 %v5743_v0 }
 0x110   : > { %5332 = vmatmul.mubr.msk.f32.gmra.mrb[90].mxu0 %vm1159_vm3, %v714_v8 }
 0x111   : > { %5432 = vmatmul.mubr.msk.f32.gmra.mrb[90].mxu1 %vm1159_vm3, %v714_v8  ;;  %1807 = vmatprep.mubr.f32.mxu0 %v5743_v0 }
 0x112   : > { %2460 = vmatprep.mubr.f32.mxu1 %v5743_v0 }
 0x114   : > { %5333 = vmatmul.mubr.msk.f32.gmra.mrb[92].mxu0 %vm1159_vm3, %v715_v9 }
 0x115   : > { %5433 = vmatmul.mubr.msk.f32.gmra.mrb[92].mxu1 %vm1159_vm3, %v715_v9  ;;  %1813 = vmatprep.mubr.f32.mxu0 %v5743_v0 }
 0x116   : > { %2466 = vmatprep.mubr.f32.mxu1 %v5743_v0 }
 0x118   : > { %5334 = vmatmul.mubr.msk.f32.gmra.mrb[94].mxu0 %vm1159_vm3, %v716_v10 }
 0x119   : > { %5434 = vmatmul.mubr.msk.f32.gmra.mrb[94].mxu1 %vm1159_vm3, %v716_v10  ;;  %1819 = vmatprep.mubr.f32.mxu0 %v5743_v0 }
 0x11a   : > { %2472 = vmatprep.mubr.f32.mxu1 %v5743_v0 }
 0x11c   : > { %5335 = vmatmul.mubr.msk.f32.gmra.mrb[96].mxu0 %vm1159_vm3, %v717_v11 }
 0x11d   : > { %5435 = vmatmul.mubr.msk.f32.gmra.mrb[96].mxu1 %vm1159_vm3, %v717_v11  ;;  %1825 = vmatprep.mubr.f32.mxu0 %v5743_v0  ;;  %v726_v11 = vld [vmem:[%s5911_s23 + $0x1c8] sm:$0xff] }
 0x11e   : > { %2478 = vmatprep.mubr.f32.mxu1 %v5743_v0 }
 0x120   : > { %5336 = vmatmul.mubr.msk.f32.gmra.mrb[98].mxu0 %vm1159_vm3, %v718_v12 }
 0x121   : > { %5436 = vmatmul.mubr.msk.f32.gmra.mrb[98].mxu1 %vm1159_vm3, %v718_v12  ;;  %1831 = vmatprep.mubr.f32.mxu0 %v5743_v0 }
 0x122   : > { %2484 = vmatprep.mubr.f32.mxu1 %v5743_v0 }
 0x124   : > { %5337 = vmatmul.mubr.msk.f32.gmra.mrb[100].mxu0 %vm1159_vm3, %v719_v14 }
 0x125   : > { %5437 = vmatmul.mubr.msk.f32.gmra.mrb[100].mxu1 %vm1159_vm3, %v719_v14  ;;  %1837 = vmatprep.mubr.f32.mxu0 %v5743_v0 }
 0x126   : > { %2490 = vmatprep.mubr.f32.mxu1 %v5743_v0 }
 0x128   : > { %5338 = vmatmul.mubr.msk.f32.gmra.mrb[102].mxu0 %vm1159_vm3, %v720_v16 }
 0x129   : > { %5438 = vmatmul.mubr.msk.f32.gmra.mrb[102].mxu1 %vm1159_vm3, %v720_v16  ;;  %1843 = vmatprep.mubr.f32.mxu0 %v5743_v0 }
 0x12a   : > { %2496 = vmatprep.mubr.f32.mxu1 %v5743_v0 }
 0x12c   : > { %5339 = vmatmul.mubr.msk.f32.gmra.mrb[104].mxu0 %vm1159_vm3, %v721_v18 }
 0x12d   : > { %5439 = vmatmul.mubr.msk.f32.gmra.mrb[104].mxu1 %vm1159_vm3, %v721_v18  ;;  %1849 = vmatprep.mubr.f32.mxu0 %v5743_v0 }
 0x12e   : > { %2502 = vmatprep.mubr.f32.mxu1 %v5743_v0 }
 0x12f   : > { %v1533_v28 = vpop.f32.mrb[0].mxu0 }
 0x130   : > { %v3974_v29 = vadd.f32 %v6184_v23, %v1533_v28  ;;  %v2186_v30 = vpop.f32.mrb[0].mxu1  ;;  %v1535_v31 = vpop.f32.mrb[1].mxu0  ;;  %5340 = vmatmul.mubr.msk.f32.gmra.mrb[106].mxu0 %vm1159_vm3, %v722_v26  ;;  %v727_v28 = vld [vmem:[%s5911_s23 + $0x1d0] sm:$0xff] }
 0x131   : > { %v3976_v32 = vadd.f32 %v6190_v24, %v2186_v30  ;;  %v3975_v33 = vadd.f32 %v6192_v25, %v1535_v31  ;;  %v2188_v34 = vpop.f32.mrb[1].mxu1  ;;  %5440 = vmatmul.mubr.msk.f32.gmra.mrb[106].mxu1 %vm1159_vm3, %v722_v26  ;;  %1855 = vmatprep.mubr.f32.mxu0 %v5743_v0 }
 0x132   : > { %v4366_v36 = vmax.f32 %v3974_v29, 0.0  ;;  %v3977_v37 = vadd.f32 %v6196_v27, %v2188_v34  ;;  %2508 = vmatprep.mubr.f32.mxu1 %v5743_v0 }
 0x133   : > { %v4368_v38 = vmax.f32 %v3976_v32, 0.0  ;;  %v4367_v39 = vmax.f32 %v3975_v33, 0.0  ;;  %v1539_v40 = vpop.f32.mrb[2].mxu0 }
 0x134   : > { %4758 = vst [vmem:[%s6207_s6] sm:$0xff] %v4366_v36  ;;  %v4369_v41 = vmax.f32 %v3977_v37, 0.0  ;;  %v3978_v42 = vadd.f32 %v6184_v23, %v1539_v40  ;;  %v2192_v43 = vpop.f32.mrb[2].mxu1  ;;  %v1541_v44 = vpop.f32.mrb[3].mxu0  ;;  %5341 = vmatmul.mubr.msk.f32.gmra.mrb[108].mxu0 %vm1159_vm3, %v723_v35 }
 0x135   : > { %4760 = vst [vmem:[%s6207_s6 + $0x10] sm:$0xff] %v4368_v38  ;;  %4759 = vst [vmem:[%s6207_s6 + $0x8] sm:$0xff] %v4367_v39  ;;  %v3980_v45 = vadd.f32 %v6190_v24, %v2192_v43  ;;  %v3979_v46 = vadd.f32 %v6192_v25, %v1541_v44  ;;  %v2194_v47 = vpop.f32.mrb[3].mxu1  ;;  %5441 = vmatmul.mubr.msk.f32.gmra.mrb[108].mxu1 %vm1159_vm3, %v723_v35  ;;  %1861 = vmatprep.mubr.f32.mxu0 %v5743_v0 }
 0x136   : > { %4761 = vst [vmem:[%s6207_s6 + $0x18] sm:$0xff] %v4369_v41  ;;  %v4370_v49 = vmax.f32 %v3978_v42, 0.0  ;;  %v3981_v50 = vadd.f32 %v6196_v27, %v2194_v47  ;;  %2514 = vmatprep.mubr.f32.mxu1 %v5743_v0  ;;  %v728_v41 = vld [vmem:[%s5911_s23 + $0x1d8] sm:$0xff] }
 0x137   : > { %v4372_v51 = vmax.f32 %v3980_v45, 0.0  ;;  %v4371_v52 = vmax.f32 %v3979_v46, 0.0  ;;  %v1545_v53 = vpop.f32.mrb[4].mxu0 }
 0x138   : > { %4762 = vst [vmem:[%s6207_s6 + $0x20] sm:$0xff] %v4370_v49  ;;  %v4373_v54 = vmax.f32 %v3981_v50, 0.0  ;;  %v3982_v55 = vadd.f32 %v6184_v23, %v1545_v53  ;;  %v2198_v56 = vpop.f32.mrb[4].mxu1  ;;  %v1547_v57 = vpop.f32.mrb[5].mxu0  ;;  %5342 = vmatmul.mubr.msk.f32.gmra.mrb[110].mxu0 %vm1159_vm3, %v724_v48 }
 0x139   : > { %4764 = vst [vmem:[%s6207_s6 + $0x30] sm:$0xff] %v4372_v51  ;;  %4763 = vst [vmem:[%s6207_s6 + $0x28] sm:$0xff] %v4371_v52  ;;  %v3984_v58 = vadd.f32 %v6190_v24, %v2198_v56  ;;  %v3983_v59 = vadd.f32 %v6192_v25, %v1547_v57  ;;  %v2200_v60 = vpop.f32.mrb[5].mxu1  ;;  %5442 = vmatmul.mubr.msk.f32.gmra.mrb[110].mxu1 %vm1159_vm3, %v724_v48  ;;  %1867 = vmatprep.mubr.f32.mxu0 %v5743_v0 }
 0x13a   : > { %4765 = vst [vmem:[%s6207_s6 + $0x38] sm:$0xff] %v4373_v54  ;;  %v4374_v62 = vmax.f32 %v3982_v55, 0.0  ;;  %v3985_v63 = vadd.f32 %v6196_v27, %v2200_v60  ;;  %2520 = vmatprep.mubr.f32.mxu1 %v5743_v0  ;;  %v729_v54 = vld [vmem:[%s5911_s23 + $0x1e0] sm:$0xff] }
 0x13b   : > { %v4376_v1 = vmax.f32 %v3984_v58, 0.0  ;;  %v4375_v2 = vmax.f32 %v3983_v59, 0.0  ;;  %v1551_v3 = vpop.f32.mrb[6].mxu0 }
 0x13c   : > { %4766 = vst [vmem:[%s6207_s6 + $0x40] sm:$0xff] %v4374_v62  ;;  %v4377_v4 = vmax.f32 %v3985_v63, 0.0  ;;  %v3986_v5 = vadd.f32 %v6184_v23, %v1551_v3  ;;  %v2204_v6 = vpop.f32.mrb[6].mxu1  ;;  %v1553_v7 = vpop.f32.mrb[7].mxu0  ;;  %5343 = vmatmul.mubr.msk.f32.gmra.mrb[112].mxu0 %vm1159_vm3, %v725_v61 }
 0x13d   : > { %4768 = vst [vmem:[%s6207_s6 + $0x50] sm:$0xff] %v4376_v1  ;;  %4767 = vst [vmem:[%s6207_s6 + $0x48] sm:$0xff] %v4375_v2  ;;  %v3988_v8 = vadd.f32 %v6190_v24, %v2204_v6  ;;  %v3987_v9 = vadd.f32 %v6192_v25, %v1553_v7  ;;  %v2206_v10 = vpop.f32.mrb[7].mxu1  ;;  %5443 = vmatmul.mubr.msk.f32.gmra.mrb[112].mxu1 %vm1159_vm3, %v725_v61  ;;  %1873 = vmatprep.mubr.f32.mxu0 %v5743_v0 }
 0x13e   : > { %4769 = vst [vmem:[%s6207_s6 + $0x58] sm:$0xff] %v4377_v4  ;;  %v4378_v12 = vmax.f32 %v3986_v5, 0.0  ;;  %v3989_v13 = vadd.f32 %v6196_v27, %v2206_v10  ;;  %2526 = vmatprep.mubr.f32.mxu1 %v5743_v0  ;;  %v730_v4 = vld [vmem:[%s5911_s23 + $0x1e8] sm:$0xff] }
 0x13f   : > { %v4380_v14 = vmax.f32 %v3988_v8, 0.0  ;;  %v4379_v15 = vmax.f32 %v3987_v9, 0.0  ;;  %v1557_v16 = vpop.f32.mrb[8].mxu0 }
 0x140   : > { %4770 = vst [vmem:[%s6207_s6 + $0x60] sm:$0xff] %v4378_v12  ;;  %v4381_v17 = vmax.f32 %v3989_v13, 0.0  ;;  %v3990_v18 = vadd.f32 %v6184_v23, %v1557_v16  ;;  %v2210_v19 = vpop.f32.mrb[8].mxu1  ;;  %v1559_v20 = vpop.f32.mrb[9].mxu0  ;;  %5344 = vmatmul.mubr.msk.f32.gmra.mrb[114].mxu0 %vm1159_vm3, %v726_v11 }
 0x141   : > { %4772 = vst [vmem:[%s6207_s6 + $0x70] sm:$0xff] %v4380_v14  ;;  %4771 = vst [vmem:[%s6207_s6 + $0x68] sm:$0xff] %v4379_v15  ;;  %v3992_v21 = vadd.f32 %v6190_v24, %v2210_v19  ;;  %v3991_v22 = vadd.f32 %v6192_v25, %v1559_v20  ;;  %v2212_v26 = vpop.f32.mrb[9].mxu1  ;;  %5444 = vmatmul.mubr.msk.f32.gmra.mrb[114].mxu1 %vm1159_vm3, %v726_v11  ;;  %1879 = vmatprep.mubr.f32.mxu0 %v5743_v0 }
 0x142   : > { %4773 = vst [vmem:[%s6207_s6 + $0x78] sm:$0xff] %v4381_v17  ;;  %v4382_v29 = vmax.f32 %v3990_v18, 0.0  ;;  %v3993_v30 = vadd.f32 %v6196_v27, %v2212_v26  ;;  %2532 = vmatprep.mubr.f32.mxu1 %v5743_v0  ;;  %v731_v17 = vld [vmem:[%s5911_s23 + $0x1f0] sm:$0xff] }
 0x143   : > { %v4384_v31 = vmax.f32 %v3992_v21, 0.0  ;;  %v4383_v32 = vmax.f32 %v3991_v22, 0.0  ;;  %v1563_v33 = vpop.f32.mrb[10].mxu0 }
 0x144   : > { %4774 = vst [vmem:[%s6207_s6 + $0x80] sm:$0xff] %v4382_v29  ;;  %v4385_v34 = vmax.f32 %v3993_v30, 0.0  ;;  %v3994_v35 = vadd.f32 %v6184_v23, %v1563_v33  ;;  %v2216_v36 = vpop.f32.mrb[10].mxu1  ;;  %v1565_v37 = vpop.f32.mrb[11].mxu0  ;;  %5345 = vmatmul.mubr.msk.f32.gmra.mrb[116].mxu0 %vm1159_vm3, %v727_v28 }
 0x145   : > { %4776 = vst [vmem:[%s6207_s6 + $0x90] sm:$0xff] %v4384_v31  ;;  %4775 = vst [vmem:[%s6207_s6 + $0x88] sm:$0xff] %v4383_v32  ;;  %v3996_v38 = vadd.f32 %v6190_v24, %v2216_v36  ;;  %v3995_v39 = vadd.f32 %v6192_v25, %v1565_v37  ;;  %v2218_v40 = vpop.f32.mrb[11].mxu1  ;;  %5445 = vmatmul.mubr.msk.f32.gmra.mrb[116].mxu1 %vm1159_vm3, %v727_v28  ;;  %1885 = vmatprep.mubr.f32.mxu0 %v5743_v0 }
 0x146   : > { %4777 = vst [vmem:[%s6207_s6 + $0x98] sm:$0xff] %v4385_v34  ;;  %v4386_v42 = vmax.f32 %v3994_v35, 0.0  ;;  %v3997_v43 = vadd.f32 %v6196_v27, %v2218_v40  ;;  %2538 = vmatprep.mubr.f32.mxu1 %v5743_v0  ;;  %v732_v34 = vld [vmem:[%s5911_s23 + $0x1f8] sm:$0xff] }
 0x147   : > { %v4388_v44 = vmax.f32 %v3996_v38, 0.0  ;;  %v4387_v45 = vmax.f32 %v3995_v39, 0.0  ;;  %v1569_v46 = vpop.f32.mrb[12].mxu0 }
 0x148   : > { %4778 = vst [vmem:[%s6207_s6 + $0xa0] sm:$0xff] %v4386_v42  ;;  %v4389_v47 = vmax.f32 %v3997_v43, 0.0  ;;  %v3998_v48 = vadd.f32 %v6184_v23, %v1569_v46  ;;  %v2222_v49 = vpop.f32.mrb[12].mxu1  ;;  %v1571_v50 = vpop.f32.mrb[13].mxu0  ;;  %5346 = vmatmul.mubr.msk.f32.gmra.mrb[118].mxu0 %vm1159_vm3, %v728_v41 }
 0x149   : > { %4780 = vst [vmem:[%s6207_s6 + $0xb0] sm:$0xff] %v4388_v44  ;;  %4779 = vst [vmem:[%s6207_s6 + $0xa8] sm:$0xff] %v4387_v45  ;;  %v4000_v51 = vadd.f32 %v6190_v24, %v2222_v49  ;;  %v3999_v52 = vadd.f32 %v6192_v25, %v1571_v50  ;;  %v2224_v53 = vpop.f32.mrb[13].mxu1  ;;  %5446 = vmatmul.mubr.msk.f32.gmra.mrb[118].mxu1 %vm1159_vm3, %v728_v41  ;;  %1891 = vmatprep.mubr.f32.mxu0 %v5743_v0 }
 0x14a   : > { %4781 = vst [vmem:[%s6207_s6 + $0xb8] sm:$0xff] %v4389_v47  ;;  %v4390_v55 = vmax.f32 %v3998_v48, 0.0  ;;  %v4001_v56 = vadd.f32 %v6196_v27, %v2224_v53  ;;  %2544 = vmatprep.mubr.f32.mxu1 %v5743_v0  ;;  %v733_v47 = vld [vmem:[%s5911_s23 + $0x200] sm:$0xff] }
 0x14b   : > { %v4392_v57 = vmax.f32 %v4000_v51, 0.0  ;;  %v4391_v58 = vmax.f32 %v3999_v52, 0.0  ;;  %v1575_v59 = vpop.f32.mrb[14].mxu0 }
 0x14c   : > { %4782 = vst [vmem:[%s6207_s6 + $0xc0] sm:$0xff] %v4390_v55  ;;  %v4393_v60 = vmax.f32 %v4001_v56, 0.0  ;;  %v4002_v61 = vadd.f32 %v6184_v23, %v1575_v59  ;;  %v2228_v62 = vpop.f32.mrb[14].mxu1  ;;  %v1577_v63 = vpop.f32.mrb[15].mxu0  ;;  %5347 = vmatmul.mubr.msk.f32.gmra.mrb[120].mxu0 %vm1159_vm3, %v729_v54 }
 0x14d   : > { %4784 = vst [vmem:[%s6207_s6 + $0xd0] sm:$0xff] %v4392_v57  ;;  %4783 = vst [vmem:[%s6207_s6 + $0xc8] sm:$0xff] %v4391_v58  ;;  %v4004_v1 = vadd.f32 %v6190_v24, %v2228_v62  ;;  %v4003_v2 = vadd.f32 %v6192_v25, %v1577_v63  ;;  %v2230_v3 = vpop.f32.mrb[15].mxu1  ;;  %5447 = vmatmul.mubr.msk.f32.gmra.mrb[120].mxu1 %vm1159_vm3, %v729_v54  ;;  %1897 = vmatprep.mubr.f32.mxu0 %v5743_v0 }
 0x14e   : > { %4785 = vst [vmem:[%s6207_s6 + $0xd8] sm:$0xff] %v4393_v60  ;;  %v4394_v5 = vmax.f32 %v4002_v61, 0.0  ;;  %v4005_v6 = vadd.f32 %v6196_v27, %v2230_v3  ;;  %2550 = vmatprep.mubr.f32.mxu1 %v5743_v0  ;;  %v734_v60 = vld [vmem:[%s5911_s23 + $0x208] sm:$0xff] }
 0x14f   : > { %v4396_v7 = vmax.f32 %v4004_v1, 0.0  ;;  %v4395_v8 = vmax.f32 %v4003_v2, 0.0  ;;  %v1581_v9 = vpop.f32.mrb[16].mxu0 }
 0x150   : > { %4786 = vst [vmem:[%s6207_s6 + $0xe0] sm:$0xff] %v4394_v5  ;;  %v4397_v10 = vmax.f32 %v4005_v6, 0.0  ;;  %v4006_v11 = vadd.f32 %v6184_v23, %v1581_v9  ;;  %v2234_v12 = vpop.f32.mrb[16].mxu1  ;;  %v1583_v13 = vpop.f32.mrb[17].mxu0  ;;  %5348 = vmatmul.mubr.msk.f32.gmra.mrb[122].mxu0 %vm1159_vm3, %v730_v4 }
 0x151   : > { %4788 = vst [vmem:[%s6207_s6 + $0xf0] sm:$0xff] %v4396_v7  ;;  %4787 = vst [vmem:[%s6207_s6 + $0xe8] sm:$0xff] %v4395_v8  ;;  %v4008_v14 = vadd.f32 %v6190_v24, %v2234_v12  ;;  %v4007_v15 = vadd.f32 %v6192_v25, %v1583_v13  ;;  %v2236_v16 = vpop.f32.mrb[17].mxu1  ;;  %5448 = vmatmul.mubr.msk.f32.gmra.mrb[122].mxu1 %vm1159_vm3, %v730_v4  ;;  %1903 = vmatprep.mubr.f32.mxu0 %v5743_v0 }
 0x152   : > { %4789 = vst [vmem:[%s6207_s6 + $0xf8] sm:$0xff] %v4397_v10  ;;  %v4398_v18 = vmax.f32 %v4006_v11, 0.0  ;;  %v4009_v19 = vadd.f32 %v6196_v27, %v2236_v16  ;;  %2556 = vmatprep.mubr.f32.mxu1 %v5743_v0  ;;  %v735_v10 = vld [vmem:[%s5911_s23 + $0x210] sm:$0xff] }
 0x153   : > { %v4400_v20 = vmax.f32 %v4008_v14, 0.0  ;;  %v4399_v21 = vmax.f32 %v4007_v15, 0.0  ;;  %v1587_v22 = vpop.f32.mrb[18].mxu0 }
 0x154   : > { %4790 = vst [vmem:[%s6207_s6 + $0x100] sm:$0xff] %v4398_v18  ;;  %v4401_v26 = vmax.f32 %v4009_v19, 0.0  ;;  %v4010_v28 = vadd.f32 %v6184_v23, %v1587_v22  ;;  %v2240_v29 = vpop.f32.mrb[18].mxu1  ;;  %v1589_v30 = vpop.f32.mrb[19].mxu0  ;;  %5349 = vmatmul.mubr.msk.f32.gmra.mrb[124].mxu0 %vm1159_vm3, %v731_v17 }
 0x155   : > { %4792 = vst [vmem:[%s6207_s6 + $0x110] sm:$0xff] %v4400_v20  ;;  %4791 = vst [vmem:[%s6207_s6 + $0x108] sm:$0xff] %v4399_v21  ;;  %v4012_v31 = vadd.f32 %v6190_v24, %v2240_v29  ;;  %v4011_v32 = vadd.f32 %v6192_v25, %v1589_v30  ;;  %v2242_v33 = vpop.f32.mrb[19].mxu1  ;;  %5449 = vmatmul.mubr.msk.f32.gmra.mrb[124].mxu1 %vm1159_vm3, %v731_v17  ;;  %1909 = vmatprep.mubr.f32.mxu0 %v5743_v0 }
 0x156   : > { %4793 = vst [vmem:[%s6207_s6 + $0x118] sm:$0xff] %v4401_v26  ;;  %v4402_v35 = vmax.f32 %v4010_v28, 0.0  ;;  %v4013_v36 = vadd.f32 %v6196_v27, %v2242_v33  ;;  %2562 = vmatprep.mubr.f32.mxu1 %v5743_v0  ;;  %v736_v26 = vld [vmem:[%s5911_s23 + $0x218] sm:$0xff] }
 0x157   : > { %v4404_v37 = vmax.f32 %v4012_v31, 0.0  ;;  %v4403_v38 = vmax.f32 %v4011_v32, 0.0  ;;  %v1593_v39 = vpop.f32.mrb[20].mxu0 }
 0x158   : > { %4794 = vst [vmem:[%s6207_s6 + $0x120] sm:$0xff] %v4402_v35  ;;  %v4405_v40 = vmax.f32 %v4013_v36, 0.0  ;;  %v4014_v41 = vadd.f32 %v6184_v23, %v1593_v39  ;;  %v2246_v42 = vpop.f32.mrb[20].mxu1  ;;  %v1595_v43 = vpop.f32.mrb[21].mxu0  ;;  %5350 = vmatmul.mubr.msk.f32.gmra.mrb[126].mxu0 %vm1159_vm3, %v732_v34 }
 0x159   : > { %4796 = vst [vmem:[%s6207_s6 + $0x130] sm:$0xff] %v4404_v37  ;;  %4795 = vst [vmem:[%s6207_s6 + $0x128] sm:$0xff] %v4403_v38  ;;  %v4016_v44 = vadd.f32 %v6190_v24, %v2246_v42  ;;  %v4015_v45 = vadd.f32 %v6192_v25, %v1595_v43  ;;  %v2248_v46 = vpop.f32.mrb[21].mxu1  ;;  %5450 = vmatmul.mubr.msk.f32.gmra.mrb[126].mxu1 %vm1159_vm3, %v732_v34  ;;  %1915 = vmatprep.mubr.f32.mxu0 %v5743_v0 }
 0x15a   : > { %4797 = vst [vmem:[%s6207_s6 + $0x138] sm:$0xff] %v4405_v40  ;;  %v4406_v48 = vmax.f32 %v4014_v41, 0.0  ;;  %v4017_v49 = vadd.f32 %v6196_v27, %v2248_v46  ;;  %2568 = vmatprep.mubr.f32.mxu1 %v5743_v0  ;;  %v737_v40 = vld [vmem:[%s5911_s23 + $0x220] sm:$0xff] }
 0x15b   : > { %v4408_v50 = vmax.f32 %v4016_v44, 0.0  ;;  %v4407_v51 = vmax.f32 %v4015_v45, 0.0  ;;  %v1599_v52 = vpop.f32.mrb[22].mxu0 }
 0x15c   : > { %4798 = vst [vmem:[%s6207_s6 + $0x140] sm:$0xff] %v4406_v48  ;;  %v4409_v53 = vmax.f32 %v4017_v49, 0.0  ;;  %v4018_v54 = vadd.f32 %v6184_v23, %v1599_v52  ;;  %v2252_v55 = vpop.f32.mrb[22].mxu1  ;;  %v1601_v56 = vpop.f32.mrb[23].mxu0  ;;  %5351 = vmatmul.mubr.msk.f32.gmra.mrb[128].mxu0 %vm1159_vm3, %v733_v47 }
 0x15d   : > { %4800 = vst [vmem:[%s6207_s6 + $0x150] sm:$0xff] %v4408_v50  ;;  %4799 = vst [vmem:[%s6207_s6 + $0x148] sm:$0xff] %v4407_v51  ;;  %v4020_v57 = vadd.f32 %v6190_v24, %v2252_v55  ;;  %v4019_v58 = vadd.f32 %v6192_v25, %v1601_v56  ;;  %v2254_v59 = vpop.f32.mrb[23].mxu1  ;;  %5451 = vmatmul.mubr.msk.f32.gmra.mrb[128].mxu1 %vm1159_vm3, %v733_v47  ;;  %1921 = vmatprep.mubr.f32.mxu0 %v5743_v0 }
 0x15e   : > { %4801 = vst [vmem:[%s6207_s6 + $0x158] sm:$0xff] %v4409_v53  ;;  %v4410_v61 = vmax.f32 %v4018_v54, 0.0  ;;  %v4021_v62 = vadd.f32 %v6196_v27, %v2254_v59  ;;  %2574 = vmatprep.mubr.f32.mxu1 %v5743_v0  ;;  %v738_v53 = vld [vmem:[%s5911_s23 + $0x228] sm:$0xff] }
 0x15f   : > { %v4412_v63 = vmax.f32 %v4020_v57, 0.0  ;;  %v4411_v1 = vmax.f32 %v4019_v58, 0.0  ;;  %v1605_v2 = vpop.f32.mrb[24].mxu0 }
 0x160   : > { %4802 = vst [vmem:[%s6207_s6 + $0x160] sm:$0xff] %v4410_v61  ;;  %v4413_v3 = vmax.f32 %v4021_v62, 0.0  ;;  %v4022_v4 = vadd.f32 %v6184_v23, %v1605_v2  ;;  %v2258_v5 = vpop.f32.mrb[24].mxu1  ;;  %v1607_v6 = vpop.f32.mrb[25].mxu0  ;;  %5352 = vmatmul.mubr.msk.f32.gmra.mrb[130].mxu0 %vm1159_vm3, %v734_v60 }
 0x161   : > { %4804 = vst [vmem:[%s6207_s6 + $0x170] sm:$0xff] %v4412_v63  ;;  %4803 = vst [vmem:[%s6207_s6 + $0x168] sm:$0xff] %v4411_v1  ;;  %v4024_v7 = vadd.f32 %v6190_v24, %v2258_v5  ;;  %v4023_v8 = vadd.f32 %v6192_v25, %v1607_v6  ;;  %v2260_v9 = vpop.f32.mrb[25].mxu1  ;;  %5452 = vmatmul.mubr.msk.f32.gmra.mrb[130].mxu1 %vm1159_vm3, %v734_v60  ;;  %1927 = vmatprep.mubr.f32.mxu0 %v5743_v0 }
 0x162   : > { %4805 = vst [vmem:[%s6207_s6 + $0x178] sm:$0xff] %v4413_v3  ;;  %v4414_v11 = vmax.f32 %v4022_v4, 0.0  ;;  %v4025_v12 = vadd.f32 %v6196_v27, %v2260_v9  ;;  %2580 = vmatprep.mubr.f32.mxu1 %v5743_v0  ;;  %v739_v3 = vld [vmem:[%s5911_s23 + $0x230] sm:$0xff] }
 0x163   : > { %v4416_v13 = vmax.f32 %v4024_v7, 0.0  ;;  %v4415_v14 = vmax.f32 %v4023_v8, 0.0  ;;  %v1611_v15 = vpop.f32.mrb[26].mxu0 }
 0x164   : > { %4806 = vst [vmem:[%s6207_s6 + $0x180] sm:$0xff] %v4414_v11  ;;  %v4417_v16 = vmax.f32 %v4025_v12, 0.0  ;;  %v4026_v17 = vadd.f32 %v6184_v23, %v1611_v15  ;;  %v2264_v18 = vpop.f32.mrb[26].mxu1  ;;  %v1613_v19 = vpop.f32.mrb[27].mxu0  ;;  %5353 = vmatmul.mubr.msk.f32.gmra.mrb[132].mxu0 %vm1159_vm3, %v735_v10 }
 0x165   : > { %4808 = vst [vmem:[%s6207_s6 + $0x190] sm:$0xff] %v4416_v13  ;;  %4807 = vst [vmem:[%s6207_s6 + $0x188] sm:$0xff] %v4415_v14  ;;  %v4028_v20 = vadd.f32 %v6190_v24, %v2264_v18  ;;  %v4027_v21 = vadd.f32 %v6192_v25, %v1613_v19  ;;  %v2266_v22 = vpop.f32.mrb[27].mxu1  ;;  %5453 = vmatmul.mubr.msk.f32.gmra.mrb[132].mxu1 %vm1159_vm3, %v735_v10  ;;  %1933 = vmatprep.mubr.f32.mxu0 %v5743_v0 }
 0x166   : > { %4809 = vst [vmem:[%s6207_s6 + $0x198] sm:$0xff] %v4417_v16  ;;  %v4418_v28 = vmax.f32 %v4026_v17, 0.0  ;;  %v4029_v29 = vadd.f32 %v6196_v27, %v2266_v22  ;;  %2586 = vmatprep.mubr.f32.mxu1 %v5743_v0  ;;  %v740_v16 = vld [vmem:[%s5911_s23 + $0x238] sm:$0xff] }
 0x167   : > { %v4420_v30 = vmax.f32 %v4028_v20, 0.0  ;;  %v4419_v31 = vmax.f32 %v4027_v21, 0.0  ;;  %v1617_v32 = vpop.f32.mrb[28].mxu0 }
 0x168   : > { %4810 = vst [vmem:[%s6207_s6 + $0x1a0] sm:$0xff] %v4418_v28  ;;  %v4421_v33 = vmax.f32 %v4029_v29, 0.0  ;;  %v4030_v34 = vadd.f32 %v6184_v23, %v1617_v32  ;;  %v2270_v35 = vpop.f32.mrb[28].mxu1  ;;  %v1619_v36 = vpop.f32.mrb[29].mxu0  ;;  %5354 = vmatmul.mubr.msk.f32.gmra.mrb[134].mxu0 %vm1159_vm3, %v736_v26 }
 0x169   : > { %4812 = vst [vmem:[%s6207_s6 + $0x1b0] sm:$0xff] %v4420_v30  ;;  %4811 = vst [vmem:[%s6207_s6 + $0x1a8] sm:$0xff] %v4419_v31  ;;  %v4032_v37 = vadd.f32 %v6190_v24, %v2270_v35  ;;  %v4031_v38 = vadd.f32 %v6192_v25, %v1619_v36  ;;  %v2272_v39 = vpop.f32.mrb[29].mxu1  ;;  %5454 = vmatmul.mubr.msk.f32.gmra.mrb[134].mxu1 %vm1159_vm3, %v736_v26  ;;  %1939 = vmatprep.mubr.f32.mxu0 %v5743_v0 }
 0x16a   : > { %4813 = vst [vmem:[%s6207_s6 + $0x1b8] sm:$0xff] %v4421_v33  ;;  %v4422_v41 = vmax.f32 %v4030_v34, 0.0  ;;  %v4033_v42 = vadd.f32 %v6196_v27, %v2272_v39  ;;  %2592 = vmatprep.mubr.f32.mxu1 %v5743_v0  ;;  %v741_v33 = vld [vmem:[%s5911_s23 + $0x240] sm:$0xff] }
 0x16b   : > { %v4424_v43 = vmax.f32 %v4032_v37, 0.0  ;;  %v4423_v44 = vmax.f32 %v4031_v38, 0.0  ;;  %v1623_v45 = vpop.f32.mrb[30].mxu0 }
 0x16c   : > { %4814 = vst [vmem:[%s6207_s6 + $0x1c0] sm:$0xff] %v4422_v41  ;;  %v4425_v46 = vmax.f32 %v4033_v42, 0.0  ;;  %v4034_v47 = vadd.f32 %v6184_v23, %v1623_v45  ;;  %v2276_v48 = vpop.f32.mrb[30].mxu1  ;;  %v1625_v49 = vpop.f32.mrb[31].mxu0  ;;  %5355 = vmatmul.mubr.msk.f32.gmra.mrb[136].mxu0 %vm1159_vm3, %v737_v40 }
 0x16d   : > { %4816 = vst [vmem:[%s6207_s6 + $0x1d0] sm:$0xff] %v4424_v43  ;;  %4815 = vst [vmem:[%s6207_s6 + $0x1c8] sm:$0xff] %v4423_v44  ;;  %v4036_v50 = vadd.f32 %v6190_v24, %v2276_v48  ;;  %v4035_v51 = vadd.f32 %v6192_v25, %v1625_v49  ;;  %v2278_v52 = vpop.f32.mrb[31].mxu1  ;;  %5455 = vmatmul.mubr.msk.f32.gmra.mrb[136].mxu1 %vm1159_vm3, %v737_v40  ;;  %1945 = vmatprep.mubr.f32.mxu0 %v5743_v0 }
 0x16e   : > { %4817 = vst [vmem:[%s6207_s6 + $0x1d8] sm:$0xff] %v4425_v46  ;;  %v4426_v54 = vmax.f32 %v4034_v47, 0.0  ;;  %v4037_v55 = vadd.f32 %v6196_v27, %v2278_v52  ;;  %2598 = vmatprep.mubr.f32.mxu1 %v5743_v0  ;;  %v742_v46 = vld [vmem:[%s5911_s23 + $0x248] sm:$0xff] }
 0x16f   : > { %v4428_v56 = vmax.f32 %v4036_v50, 0.0  ;;  %v4427_v57 = vmax.f32 %v4035_v51, 0.0  ;;  %v1629_v58 = vpop.f32.mrb[32].mxu0 }
 0x170   : > { %4818 = vst [vmem:[%s6207_s6 + $0x1e0] sm:$0xff] %v4426_v54  ;;  %v4429_v59 = vmax.f32 %v4037_v55, 0.0  ;;  %v4038_v60 = vadd.f32 %v6184_v23, %v1629_v58  ;;  %v2282_v61 = vpop.f32.mrb[32].mxu1  ;;  %v1631_v62 = vpop.f32.mrb[33].mxu0  ;;  %5356 = vmatmul.mubr.msk.f32.gmra.mrb[138].mxu0 %vm1159_vm3, %v738_v53 }
 0x171   : > { %4820 = vst [vmem:[%s6207_s6 + $0x1f0] sm:$0xff] %v4428_v56  ;;  %4819 = vst [vmem:[%s6207_s6 + $0x1e8] sm:$0xff] %v4427_v57  ;;  %v4040_v63 = vadd.f32 %v6190_v24, %v2282_v61  ;;  %v4039_v1 = vadd.f32 %v6192_v25, %v1631_v62  ;;  %v2284_v2 = vpop.f32.mrb[33].mxu1  ;;  %5456 = vmatmul.mubr.msk.f32.gmra.mrb[138].mxu1 %vm1159_vm3, %v738_v53  ;;  %1951 = vmatprep.mubr.f32.mxu0 %v5743_v0 }
 0x172   : > { %4821 = vst [vmem:[%s6207_s6 + $0x1f8] sm:$0xff] %v4429_v59  ;;  %v4430_v4 = vmax.f32 %v4038_v60, 0.0  ;;  %v4041_v5 = vadd.f32 %v6196_v27, %v2284_v2  ;;  %2604 = vmatprep.mubr.f32.mxu1 %v5743_v0  ;;  %v743_v59 = vld [vmem:[%s5911_s23 + $0x250] sm:$0xff] }
 0x173   : > { %v4432_v6 = vmax.f32 %v4040_v63, 0.0  ;;  %v4431_v7 = vmax.f32 %v4039_v1, 0.0  ;;  %v1635_v8 = vpop.f32.mrb[34].mxu0 }
 0x174   : > { %4822 = vst [vmem:[%s6207_s6 + $0x200] sm:$0xff] %v4430_v4  ;;  %v4433_v9 = vmax.f32 %v4041_v5, 0.0  ;;  %v4042_v10 = vadd.f32 %v6184_v23, %v1635_v8  ;;  %v2288_v11 = vpop.f32.mrb[34].mxu1  ;;  %v1637_v12 = vpop.f32.mrb[35].mxu0  ;;  %5357 = vmatmul.mubr.msk.f32.gmra.mrb[140].mxu0 %vm1159_vm3, %v739_v3 }
 0x175   : > { %4824 = vst [vmem:[%s6207_s6 + $0x210] sm:$0xff] %v4432_v6  ;;  %4823 = vst [vmem:[%s6207_s6 + $0x208] sm:$0xff] %v4431_v7  ;;  %v4044_v13 = vadd.f32 %v6190_v24, %v2288_v11  ;;  %v4043_v14 = vadd.f32 %v6192_v25, %v1637_v12  ;;  %v2290_v15 = vpop.f32.mrb[35].mxu1  ;;  %5457 = vmatmul.mubr.msk.f32.gmra.mrb[140].mxu1 %vm1159_vm3, %v739_v3  ;;  %1957 = vmatprep.mubr.f32.mxu0 %v5743_v0 }
 0x176   : > { %4825 = vst [vmem:[%s6207_s6 + $0x218] sm:$0xff] %v4433_v9  ;;  %v4434_v17 = vmax.f32 %v4042_v10, 0.0  ;;  %v4045_v18 = vadd.f32 %v6196_v27, %v2290_v15  ;;  %2610 = vmatprep.mubr.f32.mxu1 %v5743_v0  ;;  %v744_v9 = vld [vmem:[%s5911_s23 + $0x258] sm:$0xff] }
 0x177   : > { %v4436_v19 = vmax.f32 %v4044_v13, 0.0  ;;  %v4435_v20 = vmax.f32 %v4043_v14, 0.0  ;;  %v1641_v21 = vpop.f32.mrb[36].mxu0 }
 0x178   : > { %4826 = vst [vmem:[%s6207_s6 + $0x220] sm:$0xff] %v4434_v17  ;;  %v4437_v22 = vmax.f32 %v4045_v18, 0.0  ;;  %v4046_v26 = vadd.f32 %v6184_v23, %v1641_v21  ;;  %v2294_v28 = vpop.f32.mrb[36].mxu1  ;;  %v1643_v29 = vpop.f32.mrb[37].mxu0  ;;  %5358 = vmatmul.mubr.msk.f32.gmra.mrb[142].mxu0 %vm1159_vm3, %v740_v16 }
 0x179   : > { %4828 = vst [vmem:[%s6207_s6 + $0x230] sm:$0xff] %v4436_v19  ;;  %4827 = vst [vmem:[%s6207_s6 + $0x228] sm:$0xff] %v4435_v20  ;;  %v4048_v30 = vadd.f32 %v6190_v24, %v2294_v28  ;;  %v4047_v31 = vadd.f32 %v6192_v25, %v1643_v29  ;;  %v2296_v32 = vpop.f32.mrb[37].mxu1  ;;  %5458 = vmatmul.mubr.msk.f32.gmra.mrb[142].mxu1 %vm1159_vm3, %v740_v16  ;;  %1963 = vmatprep.mubr.f32.mxu0 %v5743_v0 }
 0x17a   : > { %4829 = vst [vmem:[%s6207_s6 + $0x238] sm:$0xff] %v4437_v22  ;;  %v4438_v34 = vmax.f32 %v4046_v26, 0.0  ;;  %v4049_v35 = vadd.f32 %v6196_v27, %v2296_v32  ;;  %2616 = vmatprep.mubr.f32.mxu1 %v5743_v0  ;;  %v745_v22 = vld [vmem:[%s5911_s23 + $0x260] sm:$0xff] }
 0x17b   : > { %v4440_v36 = vmax.f32 %v4048_v30, 0.0  ;;  %v4439_v37 = vmax.f32 %v4047_v31, 0.0  ;;  %v1647_v38 = vpop.f32.mrb[38].mxu0 }
 0x17c   : > { %4830 = vst [vmem:[%s6207_s6 + $0x240] sm:$0xff] %v4438_v34  ;;  %v4441_v39 = vmax.f32 %v4049_v35, 0.0  ;;  %v4050_v40 = vadd.f32 %v6184_v23, %v1647_v38  ;;  %v2300_v41 = vpop.f32.mrb[38].mxu1  ;;  %v1649_v42 = vpop.f32.mrb[39].mxu0  ;;  %5359 = vmatmul.mubr.msk.f32.gmra.mrb[144].mxu0 %vm1159_vm3, %v741_v33 }
 0x17d   : > { %4832 = vst [vmem:[%s6207_s6 + $0x250] sm:$0xff] %v4440_v36  ;;  %4831 = vst [vmem:[%s6207_s6 + $0x248] sm:$0xff] %v4439_v37  ;;  %v4052_v43 = vadd.f32 %v6190_v24, %v2300_v41  ;;  %v4051_v44 = vadd.f32 %v6192_v25, %v1649_v42  ;;  %v2302_v45 = vpop.f32.mrb[39].mxu1  ;;  %5459 = vmatmul.mubr.msk.f32.gmra.mrb[144].mxu1 %vm1159_vm3, %v741_v33  ;;  %1969 = vmatprep.mubr.f32.mxu0 %v5743_v0 }
 0x17e   : > { %4833 = vst [vmem:[%s6207_s6 + $0x258] sm:$0xff] %v4441_v39  ;;  %v4442_v47 = vmax.f32 %v4050_v40, 0.0  ;;  %v4053_v48 = vadd.f32 %v6196_v27, %v2302_v45  ;;  %2622 = vmatprep.mubr.f32.mxu1 %v5743_v0  ;;  %v746_v39 = vld [vmem:[%s5911_s23 + $0x268] sm:$0xff] }
 0x17f   : > { %v4444_v49 = vmax.f32 %v4052_v43, 0.0  ;;  %v4443_v50 = vmax.f32 %v4051_v44, 0.0  ;;  %v1653_v51 = vpop.f32.mrb[40].mxu0 }
 0x180   : > { %4834 = vst [vmem:[%s6207_s6 + $0x260] sm:$0xff] %v4442_v47  ;;  %v4445_v52 = vmax.f32 %v4053_v48, 0.0  ;;  %v4054_v53 = vadd.f32 %v6184_v23, %v1653_v51  ;;  %v2306_v54 = vpop.f32.mrb[40].mxu1  ;;  %v1655_v55 = vpop.f32.mrb[41].mxu0  ;;  %5360 = vmatmul.mubr.msk.f32.gmra.mrb[146].mxu0 %vm1159_vm3, %v742_v46 }
 0x181   : > { %4836 = vst [vmem:[%s6207_s6 + $0x270] sm:$0xff] %v4444_v49  ;;  %4835 = vst [vmem:[%s6207_s6 + $0x268] sm:$0xff] %v4443_v50  ;;  %v4056_v56 = vadd.f32 %v6190_v24, %v2306_v54  ;;  %v4055_v57 = vadd.f32 %v6192_v25, %v1655_v55  ;;  %v2308_v58 = vpop.f32.mrb[41].mxu1  ;;  %5460 = vmatmul.mubr.msk.f32.gmra.mrb[146].mxu1 %vm1159_vm3, %v742_v46  ;;  %1975 = vmatprep.mubr.f32.mxu0 %v5743_v0 }
 0x182   : > { %4837 = vst [vmem:[%s6207_s6 + $0x278] sm:$0xff] %v4445_v52  ;;  %v4446_v60 = vmax.f32 %v4054_v53, 0.0  ;;  %v4057_v61 = vadd.f32 %v6196_v27, %v2308_v58  ;;  %2628 = vmatprep.mubr.f32.mxu1 %v5743_v0  ;;  %v747_v52 = vld [vmem:[%s5911_s23 + $0x270] sm:$0xff] }
 0x183   : > { %v4448_v62 = vmax.f32 %v4056_v56, 0.0  ;;  %v4447_v63 = vmax.f32 %v4055_v57, 0.0  ;;  %v1659_v1 = vpop.f32.mrb[42].mxu0 }
 0x184   : > { %4838 = vst [vmem:[%s6207_s6 + $0x280] sm:$0xff] %v4446_v60  ;;  %v4449_v2 = vmax.f32 %v4057_v61, 0.0  ;;  %v4058_v3 = vadd.f32 %v6184_v23, %v1659_v1  ;;  %v2312_v4 = vpop.f32.mrb[42].mxu1  ;;  %v1661_v5 = vpop.f32.mrb[43].mxu0  ;;  %5361 = vmatmul.mubr.msk.f32.gmra.mrb[148].mxu0 %vm1159_vm3, %v743_v59 }
 0x185   : > { %4840 = vst [vmem:[%s6207_s6 + $0x290] sm:$0xff] %v4448_v62  ;;  %4839 = vst [vmem:[%s6207_s6 + $0x288] sm:$0xff] %v4447_v63  ;;  %v4060_v6 = vadd.f32 %v6190_v24, %v2312_v4  ;;  %v4059_v7 = vadd.f32 %v6192_v25, %v1661_v5  ;;  %v2314_v8 = vpop.f32.mrb[43].mxu1  ;;  %5461 = vmatmul.mubr.msk.f32.gmra.mrb[148].mxu1 %vm1159_vm3, %v743_v59  ;;  %1981 = vmatprep.mubr.f32.mxu0 %v5743_v0 }
 0x186   : > { %4841 = vst [vmem:[%s6207_s6 + $0x298] sm:$0xff] %v4449_v2  ;;  %v4450_v10 = vmax.f32 %v4058_v3, 0.0  ;;  %v4061_v11 = vadd.f32 %v6196_v27, %v2314_v8  ;;  %2634 = vmatprep.mubr.f32.mxu1 %v5743_v0  ;;  %v748_v2 = vld [vmem:[%s5911_s23 + $0x278] sm:$0xff] }
 0x187   : > { %v4452_v12 = vmax.f32 %v4060_v6, 0.0  ;;  %v4451_v13 = vmax.f32 %v4059_v7, 0.0  ;;  %v1665_v14 = vpop.f32.mrb[44].mxu0 }
 0x188   : > { %4842 = vst [vmem:[%s6207_s6 + $0x2a0] sm:$0xff] %v4450_v10  ;;  %v4453_v15 = vmax.f32 %v4061_v11, 0.0  ;;  %v4062_v16 = vadd.f32 %v6184_v23, %v1665_v14  ;;  %v2318_v17 = vpop.f32.mrb[44].mxu1  ;;  %v1667_v18 = vpop.f32.mrb[45].mxu0  ;;  %5362 = vmatmul.mubr.msk.f32.gmra.mrb[150].mxu0 %vm1159_vm3, %v744_v9 }
 0x189   : > { %4844 = vst [vmem:[%s6207_s6 + $0x2b0] sm:$0xff] %v4452_v12  ;;  %4843 = vst [vmem:[%s6207_s6 + $0x2a8] sm:$0xff] %v4451_v13  ;;  %v4064_v19 = vadd.f32 %v6190_v24, %v2318_v17  ;;  %v4063_v20 = vadd.f32 %v6192_v25, %v1667_v18  ;;  %v2320_v21 = vpop.f32.mrb[45].mxu1  ;;  %5462 = vmatmul.mubr.msk.f32.gmra.mrb[150].mxu1 %vm1159_vm3, %v744_v9  ;;  %1987 = vmatprep.mubr.f32.mxu0 %v5743_v0 }
 0x18a   : > { %4845 = vst [vmem:[%s6207_s6 + $0x2b8] sm:$0xff] %v4453_v15  ;;  %v4454_v26 = vmax.f32 %v4062_v16, 0.0  ;;  %v4065_v28 = vadd.f32 %v6196_v27, %v2320_v21  ;;  %2640 = vmatprep.mubr.f32.mxu1 %v5743_v0  ;;  %v749_v15 = vld [vmem:[%s5911_s23 + $0x280] sm:$0xff] }
 0x18b   : > { %v4456_v29 = vmax.f32 %v4064_v19, 0.0  ;;  %v4455_v30 = vmax.f32 %v4063_v20, 0.0  ;;  %v1671_v31 = vpop.f32.mrb[46].mxu0 }
 0x18c   : > { %4846 = vst [vmem:[%s6207_s6 + $0x2c0] sm:$0xff] %v4454_v26  ;;  %v4457_v32 = vmax.f32 %v4065_v28, 0.0  ;;  %v4066_v33 = vadd.f32 %v6184_v23, %v1671_v31  ;;  %v2324_v34 = vpop.f32.mrb[46].mxu1  ;;  %v1673_v35 = vpop.f32.mrb[47].mxu0  ;;  %5363 = vmatmul.mubr.msk.f32.gmra.mrb[152].mxu0 %vm1159_vm3, %v745_v22 }
 0x18d   : > { %4848 = vst [vmem:[%s6207_s6 + $0x2d0] sm:$0xff] %v4456_v29  ;;  %4847 = vst [vmem:[%s6207_s6 + $0x2c8] sm:$0xff] %v4455_v30  ;;  %v4068_v36 = vadd.f32 %v6190_v24, %v2324_v34  ;;  %v4067_v37 = vadd.f32 %v6192_v25, %v1673_v35  ;;  %v2326_v38 = vpop.f32.mrb[47].mxu1  ;;  %5463 = vmatmul.mubr.msk.f32.gmra.mrb[152].mxu1 %vm1159_vm3, %v745_v22  ;;  %1993 = vmatprep.mubr.f32.mxu0 %v5743_v0 }
 0x18e   : > { %4849 = vst [vmem:[%s6207_s6 + $0x2d8] sm:$0xff] %v4457_v32  ;;  %v4458_v40 = vmax.f32 %v4066_v33, 0.0  ;;  %v4069_v41 = vadd.f32 %v6196_v27, %v2326_v38  ;;  %2646 = vmatprep.mubr.f32.mxu1 %v5743_v0  ;;  %v750_v32 = vld [vmem:[%s5911_s23 + $0x288] sm:$0xff] }
 0x18f   : > { %v4460_v42 = vmax.f32 %v4068_v36, 0.0  ;;  %v4459_v43 = vmax.f32 %v4067_v37, 0.0  ;;  %v1677_v44 = vpop.f32.mrb[48].mxu0 }
 0x190   : > { %4850 = vst [vmem:[%s6207_s6 + $0x2e0] sm:$0xff] %v4458_v40  ;;  %v4461_v45 = vmax.f32 %v4069_v41, 0.0  ;;  %v4070_v46 = vadd.f32 %v6184_v23, %v1677_v44  ;;  %v2330_v47 = vpop.f32.mrb[48].mxu1  ;;  %v1679_v48 = vpop.f32.mrb[49].mxu0  ;;  %5364 = vmatmul.mubr.msk.f32.gmra.mrb[154].mxu0 %vm1159_vm3, %v746_v39 }
 0x191   : > { %4852 = vst [vmem:[%s6207_s6 + $0x2f0] sm:$0xff] %v4460_v42  ;;  %4851 = vst [vmem:[%s6207_s6 + $0x2e8] sm:$0xff] %v4459_v43  ;;  %v4072_v49 = vadd.f32 %v6190_v24, %v2330_v47  ;;  %v4071_v50 = vadd.f32 %v6192_v25, %v1679_v48  ;;  %v2332_v51 = vpop.f32.mrb[49].mxu1  ;;  %5464 = vmatmul.mubr.msk.f32.gmra.mrb[154].mxu1 %vm1159_vm3, %v746_v39  ;;  %1999 = vmatprep.mubr.f32.mxu0 %v5743_v0 }
 0x192   : > { %4853 = vst [vmem:[%s6207_s6 + $0x2f8] sm:$0xff] %v4461_v45  ;;  %v4462_v53 = vmax.f32 %v4070_v46, 0.0  ;;  %v4073_v54 = vadd.f32 %v6196_v27, %v2332_v51  ;;  %2652 = vmatprep.mubr.f32.mxu1 %v5743_v0  ;;  %v751_v45 = vld [vmem:[%s5911_s23 + $0x290] sm:$0xff] }
 0x193   : > { %v4464_v55 = vmax.f32 %v4072_v49, 0.0  ;;  %v4463_v56 = vmax.f32 %v4071_v50, 0.0  ;;  %v1683_v57 = vpop.f32.mrb[50].mxu0 }
 0x194   : > { %4854 = vst [vmem:[%s6207_s6 + $0x300] sm:$0xff] %v4462_v53  ;;  %v4465_v58 = vmax.f32 %v4073_v54, 0.0  ;;  %v4074_v59 = vadd.f32 %v6184_v23, %v1683_v57  ;;  %v2336_v60 = vpop.f32.mrb[50].mxu1  ;;  %v1685_v61 = vpop.f32.mrb[51].mxu0  ;;  %5365 = vmatmul.mubr.msk.f32.gmra.mrb[156].mxu0 %vm1159_vm3, %v747_v52 }
 0x195   : > { %4856 = vst [vmem:[%s6207_s6 + $0x310] sm:$0xff] %v4464_v55  ;;  %4855 = vst [vmem:[%s6207_s6 + $0x308] sm:$0xff] %v4463_v56  ;;  %v4076_v62 = vadd.f32 %v6190_v24, %v2336_v60  ;;  %v4075_v63 = vadd.f32 %v6192_v25, %v1685_v61  ;;  %v2338_v1 = vpop.f32.mrb[51].mxu1  ;;  %5465 = vmatmul.mubr.msk.f32.gmra.mrb[156].mxu1 %vm1159_vm3, %v747_v52  ;;  %2005 = vmatprep.mubr.f32.mxu0 %v5743_v0 }
 0x196   : > { %4857 = vst [vmem:[%s6207_s6 + $0x318] sm:$0xff] %v4465_v58  ;;  %v4466_v3 = vmax.f32 %v4074_v59, 0.0  ;;  %v4077_v4 = vadd.f32 %v6196_v27, %v2338_v1  ;;  %2658 = vmatprep.mubr.f32.mxu1 %v5743_v0  ;;  %v752_v58 = vld [vmem:[%s5911_s23 + $0x298] sm:$0xff] }
 0x197   : > { %v4468_v5 = vmax.f32 %v4076_v62, 0.0  ;;  %v4467_v6 = vmax.f32 %v4075_v63, 0.0  ;;  %v1689_v7 = vpop.f32.mrb[52].mxu0 }
 0x198   : > { %4858 = vst [vmem:[%s6207_s6 + $0x320] sm:$0xff] %v4466_v3  ;;  %v4469_v8 = vmax.f32 %v4077_v4, 0.0  ;;  %v4078_v9 = vadd.f32 %v6184_v23, %v1689_v7  ;;  %v2342_v10 = vpop.f32.mrb[52].mxu1  ;;  %v1691_v11 = vpop.f32.mrb[53].mxu0  ;;  %5366 = vmatmul.mubr.msk.f32.gmra.mrb[158].mxu0 %vm1159_vm3, %v748_v2 }
 0x199   : > { %4860 = vst [vmem:[%s6207_s6 + $0x330] sm:$0xff] %v4468_v5  ;;  %4859 = vst [vmem:[%s6207_s6 + $0x328] sm:$0xff] %v4467_v6  ;;  %v4080_v12 = vadd.f32 %v6190_v24, %v2342_v10  ;;  %v4079_v13 = vadd.f32 %v6192_v25, %v1691_v11  ;;  %v2344_v14 = vpop.f32.mrb[53].mxu1  ;;  %5466 = vmatmul.mubr.msk.f32.gmra.mrb[158].mxu1 %vm1159_vm3, %v748_v2  ;;  %2011 = vmatprep.mubr.f32.mxu0 %v5743_v0 }
 0x19a   : > { %4861 = vst [vmem:[%s6207_s6 + $0x338] sm:$0xff] %v4469_v8  ;;  %v4470_v16 = vmax.f32 %v4078_v9, 0.0  ;;  %v4081_v17 = vadd.f32 %v6196_v27, %v2344_v14  ;;  %2664 = vmatprep.mubr.f32.mxu1 %v5743_v0  ;;  %v753_v8 = vld [vmem:[%s5911_s23 + $0x2a0] sm:$0xff] }
 0x19b   : > { %v4472_v18 = vmax.f32 %v4080_v12, 0.0  ;;  %v4471_v19 = vmax.f32 %v4079_v13, 0.0  ;;  %v1695_v20 = vpop.f32.mrb[54].mxu0 }
 0x19c   : > { %4862 = vst [vmem:[%s6207_s6 + $0x340] sm:$0xff] %v4470_v16  ;;  %v4473_v21 = vmax.f32 %v4081_v17, 0.0  ;;  %v4082_v22 = vadd.f32 %v6184_v23, %v1695_v20  ;;  %v2348_v26 = vpop.f32.mrb[54].mxu1  ;;  %v1697_v28 = vpop.f32.mrb[55].mxu0  ;;  %5367 = vmatmul.mubr.msk.f32.gmra.mrb[160].mxu0 %vm1159_vm3, %v749_v15 }
 0x19d   : > { %4864 = vst [vmem:[%s6207_s6 + $0x350] sm:$0xff] %v4472_v18  ;;  %4863 = vst [vmem:[%s6207_s6 + $0x348] sm:$0xff] %v4471_v19  ;;  %v4084_v29 = vadd.f32 %v6190_v24, %v2348_v26  ;;  %v4083_v30 = vadd.f32 %v6192_v25, %v1697_v28  ;;  %v2350_v31 = vpop.f32.mrb[55].mxu1  ;;  %5467 = vmatmul.mubr.msk.f32.gmra.mrb[160].mxu1 %vm1159_vm3, %v749_v15  ;;  %2017 = vmatprep.mubr.f32.mxu0 %v5743_v0 }
 0x19e   : > { %4865 = vst [vmem:[%s6207_s6 + $0x358] sm:$0xff] %v4473_v21  ;;  %v4474_v33 = vmax.f32 %v4082_v22, 0.0  ;;  %v4085_v34 = vadd.f32 %v6196_v27, %v2350_v31  ;;  %2670 = vmatprep.mubr.f32.mxu1 %v5743_v0  ;;  %v754_v21 = vld [vmem:[%s5911_s23 + $0x2a8] sm:$0xff] }
 0x19f   : > { %v4476_v35 = vmax.f32 %v4084_v29, 0.0  ;;  %v4475_v36 = vmax.f32 %v4083_v30, 0.0  ;;  %v1701_v37 = vpop.f32.mrb[56].mxu0 }
 0x1a0   : > { %4866 = vst [vmem:[%s6207_s6 + $0x360] sm:$0xff] %v4474_v33  ;;  %v4477_v38 = vmax.f32 %v4085_v34, 0.0  ;;  %v4086_v39 = vadd.f32 %v6184_v23, %v1701_v37  ;;  %v2354_v40 = vpop.f32.mrb[56].mxu1  ;;  %v1703_v41 = vpop.f32.mrb[57].mxu0  ;;  %5368 = vmatmul.mubr.msk.f32.gmra.mrb[162].mxu0 %vm1159_vm3, %v750_v32 }
 0x1a1   : > { %4868 = vst [vmem:[%s6207_s6 + $0x370] sm:$0xff] %v4476_v35  ;;  %4867 = vst [vmem:[%s6207_s6 + $0x368] sm:$0xff] %v4475_v36  ;;  %v4088_v42 = vadd.f32 %v6190_v24, %v2354_v40  ;;  %v4087_v43 = vadd.f32 %v6192_v25, %v1703_v41  ;;  %v2356_v44 = vpop.f32.mrb[57].mxu1  ;;  %5468 = vmatmul.mubr.msk.f32.gmra.mrb[162].mxu1 %vm1159_vm3, %v750_v32  ;;  %2023 = vmatprep.mubr.f32.mxu0 %v5743_v0 }
 0x1a2   : > { %4869 = vst [vmem:[%s6207_s6 + $0x378] sm:$0xff] %v4477_v38  ;;  %v4478_v46 = vmax.f32 %v4086_v39, 0.0  ;;  %v4089_v47 = vadd.f32 %v6196_v27, %v2356_v44  ;;  %2676 = vmatprep.mubr.f32.mxu1 %v5743_v0  ;;  %v755_v38 = vld [vmem:[%s5911_s23 + $0x2b0] sm:$0xff] }
 0x1a3   : > { %v4480_v48 = vmax.f32 %v4088_v42, 0.0  ;;  %v4479_v49 = vmax.f32 %v4087_v43, 0.0  ;;  %v1707_v50 = vpop.f32.mrb[58].mxu0 }
 0x1a4   : > { %4870 = vst [vmem:[%s6207_s6 + $0x380] sm:$0xff] %v4478_v46  ;;  %v4481_v51 = vmax.f32 %v4089_v47, 0.0  ;;  %v4090_v52 = vadd.f32 %v6184_v23, %v1707_v50  ;;  %v2360_v53 = vpop.f32.mrb[58].mxu1  ;;  %v1709_v54 = vpop.f32.mrb[59].mxu0  ;;  %5369 = vmatmul.mubr.msk.f32.gmra.mrb[164].mxu0 %vm1159_vm3, %v751_v45 }
 0x1a5   : > { %4872 = vst [vmem:[%s6207_s6 + $0x390] sm:$0xff] %v4480_v48  ;;  %4871 = vst [vmem:[%s6207_s6 + $0x388] sm:$0xff] %v4479_v49  ;;  %v4092_v55 = vadd.f32 %v6190_v24, %v2360_v53  ;;  %v4091_v56 = vadd.f32 %v6192_v25, %v1709_v54  ;;  %v2362_v57 = vpop.f32.mrb[59].mxu1  ;;  %5469 = vmatmul.mubr.msk.f32.gmra.mrb[164].mxu1 %vm1159_vm3, %v751_v45  ;;  %2029 = vmatprep.mubr.f32.mxu0 %v5743_v0 }
 0x1a6   : > { %4873 = vst [vmem:[%s6207_s6 + $0x398] sm:$0xff] %v4481_v51  ;;  %v4482_v59 = vmax.f32 %v4090_v52, 0.0  ;;  %v4093_v60 = vadd.f32 %v6196_v27, %v2362_v57  ;;  %2682 = vmatprep.mubr.f32.mxu1 %v5743_v0  ;;  %v756_v51 = vld [vmem:[%s5911_s23 + $0x2b8] sm:$0xff] }
 0x1a7   : > { %v4484_v61 = vmax.f32 %v4092_v55, 0.0  ;;  %v4483_v62 = vmax.f32 %v4091_v56, 0.0  ;;  %v1713_v63 = vpop.f32.mrb[60].mxu0 }
 0x1a8   : > { %4874 = vst [vmem:[%s6207_s6 + $0x3a0] sm:$0xff] %v4482_v59  ;;  %v4485_v1 = vmax.f32 %v4093_v60, 0.0  ;;  %v4094_v2 = vadd.f32 %v6184_v23, %v1713_v63  ;;  %v2366_v3 = vpop.f32.mrb[60].mxu1  ;;  %v1715_v4 = vpop.f32.mrb[61].mxu0  ;;  %5370 = vmatmul.mubr.msk.f32.gmra.mrb[166].mxu0 %vm1159_vm3, %v752_v58 }
 0x1a9   : > { %4876 = vst [vmem:[%s6207_s6 + $0x3b0] sm:$0xff] %v4484_v61  ;;  %4875 = vst [vmem:[%s6207_s6 + $0x3a8] sm:$0xff] %v4483_v62  ;;  %v4096_v5 = vadd.f32 %v6190_v24, %v2366_v3  ;;  %v4095_v6 = vadd.f32 %v6192_v25, %v1715_v4  ;;  %v2368_v7 = vpop.f32.mrb[61].mxu1  ;;  %5470 = vmatmul.mubr.msk.f32.gmra.mrb[166].mxu1 %vm1159_vm3, %v752_v58  ;;  %2035 = vmatprep.mubr.f32.mxu0 %v5743_v0 }
 0x1aa   : > { %4877 = vst [vmem:[%s6207_s6 + $0x3b8] sm:$0xff] %v4485_v1  ;;  %v4486_v9 = vmax.f32 %v4094_v2, 0.0  ;;  %v4097_v10 = vadd.f32 %v6196_v27, %v2368_v7  ;;  %2688 = vmatprep.mubr.f32.mxu1 %v5743_v0  ;;  %v757_v1 = vld [vmem:[%s5911_s23 + $0x2c0] sm:$0xff] }
 0x1ab   : > { %v4488_v11 = vmax.f32 %v4096_v5, 0.0  ;;  %v4487_v12 = vmax.f32 %v4095_v6, 0.0  ;;  %v1719_v13 = vpop.f32.mrb[62].mxu0 }
 0x1ac   : > { %4878 = vst [vmem:[%s6207_s6 + $0x3c0] sm:$0xff] %v4486_v9  ;;  %v4489_v14 = vmax.f32 %v4097_v10, 0.0  ;;  %v4098_v15 = vadd.f32 %v6184_v23, %v1719_v13  ;;  %v2372_v16 = vpop.f32.mrb[62].mxu1  ;;  %v1721_v17 = vpop.f32.mrb[63].mxu0  ;;  %5371 = vmatmul.mubr.msk.f32.gmra.mrb[168].mxu0 %vm1159_vm3, %v753_v8 }
 0x1ad   : > { %4880 = vst [vmem:[%s6207_s6 + $0x3d0] sm:$0xff] %v4488_v11  ;;  %4879 = vst [vmem:[%s6207_s6 + $0x3c8] sm:$0xff] %v4487_v12  ;;  %v4100_v18 = vadd.f32 %v6190_v24, %v2372_v16  ;;  %v4099_v19 = vadd.f32 %v6192_v25, %v1721_v17  ;;  %v2374_v20 = vpop.f32.mrb[63].mxu1  ;;  %5471 = vmatmul.mubr.msk.f32.gmra.mrb[168].mxu1 %vm1159_vm3, %v753_v8  ;;  %2041 = vmatprep.mubr.f32.mxu0 %v5743_v0 }
 0x1ae   : > { %4881 = vst [vmem:[%s6207_s6 + $0x3d8] sm:$0xff] %v4489_v14  ;;  %v4490_v22 = vmax.f32 %v4098_v15, 0.0  ;;  %v4101_v26 = vadd.f32 %v6196_v27, %v2374_v20  ;;  %2694 = vmatprep.mubr.f32.mxu1 %v5743_v0  ;;  %v758_v14 = vld [vmem:[%s5911_s23 + $0x2c8] sm:$0xff] }
 0x1af   : > { %v4492_v28 = vmax.f32 %v4100_v18, 0.0  ;;  %v4491_v29 = vmax.f32 %v4099_v19, 0.0  ;;  %v1725_v30 = vpop.f32.mrb[64].mxu0 }
 0x1b0   : > { %4882 = vst [vmem:[%s6207_s6 + $0x3e0] sm:$0xff] %v4490_v22  ;;  %v4493_v31 = vmax.f32 %v4101_v26, 0.0  ;;  %v4102_v32 = vadd.f32 %v6184_v23, %v1725_v30  ;;  %v2378_v33 = vpop.f32.mrb[64].mxu1  ;;  %v1727_v34 = vpop.f32.mrb[65].mxu0  ;;  %5372 = vmatmul.mubr.msk.f32.gmra.mrb[170].mxu0 %vm1159_vm3, %v754_v21 }
 0x1b1   : > { %4884 = vst [vmem:[%s6207_s6 + $0x3f0] sm:$0xff] %v4492_v28  ;;  %4883 = vst [vmem:[%s6207_s6 + $0x3e8] sm:$0xff] %v4491_v29  ;;  %v4104_v35 = vadd.f32 %v6190_v24, %v2378_v33  ;;  %v4103_v36 = vadd.f32 %v6192_v25, %v1727_v34  ;;  %v2380_v37 = vpop.f32.mrb[65].mxu1  ;;  %5472 = vmatmul.mubr.msk.f32.gmra.mrb[170].mxu1 %vm1159_vm3, %v754_v21  ;;  %2047 = vmatprep.mubr.f32.mxu0 %v5743_v0 }
 0x1b2   : > { %4885 = vst [vmem:[%s6207_s6 + $0x3f8] sm:$0xff] %v4493_v31  ;;  %v4494_v39 = vmax.f32 %v4102_v32, 0.0  ;;  %v4105_v40 = vadd.f32 %v6196_v27, %v2380_v37  ;;  %2700 = vmatprep.mubr.f32.mxu1 %v5743_v0  ;;  %v759_v31 = vld [vmem:[%s5911_s23 + $0x2d0] sm:$0xff] }
 0x1b3   : > { %v4496_v41 = vmax.f32 %v4104_v35, 0.0  ;;  %v4495_v42 = vmax.f32 %v4103_v36, 0.0  ;;  %v1731_v43 = vpop.f32.mrb[66].mxu0 }
 0x1b4   : > { %4886 = vst [vmem:[%s6207_s6 + $0x400] sm:$0xff] %v4494_v39  ;;  %v4497_v44 = vmax.f32 %v4105_v40, 0.0  ;;  %v4106_v45 = vadd.f32 %v6184_v23, %v1731_v43  ;;  %v2384_v46 = vpop.f32.mrb[66].mxu1  ;;  %v1733_v47 = vpop.f32.mrb[67].mxu0  ;;  %5373 = vmatmul.mubr.msk.f32.gmra.mrb[172].mxu0 %vm1159_vm3, %v755_v38 }
 0x1b5   : > { %4888 = vst [vmem:[%s6207_s6 + $0x410] sm:$0xff] %v4496_v41  ;;  %4887 = vst [vmem:[%s6207_s6 + $0x408] sm:$0xff] %v4495_v42  ;;  %v4108_v48 = vadd.f32 %v6190_v24, %v2384_v46  ;;  %v4107_v49 = vadd.f32 %v6192_v25, %v1733_v47  ;;  %v2386_v50 = vpop.f32.mrb[67].mxu1  ;;  %5473 = vmatmul.mubr.msk.f32.gmra.mrb[172].mxu1 %vm1159_vm3, %v755_v38  ;;  %2053 = vmatprep.mubr.f32.mxu0 %v5743_v0 }
 0x1b6   : > { %4889 = vst [vmem:[%s6207_s6 + $0x418] sm:$0xff] %v4497_v44  ;;  %v4498_v52 = vmax.f32 %v4106_v45, 0.0  ;;  %v4109_v53 = vadd.f32 %v6196_v27, %v2386_v50  ;;  %2706 = vmatprep.mubr.f32.mxu1 %v5743_v0  ;;  %v760_v44 = vld [vmem:[%s5911_s23 + $0x2d8] sm:$0xff] }
 0x1b7   : > { %v4500_v54 = vmax.f32 %v4108_v48, 0.0  ;;  %v4499_v55 = vmax.f32 %v4107_v49, 0.0  ;;  %v1737_v56 = vpop.f32.mrb[68].mxu0 }
 0x1b8   : > { %4890 = vst [vmem:[%s6207_s6 + $0x420] sm:$0xff] %v4498_v52  ;;  %v4501_v57 = vmax.f32 %v4109_v53, 0.0  ;;  %v4110_v58 = vadd.f32 %v6184_v23, %v1737_v56  ;;  %v2390_v59 = vpop.f32.mrb[68].mxu1  ;;  %v1739_v60 = vpop.f32.mrb[69].mxu0  ;;  %5374 = vmatmul.mubr.msk.f32.gmra.mrb[174].mxu0 %vm1159_vm3, %v756_v51 }
 0x1b9   : > { %4892 = vst [vmem:[%s6207_s6 + $0x430] sm:$0xff] %v4500_v54  ;;  %4891 = vst [vmem:[%s6207_s6 + $0x428] sm:$0xff] %v4499_v55  ;;  %v4112_v61 = vadd.f32 %v6190_v24, %v2390_v59  ;;  %v4111_v62 = vadd.f32 %v6192_v25, %v1739_v60  ;;  %v2392_v63 = vpop.f32.mrb[69].mxu1  ;;  %5474 = vmatmul.mubr.msk.f32.gmra.mrb[174].mxu1 %vm1159_vm3, %v756_v51  ;;  %2059 = vmatprep.mubr.f32.mxu0 %v5743_v0 }
 0x1ba   : > { %4893 = vst [vmem:[%s6207_s6 + $0x438] sm:$0xff] %v4501_v57  ;;  %v4502_v2 = vmax.f32 %v4110_v58, 0.0  ;;  %v4113_v3 = vadd.f32 %v6196_v27, %v2392_v63  ;;  %2712 = vmatprep.mubr.f32.mxu1 %v5743_v0  ;;  %v761_v57 = vld [vmem:[%s5911_s23 + $0x2e0] sm:$0xff] }
 0x1bb   : > { %v4504_v4 = vmax.f32 %v4112_v61, 0.0  ;;  %v4503_v5 = vmax.f32 %v4111_v62, 0.0  ;;  %v1743_v6 = vpop.f32.mrb[70].mxu0 }
 0x1bc   : > { %4894 = vst [vmem:[%s6207_s6 + $0x440] sm:$0xff] %v4502_v2  ;;  %v4505_v7 = vmax.f32 %v4113_v3, 0.0  ;;  %v4114_v8 = vadd.f32 %v6184_v23, %v1743_v6  ;;  %v2396_v9 = vpop.f32.mrb[70].mxu1  ;;  %v1745_v10 = vpop.f32.mrb[71].mxu0  ;;  %5375 = vmatmul.mubr.msk.f32.gmra.mrb[176].mxu0 %vm1159_vm3, %v757_v1 }
 0x1bd   : > { %4896 = vst [vmem:[%s6207_s6 + $0x450] sm:$0xff] %v4504_v4  ;;  %4895 = vst [vmem:[%s6207_s6 + $0x448] sm:$0xff] %v4503_v5  ;;  %v4116_v11 = vadd.f32 %v6190_v24, %v2396_v9  ;;  %v4115_v12 = vadd.f32 %v6192_v25, %v1745_v10  ;;  %v2398_v13 = vpop.f32.mrb[71].mxu1  ;;  %5475 = vmatmul.mubr.msk.f32.gmra.mrb[176].mxu1 %vm1159_vm3, %v757_v1  ;;  %2065 = vmatprep.mubr.f32.mxu0 %v5743_v0 }
 0x1be   : > { %4897 = vst [vmem:[%s6207_s6 + $0x458] sm:$0xff] %v4505_v7  ;;  %v4506_v15 = vmax.f32 %v4114_v8, 0.0  ;;  %v4117_v16 = vadd.f32 %v6196_v27, %v2398_v13  ;;  %2718 = vmatprep.mubr.f32.mxu1 %v5743_v0  ;;  %v762_v7 = vld [vmem:[%s5911_s23 + $0x2e8] sm:$0xff] }
 0x1bf   : > { %v4508_v17 = vmax.f32 %v4116_v11, 0.0  ;;  %v4507_v18 = vmax.f32 %v4115_v12, 0.0  ;;  %v1749_v19 = vpop.f32.mrb[72].mxu0 }
 0x1c0   : > { %4898 = vst [vmem:[%s6207_s6 + $0x460] sm:$0xff] %v4506_v15  ;;  %v4509_v20 = vmax.f32 %v4117_v16, 0.0  ;;  %v4118_v21 = vadd.f32 %v6184_v23, %v1749_v19  ;;  %v2402_v22 = vpop.f32.mrb[72].mxu1  ;;  %v1751_v26 = vpop.f32.mrb[73].mxu0  ;;  %5376 = vmatmul.mubr.msk.f32.gmra.mrb[178].mxu0 %vm1159_vm3, %v758_v14 }
 0x1c1   : > { %4900 = vst [vmem:[%s6207_s6 + $0x470] sm:$0xff] %v4508_v17  ;;  %4899 = vst [vmem:[%s6207_s6 + $0x468] sm:$0xff] %v4507_v18  ;;  %v4120_v28 = vadd.f32 %v6190_v24, %v2402_v22  ;;  %v4119_v29 = vadd.f32 %v6192_v25, %v1751_v26  ;;  %v2404_v30 = vpop.f32.mrb[73].mxu1  ;;  %5476 = vmatmul.mubr.msk.f32.gmra.mrb[178].mxu1 %vm1159_vm3, %v758_v14  ;;  %2071 = vmatprep.mubr.f32.mxu0 %v5743_v0 }
 0x1c2   : > { %4901 = vst [vmem:[%s6207_s6 + $0x478] sm:$0xff] %v4509_v20  ;;  %v4510_v32 = vmax.f32 %v4118_v21, 0.0  ;;  %v4121_v33 = vadd.f32 %v6196_v27, %v2404_v30  ;;  %2724 = vmatprep.mubr.f32.mxu1 %v5743_v0  ;;  %v763_v20 = vld [vmem:[%s5911_s23 + $0x2f0] sm:$0xff] }
 0x1c3   : > { %v4512_v34 = vmax.f32 %v4120_v28, 0.0  ;;  %v4511_v35 = vmax.f32 %v4119_v29, 0.0  ;;  %v1755_v36 = vpop.f32.mrb[74].mxu0 }
 0x1c4   : > { %4902 = vst [vmem:[%s6207_s6 + $0x480] sm:$0xff] %v4510_v32  ;;  %v4513_v37 = vmax.f32 %v4121_v33, 0.0  ;;  %v4122_v38 = vadd.f32 %v6184_v23, %v1755_v36  ;;  %v2408_v39 = vpop.f32.mrb[74].mxu1  ;;  %v1757_v40 = vpop.f32.mrb[75].mxu0  ;;  %5377 = vmatmul.mubr.msk.f32.gmra.mrb[180].mxu0 %vm1159_vm3, %v759_v31 }
 0x1c5   : > { %4904 = vst [vmem:[%s6207_s6 + $0x490] sm:$0xff] %v4512_v34  ;;  %4903 = vst [vmem:[%s6207_s6 + $0x488] sm:$0xff] %v4511_v35  ;;  %v4124_v41 = vadd.f32 %v6190_v24, %v2408_v39  ;;  %v4123_v42 = vadd.f32 %v6192_v25, %v1757_v40  ;;  %v2410_v43 = vpop.f32.mrb[75].mxu1  ;;  %5477 = vmatmul.mubr.msk.f32.gmra.mrb[180].mxu1 %vm1159_vm3, %v759_v31  ;;  %2077 = vmatprep.mubr.f32.mxu0 %v5743_v0 }
 0x1c6   : > { %4905 = vst [vmem:[%s6207_s6 + $0x498] sm:$0xff] %v4513_v37  ;;  %v4514_v45 = vmax.f32 %v4122_v38, 0.0  ;;  %v4125_v46 = vadd.f32 %v6196_v27, %v2410_v43  ;;  %2730 = vmatprep.mubr.f32.mxu1 %v5743_v0  ;;  %v764_v37 = vld [vmem:[%s5911_s23 + $0x2f8] sm:$0xff] }
 0x1c7   : > { %v4516_v47 = vmax.f32 %v4124_v41, 0.0  ;;  %v4515_v48 = vmax.f32 %v4123_v42, 0.0  ;;  %v1761_v49 = vpop.f32.mrb[76].mxu0 }
 0x1c8   : > { %4906 = vst [vmem:[%s6207_s6 + $0x4a0] sm:$0xff] %v4514_v45  ;;  %v4517_v50 = vmax.f32 %v4125_v46, 0.0  ;;  %v4126_v51 = vadd.f32 %v6184_v23, %v1761_v49  ;;  %v2414_v52 = vpop.f32.mrb[76].mxu1  ;;  %v1763_v53 = vpop.f32.mrb[77].mxu0  ;;  %5378 = vmatmul.mubr.msk.f32.gmra.mrb[182].mxu0 %vm1159_vm3, %v760_v44 }
 0x1c9   : > { %4908 = vst [vmem:[%s6207_s6 + $0x4b0] sm:$0xff] %v4516_v47  ;;  %4907 = vst [vmem:[%s6207_s6 + $0x4a8] sm:$0xff] %v4515_v48  ;;  %v4128_v54 = vadd.f32 %v6190_v24, %v2414_v52  ;;  %v4127_v55 = vadd.f32 %v6192_v25, %v1763_v53  ;;  %v2416_v56 = vpop.f32.mrb[77].mxu1  ;;  %5478 = vmatmul.mubr.msk.f32.gmra.mrb[182].mxu1 %vm1159_vm3, %v760_v44  ;;  %2083 = vmatprep.mubr.f32.mxu0 %v5743_v0 }
 0x1ca   : > { %4909 = vst [vmem:[%s6207_s6 + $0x4b8] sm:$0xff] %v4517_v50  ;;  %v4518_v58 = vmax.f32 %v4126_v51, 0.0  ;;  %v4129_v59 = vadd.f32 %v6196_v27, %v2416_v56  ;;  %2736 = vmatprep.mubr.f32.mxu1 %v5743_v0  ;;  %v765_v50 = vld [vmem:[%s5911_s23 + $0x300] sm:$0xff] }
 0x1cb   : > { %v4520_v60 = vmax.f32 %v4128_v54, 0.0  ;;  %v4519_v61 = vmax.f32 %v4127_v55, 0.0  ;;  %v1767_v62 = vpop.f32.mrb[78].mxu0 }
 0x1cc   : > { %4910 = vst [vmem:[%s6207_s6 + $0x4c0] sm:$0xff] %v4518_v58  ;;  %v4521_v63 = vmax.f32 %v4129_v59, 0.0  ;;  %v4130_v1 = vadd.f32 %v6184_v23, %v1767_v62  ;;  %v2420_v2 = vpop.f32.mrb[78].mxu1  ;;  %v1769_v3 = vpop.f32.mrb[79].mxu0  ;;  %5379 = vmatmul.mubr.msk.f32.gmra.mrb[184].mxu0 %vm1159_vm3, %v761_v57 }
 0x1cd   : > { %4912 = vst [vmem:[%s6207_s6 + $0x4d0] sm:$0xff] %v4520_v60  ;;  %4911 = vst [vmem:[%s6207_s6 + $0x4c8] sm:$0xff] %v4519_v61  ;;  %v4132_v4 = vadd.f32 %v6190_v24, %v2420_v2  ;;  %v4131_v5 = vadd.f32 %v6192_v25, %v1769_v3  ;;  %v2422_v6 = vpop.f32.mrb[79].mxu1  ;;  %5479 = vmatmul.mubr.msk.f32.gmra.mrb[184].mxu1 %vm1159_vm3, %v761_v57  ;;  %2089 = vmatprep.mubr.f32.mxu0 %v5743_v0 }
 0x1ce   : > { %4913 = vst [vmem:[%s6207_s6 + $0x4d8] sm:$0xff] %v4521_v63  ;;  %v4522_v8 = vmax.f32 %v4130_v1, 0.0  ;;  %v4133_v9 = vadd.f32 %v6196_v27, %v2422_v6  ;;  %2742 = vmatprep.mubr.f32.mxu1 %v5743_v0  ;;  %v766_v63 = vld [vmem:[%s5911_s23 + $0x308] sm:$0xff] }
 0x1cf   : > { %v4524_v10 = vmax.f32 %v4132_v4, 0.0  ;;  %v4523_v11 = vmax.f32 %v4131_v5, 0.0  ;;  %v1773_v12 = vpop.f32.mrb[80].mxu0 }
 0x1d0   : > { %4914 = vst [vmem:[%s6207_s6 + $0x4e0] sm:$0xff] %v4522_v8  ;;  %v4525_v13 = vmax.f32 %v4133_v9, 0.0  ;;  %v4134_v14 = vadd.f32 %v6184_v23, %v1773_v12  ;;  %v2426_v15 = vpop.f32.mrb[80].mxu1  ;;  %v1775_v16 = vpop.f32.mrb[81].mxu0  ;;  %5380 = vmatmul.mubr.msk.f32.gmra.mrb[186].mxu0 %vm1159_vm3, %v762_v7 }
 0x1d1   : > { %4916 = vst [vmem:[%s6207_s6 + $0x4f0] sm:$0xff] %v4524_v10  ;;  %4915 = vst [vmem:[%s6207_s6 + $0x4e8] sm:$0xff] %v4523_v11  ;;  %v4136_v17 = vadd.f32 %v6190_v24, %v2426_v15  ;;  %v4135_v18 = vadd.f32 %v6192_v25, %v1775_v16  ;;  %v2428_v19 = vpop.f32.mrb[81].mxu1  ;;  %5480 = vmatmul.mubr.msk.f32.gmra.mrb[186].mxu1 %vm1159_vm3, %v762_v7  ;;  %2095 = vmatprep.mubr.f32.mxu0 %v5743_v0 }
 0x1d2   : > { %4917 = vst [vmem:[%s6207_s6 + $0x4f8] sm:$0xff] %v4525_v13  ;;  %v4526_v21 = vmax.f32 %v4134_v14, 0.0  ;;  %v4137_v22 = vadd.f32 %v6196_v27, %v2428_v19  ;;  %2748 = vmatprep.mubr.f32.mxu1 %v5743_v0 }
 0x1d3   : > { %v4528_v26 = vmax.f32 %v4136_v17, 0.0  ;;  %v4527_v28 = vmax.f32 %v4135_v18, 0.0  ;;  %v1779_v29 = vpop.f32.mrb[82].mxu0 }
 0x1d4   : > { %4918 = vst [vmem:[%s6207_s6 + $0x500] sm:$0xff] %v4526_v21  ;;  %v4529_v30 = vmax.f32 %v4137_v22, 0.0  ;;  %v4138_v31 = vadd.f32 %v6184_v23, %v1779_v29  ;;  %v2432_v32 = vpop.f32.mrb[82].mxu1  ;;  %v1781_v33 = vpop.f32.mrb[83].mxu0  ;;  %5381 = vmatmul.mubr.msk.f32.gmra.mrb[188].mxu0 %vm1159_vm3, %v763_v20 }
 0x1d5   : > { %4920 = vst [vmem:[%s6207_s6 + $0x510] sm:$0xff] %v4528_v26  ;;  %4919 = vst [vmem:[%s6207_s6 + $0x508] sm:$0xff] %v4527_v28  ;;  %v4140_v34 = vadd.f32 %v6190_v24, %v2432_v32  ;;  %v4139_v35 = vadd.f32 %v6192_v25, %v1781_v33  ;;  %v2434_v36 = vpop.f32.mrb[83].mxu1  ;;  %5481 = vmatmul.mubr.msk.f32.gmra.mrb[188].mxu1 %vm1159_vm3, %v763_v20  ;;  %2101 = vmatprep.mubr.f32.mxu0 %v5743_v0 }
 0x1d6   : > { %4921 = vst [vmem:[%s6207_s6 + $0x518] sm:$0xff] %v4529_v30  ;;  %v4530_v38 = vmax.f32 %v4138_v31, 0.0  ;;  %v4141_v39 = vadd.f32 %v6196_v27, %v2434_v36  ;;  %2754 = vmatprep.mubr.f32.mxu1 %v5743_v0 }
 0x1d7   : > { %v4532_v40 = vmax.f32 %v4140_v34, 0.0  ;;  %v4531_v41 = vmax.f32 %v4139_v35, 0.0  ;;  %v1785_v42 = vpop.f32.mrb[84].mxu0 }
 0x1d8   : > { %4922 = vst [vmem:[%s6207_s6 + $0x520] sm:$0xff] %v4530_v38  ;;  %v4533_v43 = vmax.f32 %v4141_v39, 0.0  ;;  %v4142_v44 = vadd.f32 %v6184_v23, %v1785_v42  ;;  %v2438_v45 = vpop.f32.mrb[84].mxu1  ;;  %v1787_v46 = vpop.f32.mrb[85].mxu0  ;;  %5382 = vmatmul.mubr.msk.f32.gmra.mrb[190].mxu0 %vm1159_vm3, %v764_v37 }
 0x1d9   : > { %4924 = vst [vmem:[%s6207_s6 + $0x530] sm:$0xff] %v4532_v40  ;;  %4923 = vst [vmem:[%s6207_s6 + $0x528] sm:$0xff] %v4531_v41  ;;  %v4144_v47 = vadd.f32 %v6190_v24, %v2438_v45  ;;  %v4143_v48 = vadd.f32 %v6192_v25, %v1787_v46  ;;  %v2440_v49 = vpop.f32.mrb[85].mxu1  ;;  %5482 = vmatmul.mubr.msk.f32.gmra.mrb[190].mxu1 %vm1159_vm3, %v764_v37  ;;  %2107 = vmatprep.mubr.f32.mxu0 %v5743_v0 }
 0x1da   : > { %4925 = vst [vmem:[%s6207_s6 + $0x538] sm:$0xff] %v4533_v43  ;;  %v4534_v51 = vmax.f32 %v4142_v44, 0.0  ;;  %v4145_v52 = vadd.f32 %v6196_v27, %v2440_v49  ;;  %2760 = vmatprep.mubr.f32.mxu1 %v5743_v0 }
 0x1db   : > { %v4536_v53 = vmax.f32 %v4144_v47, 0.0  ;;  %v4535_v54 = vmax.f32 %v4143_v48, 0.0  ;;  %v1791_v55 = vpop.f32.mrb[86].mxu0 }
 0x1dc   : > { %4926 = vst [vmem:[%s6207_s6 + $0x540] sm:$0xff] %v4534_v51  ;;  %v4537_v56 = vmax.f32 %v4145_v52, 0.0  ;;  %v4146_v57 = vadd.f32 %v6184_v23, %v1791_v55  ;;  %v2444_v58 = vpop.f32.mrb[86].mxu1  ;;  %v1793_v59 = vpop.f32.mrb[87].mxu0  ;;  %5383 = vmatmul.mubr.msk.f32.gmra.mrb[192].mxu0 %vm1159_vm3, %v765_v50 }
 0x1dd   : > { %4928 = vst [vmem:[%s6207_s6 + $0x550] sm:$0xff] %v4536_v53  ;;  %4927 = vst [vmem:[%s6207_s6 + $0x548] sm:$0xff] %v4535_v54  ;;  %v4148_v60 = vadd.f32 %v6190_v24, %v2444_v58  ;;  %v4147_v61 = vadd.f32 %v6192_v25, %v1793_v59  ;;  %v2446_v62 = vpop.f32.mrb[87].mxu1  ;;  %5483 = vmatmul.mubr.msk.f32.gmra.mrb[192].mxu1 %vm1159_vm3, %v765_v50  ;;  %2113 = vmatprep.mubr.f32.mxu0 %v5743_v0 }
 0x1de   : > { %4929 = vst [vmem:[%s6207_s6 + $0x558] sm:$0xff] %v4537_v56  ;;  %v4538_v1 = vmax.f32 %v4146_v57, 0.0  ;;  %v4149_v2 = vadd.f32 %v6196_v27, %v2446_v62  ;;  %2766 = vmatprep.mubr.f32.mxu1 %v5743_v0 }
 0x1df   : > { %v4540_v3 = vmax.f32 %v4148_v60, 0.0  ;;  %v4539_v4 = vmax.f32 %v4147_v61, 0.0  ;;  %v1797_v5 = vpop.f32.mrb[88].mxu0 }
 0x1e0   : > { %4930 = vst [vmem:[%s6207_s6 + $0x560] sm:$0xff] %v4538_v1  ;;  %v4541_v6 = vmax.f32 %v4149_v2, 0.0  ;;  %v4150_v7 = vadd.f32 %v6184_v23, %v1797_v5  ;;  %v2450_v8 = vpop.f32.mrb[88].mxu1  ;;  %v1799_v9 = vpop.f32.mrb[89].mxu0  ;;  %5384 = vmatmul.mubr.msk.f32.gmra.mrb[194].mxu0 %vm1159_vm3, %v766_v63 }
 0x1e1   : > { %4932 = vst [vmem:[%s6207_s6 + $0x570] sm:$0xff] %v4540_v3  ;;  %4931 = vst [vmem:[%s6207_s6 + $0x568] sm:$0xff] %v4539_v4  ;;  %v4152_v10 = vadd.f32 %v6190_v24, %v2450_v8  ;;  %v4151_v0 = vadd.f32 %v6192_v25, %v1799_v9  ;;  %v2452_v11 = vpop.f32.mrb[89].mxu1  ;;  %5484 = vmatmul.mubr.msk.f32.gmra.mrb[194].mxu1 %vm1159_vm3, %v766_v63 }
 0x1e2   : > { %4933 = vst [vmem:[%s6207_s6 + $0x578] sm:$0xff] %v4541_v6  ;;  %v4542_v12 = vmax.f32 %v4150_v7, 0.0  ;;  %v4153_v13 = vadd.f32 %v6196_v27, %v2452_v11 }
 0x1e3   : > { %v4544_v14 = vmax.f32 %v4152_v10, 0.0  ;;  %v4543_v15 = vmax.f32 %v4151_v0, 0.0  ;;  %v1803_v16 = vpop.f32.mrb[90].mxu0 }
 0x1e4   : > { %4934 = vst [vmem:[%s6207_s6 + $0x580] sm:$0xff] %v4542_v12  ;;  %v4545_v17 = vmax.f32 %v4153_v13, 0.0  ;;  %v4154_v18 = vadd.f32 %v6184_v23, %v1803_v16  ;;  %v2456_v19 = vpop.f32.mrb[90].mxu1  ;;  %v1805_v20 = vpop.f32.mrb[91].mxu0 }
 0x1e5   : > { %4936 = vst [vmem:[%s6207_s6 + $0x590] sm:$0xff] %v4544_v14  ;;  %4935 = vst [vmem:[%s6207_s6 + $0x588] sm:$0xff] %v4543_v15  ;;  %v4156_v21 = vadd.f32 %v6190_v24, %v2456_v19  ;;  %v4155_v22 = vadd.f32 %v6192_v25, %v1805_v20  ;;  %v2458_v26 = vpop.f32.mrb[91].mxu1 }
 0x1e6   : > { %4937 = vst [vmem:[%s6207_s6 + $0x598] sm:$0xff] %v4545_v17  ;;  %v4546_v28 = vmax.f32 %v4154_v18, 0.0  ;;  %v4157_v29 = vadd.f32 %v6196_v27, %v2458_v26 }
 0x1e7   : > { %v4548_v30 = vmax.f32 %v4156_v21, 0.0  ;;  %v4547_v31 = vmax.f32 %v4155_v22, 0.0  ;;  %v1809_v32 = vpop.f32.mrb[92].mxu0 }
 0x1e8   : > { %4938 = vst [vmem:[%s6207_s6 + $0x5a0] sm:$0xff] %v4546_v28  ;;  %v4549_v33 = vmax.f32 %v4157_v29, 0.0  ;;  %v4158_v34 = vadd.f32 %v6184_v23, %v1809_v32  ;;  %v2462_v35 = vpop.f32.mrb[92].mxu1  ;;  %v1811_v36 = vpop.f32.mrb[93].mxu0 }
 0x1e9   : > { %4940 = vst [vmem:[%s6207_s6 + $0x5b0] sm:$0xff] %v4548_v30  ;;  %4939 = vst [vmem:[%s6207_s6 + $0x5a8] sm:$0xff] %v4547_v31  ;;  %v4160_v37 = vadd.f32 %v6190_v24, %v2462_v35  ;;  %v4159_v38 = vadd.f32 %v6192_v25, %v1811_v36  ;;  %v2464_v39 = vpop.f32.mrb[93].mxu1 }
 0x1ea   : > { %4941 = vst [vmem:[%s6207_s6 + $0x5b8] sm:$0xff] %v4549_v33  ;;  %v4550_v40 = vmax.f32 %v4158_v34, 0.0  ;;  %v4161_v41 = vadd.f32 %v6196_v27, %v2464_v39 }
 0x1eb   : > { %v4552_v42 = vmax.f32 %v4160_v37, 0.0  ;;  %v4551_v43 = vmax.f32 %v4159_v38, 0.0  ;;  %v1815_v44 = vpop.f32.mrb[94].mxu0 }
 0x1ec   : > { %4942 = vst [vmem:[%s6207_s6 + $0x5c0] sm:$0xff] %v4550_v40  ;;  %v4553_v45 = vmax.f32 %v4161_v41, 0.0  ;;  %v4162_v46 = vadd.f32 %v6184_v23, %v1815_v44  ;;  %v2468_v47 = vpop.f32.mrb[94].mxu1  ;;  %v1817_v48 = vpop.f32.mrb[95].mxu0 }
 0x1ed   : > { %4944 = vst [vmem:[%s6207_s6 + $0x5d0] sm:$0xff] %v4552_v42  ;;  %4943 = vst [vmem:[%s6207_s6 + $0x5c8] sm:$0xff] %v4551_v43  ;;  %v4164_v49 = vadd.f32 %v6190_v24, %v2468_v47  ;;  %v4163_v50 = vadd.f32 %v6192_v25, %v1817_v48  ;;  %v2470_v51 = vpop.f32.mrb[95].mxu1 }
 0x1ee   : > { %4945 = vst [vmem:[%s6207_s6 + $0x5d8] sm:$0xff] %v4553_v45  ;;  %v4554_v52 = vmax.f32 %v4162_v46, 0.0  ;;  %v4165_v53 = vadd.f32 %v6196_v27, %v2470_v51 }
 0x1ef   : > { %v4556_v54 = vmax.f32 %v4164_v49, 0.0  ;;  %v4555_v55 = vmax.f32 %v4163_v50, 0.0  ;;  %v1821_v56 = vpop.f32.mrb[96].mxu0 }
 0x1f0   : > { %4946 = vst [vmem:[%s6207_s6 + $0x5e0] sm:$0xff] %v4554_v52  ;;  %v4557_v57 = vmax.f32 %v4165_v53, 0.0  ;;  %v4166_v58 = vadd.f32 %v6184_v23, %v1821_v56  ;;  %v2474_v59 = vpop.f32.mrb[96].mxu1  ;;  %v1823_v60 = vpop.f32.mrb[97].mxu0 }
 0x1f1   : > { %4948 = vst [vmem:[%s6207_s6 + $0x5f0] sm:$0xff] %v4556_v54  ;;  %4947 = vst [vmem:[%s6207_s6 + $0x5e8] sm:$0xff] %v4555_v55  ;;  %v4168_v61 = vadd.f32 %v6190_v24, %v2474_v59  ;;  %v4167_v62 = vadd.f32 %v6192_v25, %v1823_v60  ;;  %v2476_v63 = vpop.f32.mrb[97].mxu1 }
 0x1f2   : > { %4949 = vst [vmem:[%s6207_s6 + $0x5f8] sm:$0xff] %v4557_v57  ;;  %v4558_v1 = vmax.f32 %v4166_v58, 0.0  ;;  %v4169_v2 = vadd.f32 %v6196_v27, %v2476_v63 }
 0x1f3   : > { %v4560_v3 = vmax.f32 %v4168_v61, 0.0  ;;  %v4559_v4 = vmax.f32 %v4167_v62, 0.0  ;;  %v1827_v5 = vpop.f32.mrb[98].mxu0 }
 0x1f4   : > { %4950 = vst [vmem:[%s6207_s6 + $0x600] sm:$0xff] %v4558_v1  ;;  %v4561_v6 = vmax.f32 %v4169_v2, 0.0  ;;  %v4170_v7 = vadd.f32 %v6184_v23, %v1827_v5  ;;  %v2480_v8 = vpop.f32.mrb[98].mxu1  ;;  %v1829_v9 = vpop.f32.mrb[99].mxu0 }
 0x1f5   : > { %4952 = vst [vmem:[%s6207_s6 + $0x610] sm:$0xff] %v4560_v3  ;;  %4951 = vst [vmem:[%s6207_s6 + $0x608] sm:$0xff] %v4559_v4  ;;  %v4172_v10 = vadd.f32 %v6190_v24, %v2480_v8  ;;  %v4171_v0 = vadd.f32 %v6192_v25, %v1829_v9  ;;  %v2482_v11 = vpop.f32.mrb[99].mxu1 }
 0x1f6   : > { %4953 = vst [vmem:[%s6207_s6 + $0x618] sm:$0xff] %v4561_v6  ;;  %v4562_v12 = vmax.f32 %v4170_v7, 0.0  ;;  %v4173_v13 = vadd.f32 %v6196_v27, %v2482_v11 }
 0x1f7   : > { %v4564_v14 = vmax.f32 %v4172_v10, 0.0  ;;  %v4563_v15 = vmax.f32 %v4171_v0, 0.0  ;;  %v1833_v16 = vpop.f32.mrb[100].mxu0 }
 0x1f8   : > { %4954 = vst [vmem:[%s6207_s6 + $0x620] sm:$0xff] %v4562_v12  ;;  %v4565_v17 = vmax.f32 %v4173_v13, 0.0  ;;  %v4174_v18 = vadd.f32 %v6184_v23, %v1833_v16  ;;  %v2486_v19 = vpop.f32.mrb[100].mxu1  ;;  %v1835_v20 = vpop.f32.mrb[101].mxu0 }
 0x1f9   : > { %4956 = vst [vmem:[%s6207_s6 + $0x630] sm:$0xff] %v4564_v14  ;;  %4955 = vst [vmem:[%s6207_s6 + $0x628] sm:$0xff] %v4563_v15  ;;  %v4176_v21 = vadd.f32 %v6190_v24, %v2486_v19  ;;  %v4175_v22 = vadd.f32 %v6192_v25, %v1835_v20  ;;  %v2488_v26 = vpop.f32.mrb[101].mxu1 }
 0x1fa   : > { %4957 = vst [vmem:[%s6207_s6 + $0x638] sm:$0xff] %v4565_v17  ;;  %v4566_v28 = vmax.f32 %v4174_v18, 0.0  ;;  %v4177_v29 = vadd.f32 %v6196_v27, %v2488_v26 }
 0x1fb   : > { %v4568_v30 = vmax.f32 %v4176_v21, 0.0  ;;  %v4567_v31 = vmax.f32 %v4175_v22, 0.0  ;;  %v1839_v32 = vpop.f32.mrb[102].mxu0 }
 0x1fc   : > { %4958 = vst [vmem:[%s6207_s6 + $0x640] sm:$0xff] %v4566_v28  ;;  %v4569_v33 = vmax.f32 %v4177_v29, 0.0  ;;  %v4178_v34 = vadd.f32 %v6184_v23, %v1839_v32  ;;  %v2492_v35 = vpop.f32.mrb[102].mxu1  ;;  %v1841_v36 = vpop.f32.mrb[103].mxu0 }
 0x1fd   : > { %4960 = vst [vmem:[%s6207_s6 + $0x650] sm:$0xff] %v4568_v30  ;;  %4959 = vst [vmem:[%s6207_s6 + $0x648] sm:$0xff] %v4567_v31  ;;  %v4180_v37 = vadd.f32 %v6190_v24, %v2492_v35  ;;  %v4179_v38 = vadd.f32 %v6192_v25, %v1841_v36  ;;  %v2494_v39 = vpop.f32.mrb[103].mxu1 }
 0x1fe   : > { %4961 = vst [vmem:[%s6207_s6 + $0x658] sm:$0xff] %v4569_v33  ;;  %v4570_v40 = vmax.f32 %v4178_v34, 0.0  ;;  %v4181_v41 = vadd.f32 %v6196_v27, %v2494_v39 }
 0x1ff   : > { %v4572_v42 = vmax.f32 %v4180_v37, 0.0  ;;  %v4571_v43 = vmax.f32 %v4179_v38, 0.0  ;;  %v1845_v44 = vpop.f32.mrb[104].mxu0 }
 0x200   : > { %4962 = vst [vmem:[%s6207_s6 + $0x660] sm:$0xff] %v4570_v40  ;;  %v4573_v45 = vmax.f32 %v4181_v41, 0.0  ;;  %v4182_v46 = vadd.f32 %v6184_v23, %v1845_v44  ;;  %v2498_v47 = vpop.f32.mrb[104].mxu1  ;;  %v1847_v48 = vpop.f32.mrb[105].mxu0 }
 0x201   : > { %4964 = vst [vmem:[%s6207_s6 + $0x670] sm:$0xff] %v4572_v42  ;;  %4963 = vst [vmem:[%s6207_s6 + $0x668] sm:$0xff] %v4571_v43  ;;  %v4184_v49 = vadd.f32 %v6190_v24, %v2498_v47  ;;  %v4183_v50 = vadd.f32 %v6192_v25, %v1847_v48  ;;  %v2500_v51 = vpop.f32.mrb[105].mxu1 }
 0x202   : > { %4965 = vst [vmem:[%s6207_s6 + $0x678] sm:$0xff] %v4573_v45  ;;  %v4574_v52 = vmax.f32 %v4182_v46, 0.0  ;;  %v4185_v53 = vadd.f32 %v6196_v27, %v2500_v51 }
 0x203   : > { %v4576_v54 = vmax.f32 %v4184_v49, 0.0  ;;  %v4575_v55 = vmax.f32 %v4183_v50, 0.0  ;;  %v1851_v56 = vpop.f32.mrb[106].mxu0 }
 0x204   : > { %4966 = vst [vmem:[%s6207_s6 + $0x680] sm:$0xff] %v4574_v52  ;;  %v4577_v57 = vmax.f32 %v4185_v53, 0.0  ;;  %v4186_v58 = vadd.f32 %v6184_v23, %v1851_v56  ;;  %v2504_v59 = vpop.f32.mrb[106].mxu1  ;;  %v1853_v60 = vpop.f32.mrb[107].mxu0 }
 0x205   : > { %4968 = vst [vmem:[%s6207_s6 + $0x690] sm:$0xff] %v4576_v54  ;;  %4967 = vst [vmem:[%s6207_s6 + $0x688] sm:$0xff] %v4575_v55  ;;  %v4188_v61 = vadd.f32 %v6190_v24, %v2504_v59  ;;  %v4187_v62 = vadd.f32 %v6192_v25, %v1853_v60  ;;  %v2506_v63 = vpop.f32.mrb[107].mxu1 }
 0x206   : > { %4969 = vst [vmem:[%s6207_s6 + $0x698] sm:$0xff] %v4577_v57  ;;  %v4578_v1 = vmax.f32 %v4186_v58, 0.0  ;;  %v4189_v2 = vadd.f32 %v6196_v27, %v2506_v63 }
 0x207   : > { %v4580_v3 = vmax.f32 %v4188_v61, 0.0  ;;  %v4579_v4 = vmax.f32 %v4187_v62, 0.0  ;;  %v1857_v5 = vpop.f32.mrb[108].mxu0 }
 0x208   : > { %4970 = vst [vmem:[%s6207_s6 + $0x6a0] sm:$0xff] %v4578_v1  ;;  %v4581_v6 = vmax.f32 %v4189_v2, 0.0  ;;  %v4190_v7 = vadd.f32 %v6184_v23, %v1857_v5  ;;  %v2510_v8 = vpop.f32.mrb[108].mxu1  ;;  %v1859_v9 = vpop.f32.mrb[109].mxu0 }
 0x209   : > { %4972 = vst [vmem:[%s6207_s6 + $0x6b0] sm:$0xff] %v4580_v3  ;;  %4971 = vst [vmem:[%s6207_s6 + $0x6a8] sm:$0xff] %v4579_v4  ;;  %v4192_v10 = vadd.f32 %v6190_v24, %v2510_v8  ;;  %v4191_v0 = vadd.f32 %v6192_v25, %v1859_v9  ;;  %v2512_v11 = vpop.f32.mrb[109].mxu1 }
 0x20a   : > { %4973 = vst [vmem:[%s6207_s6 + $0x6b8] sm:$0xff] %v4581_v6  ;;  %v4582_v12 = vmax.f32 %v4190_v7, 0.0  ;;  %v4193_v13 = vadd.f32 %v6196_v27, %v2512_v11 }
 0x20b   : > { %v4584_v14 = vmax.f32 %v4192_v10, 0.0  ;;  %v4583_v15 = vmax.f32 %v4191_v0, 0.0  ;;  %v1863_v16 = vpop.f32.mrb[110].mxu0 }
 0x20c   : > { %4974 = vst [vmem:[%s6207_s6 + $0x6c0] sm:$0xff] %v4582_v12  ;;  %v4585_v17 = vmax.f32 %v4193_v13, 0.0  ;;  %v4194_v18 = vadd.f32 %v6184_v23, %v1863_v16  ;;  %v2516_v19 = vpop.f32.mrb[110].mxu1  ;;  %v1865_v20 = vpop.f32.mrb[111].mxu0 }
 0x20d   : > { %4976 = vst [vmem:[%s6207_s6 + $0x6d0] sm:$0xff] %v4584_v14  ;;  %4975 = vst [vmem:[%s6207_s6 + $0x6c8] sm:$0xff] %v4583_v15  ;;  %v4196_v21 = vadd.f32 %v6190_v24, %v2516_v19  ;;  %v4195_v22 = vadd.f32 %v6192_v25, %v1865_v20  ;;  %v2518_v26 = vpop.f32.mrb[111].mxu1 }
 0x20e   : > { %4977 = vst [vmem:[%s6207_s6 + $0x6d8] sm:$0xff] %v4585_v17  ;;  %v4586_v28 = vmax.f32 %v4194_v18, 0.0  ;;  %v4197_v29 = vadd.f32 %v6196_v27, %v2518_v26 }
 0x20f   : > { %v4588_v30 = vmax.f32 %v4196_v21, 0.0  ;;  %v4587_v31 = vmax.f32 %v4195_v22, 0.0  ;;  %v1869_v32 = vpop.f32.mrb[112].mxu0 }
 0x210   : > { %4978 = vst [vmem:[%s6207_s6 + $0x6e0] sm:$0xff] %v4586_v28  ;;  %v4589_v33 = vmax.f32 %v4197_v29, 0.0  ;;  %v4198_v34 = vadd.f32 %v6184_v23, %v1869_v32  ;;  %v2522_v35 = vpop.f32.mrb[112].mxu1  ;;  %v1871_v36 = vpop.f32.mrb[113].mxu0 }
 0x211   : > { %4980 = vst [vmem:[%s6207_s6 + $0x6f0] sm:$0xff] %v4588_v30  ;;  %4979 = vst [vmem:[%s6207_s6 + $0x6e8] sm:$0xff] %v4587_v31  ;;  %v4200_v37 = vadd.f32 %v6190_v24, %v2522_v35  ;;  %v4199_v38 = vadd.f32 %v6192_v25, %v1871_v36  ;;  %v2524_v39 = vpop.f32.mrb[113].mxu1 }
 0x212   : > { %4981 = vst [vmem:[%s6207_s6 + $0x6f8] sm:$0xff] %v4589_v33  ;;  %v4590_v40 = vmax.f32 %v4198_v34, 0.0  ;;  %v4201_v41 = vadd.f32 %v6196_v27, %v2524_v39 }
 0x213   : > { %v4592_v42 = vmax.f32 %v4200_v37, 0.0  ;;  %v4591_v43 = vmax.f32 %v4199_v38, 0.0  ;;  %v1875_v44 = vpop.f32.mrb[114].mxu0 }
 0x214   : > { %4982 = vst [vmem:[%s6207_s6 + $0x700] sm:$0xff] %v4590_v40  ;;  %v4593_v45 = vmax.f32 %v4201_v41, 0.0  ;;  %v4202_v46 = vadd.f32 %v6184_v23, %v1875_v44  ;;  %v2528_v47 = vpop.f32.mrb[114].mxu1  ;;  %v1877_v48 = vpop.f32.mrb[115].mxu0 }
 0x215   : > { %4984 = vst [vmem:[%s6207_s6 + $0x710] sm:$0xff] %v4592_v42  ;;  %4983 = vst [vmem:[%s6207_s6 + $0x708] sm:$0xff] %v4591_v43  ;;  %v4204_v49 = vadd.f32 %v6190_v24, %v2528_v47  ;;  %v4203_v50 = vadd.f32 %v6192_v25, %v1877_v48  ;;  %v2530_v51 = vpop.f32.mrb[115].mxu1 }
 0x216   : > { %4985 = vst [vmem:[%s6207_s6 + $0x718] sm:$0xff] %v4593_v45  ;;  %v4594_v52 = vmax.f32 %v4202_v46, 0.0  ;;  %v4205_v53 = vadd.f32 %v6196_v27, %v2530_v51 }
 0x217   : > { %v4596_v54 = vmax.f32 %v4204_v49, 0.0  ;;  %v4595_v55 = vmax.f32 %v4203_v50, 0.0  ;;  %v1881_v56 = vpop.f32.mrb[116].mxu0 }
 0x218   : > { %4986 = vst [vmem:[%s6207_s6 + $0x720] sm:$0xff] %v4594_v52  ;;  %v4597_v57 = vmax.f32 %v4205_v53, 0.0  ;;  %v4206_v58 = vadd.f32 %v6184_v23, %v1881_v56  ;;  %v2534_v59 = vpop.f32.mrb[116].mxu1  ;;  %v1883_v60 = vpop.f32.mrb[117].mxu0 }
 0x219   : > { %4988 = vst [vmem:[%s6207_s6 + $0x730] sm:$0xff] %v4596_v54  ;;  %4987 = vst [vmem:[%s6207_s6 + $0x728] sm:$0xff] %v4595_v55  ;;  %v4208_v61 = vadd.f32 %v6190_v24, %v2534_v59  ;;  %v4207_v62 = vadd.f32 %v6192_v25, %v1883_v60  ;;  %v2536_v63 = vpop.f32.mrb[117].mxu1 }
 0x21a   : > { %4989 = vst [vmem:[%s6207_s6 + $0x738] sm:$0xff] %v4597_v57  ;;  %v4598_v1 = vmax.f32 %v4206_v58, 0.0  ;;  %v4209_v2 = vadd.f32 %v6196_v27, %v2536_v63 }
 0x21b   : > { %v4600_v3 = vmax.f32 %v4208_v61, 0.0  ;;  %v4599_v4 = vmax.f32 %v4207_v62, 0.0  ;;  %v1887_v5 = vpop.f32.mrb[118].mxu0 }
 0x21c   : > { %4990 = vst [vmem:[%s6207_s6 + $0x740] sm:$0xff] %v4598_v1  ;;  %v4601_v6 = vmax.f32 %v4209_v2, 0.0  ;;  %v4210_v7 = vadd.f32 %v6184_v23, %v1887_v5  ;;  %v2540_v8 = vpop.f32.mrb[118].mxu1  ;;  %v1889_v9 = vpop.f32.mrb[119].mxu0 }
 0x21d   : > { %4992 = vst [vmem:[%s6207_s6 + $0x750] sm:$0xff] %v4600_v3  ;;  %4991 = vst [vmem:[%s6207_s6 + $0x748] sm:$0xff] %v4599_v4  ;;  %v4212_v10 = vadd.f32 %v6190_v24, %v2540_v8  ;;  %v4211_v0 = vadd.f32 %v6192_v25, %v1889_v9  ;;  %v2542_v11 = vpop.f32.mrb[119].mxu1 }
 0x21e   : > { %4993 = vst [vmem:[%s6207_s6 + $0x758] sm:$0xff] %v4601_v6  ;;  %v4602_v12 = vmax.f32 %v4210_v7, 0.0  ;;  %v4213_v13 = vadd.f32 %v6196_v27, %v2542_v11 }
 0x21f   : > { %v4604_v14 = vmax.f32 %v4212_v10, 0.0  ;;  %v4603_v15 = vmax.f32 %v4211_v0, 0.0  ;;  %v1893_v16 = vpop.f32.mrb[120].mxu0 }
 0x220   : > { %4994 = vst [vmem:[%s6207_s6 + $0x760] sm:$0xff] %v4602_v12  ;;  %v4605_v17 = vmax.f32 %v4213_v13, 0.0  ;;  %v4214_v18 = vadd.f32 %v6184_v23, %v1893_v16  ;;  %v2546_v19 = vpop.f32.mrb[120].mxu1  ;;  %v1895_v20 = vpop.f32.mrb[121].mxu0 }
 0x221   : > { %4996 = vst [vmem:[%s6207_s6 + $0x770] sm:$0xff] %v4604_v14  ;;  %4995 = vst [vmem:[%s6207_s6 + $0x768] sm:$0xff] %v4603_v15  ;;  %v4216_v21 = vadd.f32 %v6190_v24, %v2546_v19  ;;  %v4215_v22 = vadd.f32 %v6192_v25, %v1895_v20  ;;  %v2548_v26 = vpop.f32.mrb[121].mxu1 }
 0x222   : > { %4997 = vst [vmem:[%s6207_s6 + $0x778] sm:$0xff] %v4605_v17  ;;  %v4606_v28 = vmax.f32 %v4214_v18, 0.0  ;;  %v4217_v29 = vadd.f32 %v6196_v27, %v2548_v26 }
 0x223   : > { %v4608_v30 = vmax.f32 %v4216_v21, 0.0  ;;  %v4607_v31 = vmax.f32 %v4215_v22, 0.0  ;;  %v1899_v32 = vpop.f32.mrb[122].mxu0 }
 0x224   : > { %4998 = vst [vmem:[%s6207_s6 + $0x780] sm:$0xff] %v4606_v28  ;;  %v4609_v33 = vmax.f32 %v4217_v29, 0.0  ;;  %v4218_v34 = vadd.f32 %v6184_v23, %v1899_v32  ;;  %v2552_v35 = vpop.f32.mrb[122].mxu1  ;;  %v1901_v36 = vpop.f32.mrb[123].mxu0 }
 0x225   : > { %5000 = vst [vmem:[%s6207_s6 + $0x790] sm:$0xff] %v4608_v30  ;;  %4999 = vst [vmem:[%s6207_s6 + $0x788] sm:$0xff] %v4607_v31  ;;  %v4220_v37 = vadd.f32 %v6190_v24, %v2552_v35  ;;  %v4219_v38 = vadd.f32 %v6192_v25, %v1901_v36  ;;  %v2554_v39 = vpop.f32.mrb[123].mxu1 }
 0x226   : > { %5001 = vst [vmem:[%s6207_s6 + $0x798] sm:$0xff] %v4609_v33  ;;  %v4610_v40 = vmax.f32 %v4218_v34, 0.0  ;;  %v4221_v41 = vadd.f32 %v6196_v27, %v2554_v39 }
 0x227   : > { %v4612_v42 = vmax.f32 %v4220_v37, 0.0  ;;  %v4611_v43 = vmax.f32 %v4219_v38, 0.0  ;;  %v1905_v44 = vpop.f32.mrb[124].mxu0 }
 0x228   : > { %5002 = vst [vmem:[%s6207_s6 + $0x7a0] sm:$0xff] %v4610_v40  ;;  %v4613_v45 = vmax.f32 %v4221_v41, 0.0  ;;  %v4222_v46 = vadd.f32 %v6184_v23, %v1905_v44  ;;  %v2558_v47 = vpop.f32.mrb[124].mxu1  ;;  %v1907_v48 = vpop.f32.mrb[125].mxu0 }
 0x229   : > { %5004 = vst [vmem:[%s6207_s6 + $0x7b0] sm:$0xff] %v4612_v42  ;;  %5003 = vst [vmem:[%s6207_s6 + $0x7a8] sm:$0xff] %v4611_v43  ;;  %v4224_v49 = vadd.f32 %v6190_v24, %v2558_v47  ;;  %v4223_v50 = vadd.f32 %v6192_v25, %v1907_v48  ;;  %v2560_v51 = vpop.f32.mrb[125].mxu1 }
 0x22a   : > { %5005 = vst [vmem:[%s6207_s6 + $0x7b8] sm:$0xff] %v4613_v45  ;;  %v4614_v52 = vmax.f32 %v4222_v46, 0.0  ;;  %v4225_v53 = vadd.f32 %v6196_v27, %v2560_v51 }
 0x22b   : > { %v4616_v54 = vmax.f32 %v4224_v49, 0.0  ;;  %v4615_v55 = vmax.f32 %v4223_v50, 0.0  ;;  %v1911_v56 = vpop.f32.mrb[126].mxu0 }
 0x22c   : > { %5006 = vst [vmem:[%s6207_s6 + $0x7c0] sm:$0xff] %v4614_v52  ;;  %v4617_v57 = vmax.f32 %v4225_v53, 0.0  ;;  %v4226_v58 = vadd.f32 %v6184_v23, %v1911_v56  ;;  %v2564_v59 = vpop.f32.mrb[126].mxu1  ;;  %v1913_v60 = vpop.f32.mrb[127].mxu0 }
 0x22d   : > { %5008 = vst [vmem:[%s6207_s6 + $0x7d0] sm:$0xff] %v4616_v54  ;;  %5007 = vst [vmem:[%s6207_s6 + $0x7c8] sm:$0xff] %v4615_v55  ;;  %v4228_v61 = vadd.f32 %v6190_v24, %v2564_v59  ;;  %v4227_v62 = vadd.f32 %v6192_v25, %v1913_v60  ;;  %v2566_v63 = vpop.f32.mrb[127].mxu1 }
 0x22e   : > { %5009 = vst [vmem:[%s6207_s6 + $0x7d8] sm:$0xff] %v4617_v57  ;;  %v4618_v1 = vmax.f32 %v4226_v58, 0.0  ;;  %v4229_v2 = vadd.f32 %v6196_v27, %v2566_v63 }
 0x22f   : > { %v4620_v3 = vmax.f32 %v4228_v61, 0.0  ;;  %v4619_v4 = vmax.f32 %v4227_v62, 0.0  ;;  %v1917_v5 = vpop.f32.mrb[128].mxu0 }
 0x230   : > { %5010 = vst [vmem:[%s6207_s6 + $0x7e0] sm:$0xff] %v4618_v1  ;;  %v4621_v6 = vmax.f32 %v4229_v2, 0.0  ;;  %v4230_v7 = vadd.f32 %v6184_v23, %v1917_v5  ;;  %v2570_v8 = vpop.f32.mrb[128].mxu1  ;;  %v1919_v9 = vpop.f32.mrb[129].mxu0 }
 0x231   : > { %5012 = vst [vmem:[%s6207_s6 + $0x7f0] sm:$0xff] %v4620_v3  ;;  %5011 = vst [vmem:[%s6207_s6 + $0x7e8] sm:$0xff] %v4619_v4  ;;  %v4232_v10 = vadd.f32 %v6190_v24, %v2570_v8  ;;  %v4231_v0 = vadd.f32 %v6192_v25, %v1919_v9  ;;  %v2572_v11 = vpop.f32.mrb[129].mxu1 }
 0x232   : > { %5013 = vst [vmem:[%s6207_s6 + $0x7f8] sm:$0xff] %v4621_v6  ;;  %v4622_v12 = vmax.f32 %v4230_v7, 0.0  ;;  %v4233_v13 = vadd.f32 %v6196_v27, %v2572_v11 }
 0x233   : > { %v4624_v14 = vmax.f32 %v4232_v10, 0.0  ;;  %v4623_v15 = vmax.f32 %v4231_v0, 0.0  ;;  %v1923_v16 = vpop.f32.mrb[130].mxu0 }
 0x234   : > { %5014 = vst [vmem:[%s6207_s6 + $0x800] sm:$0xff] %v4622_v12  ;;  %v4625_v17 = vmax.f32 %v4233_v13, 0.0  ;;  %v4234_v18 = vadd.f32 %v6184_v23, %v1923_v16  ;;  %v2576_v19 = vpop.f32.mrb[130].mxu1  ;;  %v1925_v20 = vpop.f32.mrb[131].mxu0 }
 0x235   : > { %5016 = vst [vmem:[%s6207_s6 + $0x810] sm:$0xff] %v4624_v14  ;;  %5015 = vst [vmem:[%s6207_s6 + $0x808] sm:$0xff] %v4623_v15  ;;  %v4236_v21 = vadd.f32 %v6190_v24, %v2576_v19  ;;  %v4235_v22 = vadd.f32 %v6192_v25, %v1925_v20  ;;  %v2578_v26 = vpop.f32.mrb[131].mxu1 }
 0x236   : > { %5017 = vst [vmem:[%s6207_s6 + $0x818] sm:$0xff] %v4625_v17  ;;  %v4626_v28 = vmax.f32 %v4234_v18, 0.0  ;;  %v4237_v29 = vadd.f32 %v6196_v27, %v2578_v26 }
 0x237   : > { %v4628_v30 = vmax.f32 %v4236_v21, 0.0  ;;  %v4627_v31 = vmax.f32 %v4235_v22, 0.0  ;;  %v1929_v32 = vpop.f32.mrb[132].mxu0 }
 0x238   : > { %5018 = vst [vmem:[%s6207_s6 + $0x820] sm:$0xff] %v4626_v28  ;;  %v4629_v33 = vmax.f32 %v4237_v29, 0.0  ;;  %v4238_v34 = vadd.f32 %v6184_v23, %v1929_v32  ;;  %v2582_v35 = vpop.f32.mrb[132].mxu1  ;;  %v1931_v36 = vpop.f32.mrb[133].mxu0 }
 0x239   : > { %5020 = vst [vmem:[%s6207_s6 + $0x830] sm:$0xff] %v4628_v30  ;;  %5019 = vst [vmem:[%s6207_s6 + $0x828] sm:$0xff] %v4627_v31  ;;  %v4240_v37 = vadd.f32 %v6190_v24, %v2582_v35  ;;  %v4239_v38 = vadd.f32 %v6192_v25, %v1931_v36  ;;  %v2584_v39 = vpop.f32.mrb[133].mxu1 }
 0x23a   : > { %5021 = vst [vmem:[%s6207_s6 + $0x838] sm:$0xff] %v4629_v33  ;;  %v4630_v40 = vmax.f32 %v4238_v34, 0.0  ;;  %v4241_v41 = vadd.f32 %v6196_v27, %v2584_v39 }
 0x23b   : > { %v4632_v42 = vmax.f32 %v4240_v37, 0.0  ;;  %v4631_v43 = vmax.f32 %v4239_v38, 0.0  ;;  %v1935_v44 = vpop.f32.mrb[134].mxu0 }
 0x23c   : > { %5022 = vst [vmem:[%s6207_s6 + $0x840] sm:$0xff] %v4630_v40  ;;  %v4633_v45 = vmax.f32 %v4241_v41, 0.0  ;;  %v4242_v46 = vadd.f32 %v6184_v23, %v1935_v44  ;;  %v2588_v47 = vpop.f32.mrb[134].mxu1  ;;  %v1937_v48 = vpop.f32.mrb[135].mxu0 }
 0x23d   : > { %5024 = vst [vmem:[%s6207_s6 + $0x850] sm:$0xff] %v4632_v42  ;;  %5023 = vst [vmem:[%s6207_s6 + $0x848] sm:$0xff] %v4631_v43  ;;  %v4244_v49 = vadd.f32 %v6190_v24, %v2588_v47  ;;  %v4243_v50 = vadd.f32 %v6192_v25, %v1937_v48  ;;  %v2590_v51 = vpop.f32.mrb[135].mxu1 }
 0x23e   : > { %5025 = vst [vmem:[%s6207_s6 + $0x858] sm:$0xff] %v4633_v45  ;;  %v4634_v52 = vmax.f32 %v4242_v46, 0.0  ;;  %v4245_v53 = vadd.f32 %v6196_v27, %v2590_v51 }
 0x23f   : > { %v4636_v54 = vmax.f32 %v4244_v49, 0.0  ;;  %v4635_v55 = vmax.f32 %v4243_v50, 0.0  ;;  %v1941_v56 = vpop.f32.mrb[136].mxu0 }
 0x240   : > { %5026 = vst [vmem:[%s6207_s6 + $0x860] sm:$0xff] %v4634_v52  ;;  %v4637_v57 = vmax.f32 %v4245_v53, 0.0  ;;  %v4246_v58 = vadd.f32 %v6184_v23, %v1941_v56  ;;  %v2594_v59 = vpop.f32.mrb[136].mxu1  ;;  %v1943_v60 = vpop.f32.mrb[137].mxu0 }
 0x241   : > { %5028 = vst [vmem:[%s6207_s6 + $0x870] sm:$0xff] %v4636_v54  ;;  %5027 = vst [vmem:[%s6207_s6 + $0x868] sm:$0xff] %v4635_v55  ;;  %v4248_v61 = vadd.f32 %v6190_v24, %v2594_v59  ;;  %v4247_v62 = vadd.f32 %v6192_v25, %v1943_v60  ;;  %v2596_v63 = vpop.f32.mrb[137].mxu1 }
 0x242   : > { %5029 = vst [vmem:[%s6207_s6 + $0x878] sm:$0xff] %v4637_v57  ;;  %v4638_v1 = vmax.f32 %v4246_v58, 0.0  ;;  %v4249_v2 = vadd.f32 %v6196_v27, %v2596_v63 }
 0x243   : > { %v4640_v3 = vmax.f32 %v4248_v61, 0.0  ;;  %v4639_v4 = vmax.f32 %v4247_v62, 0.0  ;;  %v1947_v5 = vpop.f32.mrb[138].mxu0 }
 0x244   : > { %5030 = vst [vmem:[%s6207_s6 + $0x880] sm:$0xff] %v4638_v1  ;;  %v4641_v6 = vmax.f32 %v4249_v2, 0.0  ;;  %v4250_v7 = vadd.f32 %v6184_v23, %v1947_v5  ;;  %v2600_v8 = vpop.f32.mrb[138].mxu1  ;;  %v1949_v9 = vpop.f32.mrb[139].mxu0 }
 0x245   : > { %5032 = vst [vmem:[%s6207_s6 + $0x890] sm:$0xff] %v4640_v3  ;;  %5031 = vst [vmem:[%s6207_s6 + $0x888] sm:$0xff] %v4639_v4  ;;  %v4252_v10 = vadd.f32 %v6190_v24, %v2600_v8  ;;  %v4251_v0 = vadd.f32 %v6192_v25, %v1949_v9  ;;  %v2602_v11 = vpop.f32.mrb[139].mxu1 }
 0x246   : > { %5033 = vst [vmem:[%s6207_s6 + $0x898] sm:$0xff] %v4641_v6  ;;  %v4642_v12 = vmax.f32 %v4250_v7, 0.0  ;;  %v4253_v13 = vadd.f32 %v6196_v27, %v2602_v11 }
 0x247   : > { %v4644_v14 = vmax.f32 %v4252_v10, 0.0  ;;  %v4643_v15 = vmax.f32 %v4251_v0, 0.0  ;;  %v1953_v16 = vpop.f32.mrb[140].mxu0 }
 0x248   : > { %5034 = vst [vmem:[%s6207_s6 + $0x8a0] sm:$0xff] %v4642_v12  ;;  %v4645_v17 = vmax.f32 %v4253_v13, 0.0  ;;  %v4254_v18 = vadd.f32 %v6184_v23, %v1953_v16  ;;  %v2606_v19 = vpop.f32.mrb[140].mxu1  ;;  %v1955_v20 = vpop.f32.mrb[141].mxu0 }
 0x249   : > { %5036 = vst [vmem:[%s6207_s6 + $0x8b0] sm:$0xff] %v4644_v14  ;;  %5035 = vst [vmem:[%s6207_s6 + $0x8a8] sm:$0xff] %v4643_v15  ;;  %v4256_v21 = vadd.f32 %v6190_v24, %v2606_v19  ;;  %v4255_v22 = vadd.f32 %v6192_v25, %v1955_v20  ;;  %v2608_v26 = vpop.f32.mrb[141].mxu1 }
 0x24a   : > { %5037 = vst [vmem:[%s6207_s6 + $0x8b8] sm:$0xff] %v4645_v17  ;;  %v4646_v28 = vmax.f32 %v4254_v18, 0.0  ;;  %v4257_v29 = vadd.f32 %v6196_v27, %v2608_v26 }
 0x24b   : > { %v4648_v30 = vmax.f32 %v4256_v21, 0.0  ;;  %v4647_v31 = vmax.f32 %v4255_v22, 0.0  ;;  %v1959_v32 = vpop.f32.mrb[142].mxu0 }
 0x24c   : > { %5038 = vst [vmem:[%s6207_s6 + $0x8c0] sm:$0xff] %v4646_v28  ;;  %v4649_v33 = vmax.f32 %v4257_v29, 0.0  ;;  %v4258_v34 = vadd.f32 %v6184_v23, %v1959_v32  ;;  %v2612_v35 = vpop.f32.mrb[142].mxu1  ;;  %v1961_v36 = vpop.f32.mrb[143].mxu0 }
 0x24d   : > { %5040 = vst [vmem:[%s6207_s6 + $0x8d0] sm:$0xff] %v4648_v30  ;;  %5039 = vst [vmem:[%s6207_s6 + $0x8c8] sm:$0xff] %v4647_v31  ;;  %v4260_v37 = vadd.f32 %v6190_v24, %v2612_v35  ;;  %v4259_v38 = vadd.f32 %v6192_v25, %v1961_v36  ;;  %v2614_v39 = vpop.f32.mrb[143].mxu1 }
 0x24e   : > { %5041 = vst [vmem:[%s6207_s6 + $0x8d8] sm:$0xff] %v4649_v33  ;;  %v4650_v40 = vmax.f32 %v4258_v34, 0.0  ;;  %v4261_v41 = vadd.f32 %v6196_v27, %v2614_v39 }
 0x24f   : > { %v4652_v42 = vmax.f32 %v4260_v37, 0.0  ;;  %v4651_v43 = vmax.f32 %v4259_v38, 0.0  ;;  %v1965_v44 = vpop.f32.mrb[144].mxu0 }
 0x250   : > { %5042 = vst [vmem:[%s6207_s6 + $0x8e0] sm:$0xff] %v4650_v40  ;;  %v4653_v45 = vmax.f32 %v4261_v41, 0.0  ;;  %v4262_v46 = vadd.f32 %v6184_v23, %v1965_v44  ;;  %v2618_v47 = vpop.f32.mrb[144].mxu1  ;;  %v1967_v48 = vpop.f32.mrb[145].mxu0 }
 0x251   : > { %5044 = vst [vmem:[%s6207_s6 + $0x8f0] sm:$0xff] %v4652_v42  ;;  %5043 = vst [vmem:[%s6207_s6 + $0x8e8] sm:$0xff] %v4651_v43  ;;  %v4264_v49 = vadd.f32 %v6190_v24, %v2618_v47  ;;  %v4263_v50 = vadd.f32 %v6192_v25, %v1967_v48  ;;  %v2620_v51 = vpop.f32.mrb[145].mxu1 }
 0x252   : > { %5045 = vst [vmem:[%s6207_s6 + $0x8f8] sm:$0xff] %v4653_v45  ;;  %v4654_v52 = vmax.f32 %v4262_v46, 0.0  ;;  %v4265_v53 = vadd.f32 %v6196_v27, %v2620_v51 }
 0x253   : > { %v4656_v54 = vmax.f32 %v4264_v49, 0.0  ;;  %v4655_v55 = vmax.f32 %v4263_v50, 0.0  ;;  %v1971_v56 = vpop.f32.mrb[146].mxu0 }
 0x254   : > { %5046 = vst [vmem:[%s6207_s6 + $0x900] sm:$0xff] %v4654_v52  ;;  %v4657_v57 = vmax.f32 %v4265_v53, 0.0  ;;  %v4266_v58 = vadd.f32 %v6184_v23, %v1971_v56  ;;  %v2624_v59 = vpop.f32.mrb[146].mxu1  ;;  %v1973_v60 = vpop.f32.mrb[147].mxu0 }
 0x255   : > { %5048 = vst [vmem:[%s6207_s6 + $0x910] sm:$0xff] %v4656_v54  ;;  %5047 = vst [vmem:[%s6207_s6 + $0x908] sm:$0xff] %v4655_v55  ;;  %v4268_v61 = vadd.f32 %v6190_v24, %v2624_v59  ;;  %v4267_v62 = vadd.f32 %v6192_v25, %v1973_v60  ;;  %v2626_v63 = vpop.f32.mrb[147].mxu1 }
 0x256   : > { %5049 = vst [vmem:[%s6207_s6 + $0x918] sm:$0xff] %v4657_v57  ;;  %v4658_v1 = vmax.f32 %v4266_v58, 0.0  ;;  %v4269_v2 = vadd.f32 %v6196_v27, %v2626_v63 }
 0x257   : > { %v4660_v3 = vmax.f32 %v4268_v61, 0.0  ;;  %v4659_v4 = vmax.f32 %v4267_v62, 0.0  ;;  %v1977_v5 = vpop.f32.mrb[148].mxu0 }
 0x258   : > { %5050 = vst [vmem:[%s6207_s6 + $0x920] sm:$0xff] %v4658_v1  ;;  %v4661_v6 = vmax.f32 %v4269_v2, 0.0  ;;  %v4270_v7 = vadd.f32 %v6184_v23, %v1977_v5  ;;  %v2630_v8 = vpop.f32.mrb[148].mxu1  ;;  %v1979_v9 = vpop.f32.mrb[149].mxu0 }
 0x259   : > { %5052 = vst [vmem:[%s6207_s6 + $0x930] sm:$0xff] %v4660_v3  ;;  %5051 = vst [vmem:[%s6207_s6 + $0x928] sm:$0xff] %v4659_v4  ;;  %v4272_v10 = vadd.f32 %v6190_v24, %v2630_v8  ;;  %v4271_v0 = vadd.f32 %v6192_v25, %v1979_v9  ;;  %v2632_v11 = vpop.f32.mrb[149].mxu1 }
 0x25a   : > { %5053 = vst [vmem:[%s6207_s6 + $0x938] sm:$0xff] %v4661_v6  ;;  %v4662_v12 = vmax.f32 %v4270_v7, 0.0  ;;  %v4273_v13 = vadd.f32 %v6196_v27, %v2632_v11 }
 0x25b   : > { %v4664_v14 = vmax.f32 %v4272_v10, 0.0  ;;  %v4663_v15 = vmax.f32 %v4271_v0, 0.0  ;;  %v1983_v16 = vpop.f32.mrb[150].mxu0 }
 0x25c   : > { %5054 = vst [vmem:[%s6207_s6 + $0x940] sm:$0xff] %v4662_v12  ;;  %v4665_v17 = vmax.f32 %v4273_v13, 0.0  ;;  %v4274_v18 = vadd.f32 %v6184_v23, %v1983_v16  ;;  %v2636_v19 = vpop.f32.mrb[150].mxu1  ;;  %v1985_v20 = vpop.f32.mrb[151].mxu0 }
 0x25d   : > { %5056 = vst [vmem:[%s6207_s6 + $0x950] sm:$0xff] %v4664_v14  ;;  %5055 = vst [vmem:[%s6207_s6 + $0x948] sm:$0xff] %v4663_v15  ;;  %v4276_v21 = vadd.f32 %v6190_v24, %v2636_v19  ;;  %v4275_v22 = vadd.f32 %v6192_v25, %v1985_v20  ;;  %v2638_v26 = vpop.f32.mrb[151].mxu1 }
 0x25e   : > { %5057 = vst [vmem:[%s6207_s6 + $0x958] sm:$0xff] %v4665_v17  ;;  %v4666_v28 = vmax.f32 %v4274_v18, 0.0  ;;  %v4277_v29 = vadd.f32 %v6196_v27, %v2638_v26 }
 0x25f   : > { %v4668_v30 = vmax.f32 %v4276_v21, 0.0  ;;  %v4667_v31 = vmax.f32 %v4275_v22, 0.0  ;;  %v1989_v32 = vpop.f32.mrb[152].mxu0 }
 0x260   : > { %5058 = vst [vmem:[%s6207_s6 + $0x960] sm:$0xff] %v4666_v28  ;;  %v4669_v33 = vmax.f32 %v4277_v29, 0.0  ;;  %v4278_v34 = vadd.f32 %v6184_v23, %v1989_v32  ;;  %v2642_v35 = vpop.f32.mrb[152].mxu1  ;;  %v1991_v36 = vpop.f32.mrb[153].mxu0 }
 0x261   : > { %5060 = vst [vmem:[%s6207_s6 + $0x970] sm:$0xff] %v4668_v30  ;;  %5059 = vst [vmem:[%s6207_s6 + $0x968] sm:$0xff] %v4667_v31  ;;  %v4280_v37 = vadd.f32 %v6190_v24, %v2642_v35  ;;  %v4279_v38 = vadd.f32 %v6192_v25, %v1991_v36  ;;  %v2644_v39 = vpop.f32.mrb[153].mxu1 }
 0x262   : > { %5061 = vst [vmem:[%s6207_s6 + $0x978] sm:$0xff] %v4669_v33  ;;  %v4670_v40 = vmax.f32 %v4278_v34, 0.0  ;;  %v4281_v41 = vadd.f32 %v6196_v27, %v2644_v39 }
 0x263   : > { %v4672_v42 = vmax.f32 %v4280_v37, 0.0  ;;  %v4671_v43 = vmax.f32 %v4279_v38, 0.0  ;;  %v1995_v44 = vpop.f32.mrb[154].mxu0 }
 0x264   : > { %5062 = vst [vmem:[%s6207_s6 + $0x980] sm:$0xff] %v4670_v40  ;;  %v4673_v45 = vmax.f32 %v4281_v41, 0.0  ;;  %v4282_v46 = vadd.f32 %v6184_v23, %v1995_v44  ;;  %v2648_v47 = vpop.f32.mrb[154].mxu1  ;;  %v1997_v48 = vpop.f32.mrb[155].mxu0 }
 0x265   : > { %5064 = vst [vmem:[%s6207_s6 + $0x990] sm:$0xff] %v4672_v42  ;;  %5063 = vst [vmem:[%s6207_s6 + $0x988] sm:$0xff] %v4671_v43  ;;  %v4284_v49 = vadd.f32 %v6190_v24, %v2648_v47  ;;  %v4283_v50 = vadd.f32 %v6192_v25, %v1997_v48  ;;  %v2650_v51 = vpop.f32.mrb[155].mxu1 }
 0x266   : > { %5065 = vst [vmem:[%s6207_s6 + $0x998] sm:$0xff] %v4673_v45  ;;  %v4674_v52 = vmax.f32 %v4282_v46, 0.0  ;;  %v4285_v53 = vadd.f32 %v6196_v27, %v2650_v51 }
 0x267   : > { %v4676_v54 = vmax.f32 %v4284_v49, 0.0  ;;  %v4675_v55 = vmax.f32 %v4283_v50, 0.0  ;;  %v2001_v56 = vpop.f32.mrb[156].mxu0 }
 0x268   : > { %5066 = vst [vmem:[%s6207_s6 + $0x9a0] sm:$0xff] %v4674_v52  ;;  %v4677_v57 = vmax.f32 %v4285_v53, 0.0  ;;  %v4286_v58 = vadd.f32 %v6184_v23, %v2001_v56  ;;  %v2654_v59 = vpop.f32.mrb[156].mxu1  ;;  %v2003_v60 = vpop.f32.mrb[157].mxu0 }
 0x269   : > { %5068 = vst [vmem:[%s6207_s6 + $0x9b0] sm:$0xff] %v4676_v54  ;;  %5067 = vst [vmem:[%s6207_s6 + $0x9a8] sm:$0xff] %v4675_v55  ;;  %v4288_v61 = vadd.f32 %v6190_v24, %v2654_v59  ;;  %v4287_v62 = vadd.f32 %v6192_v25, %v2003_v60  ;;  %v2656_v63 = vpop.f32.mrb[157].mxu1 }
 0x26a   : > { %5069 = vst [vmem:[%s6207_s6 + $0x9b8] sm:$0xff] %v4677_v57  ;;  %v4678_v1 = vmax.f32 %v4286_v58, 0.0  ;;  %v4289_v2 = vadd.f32 %v6196_v27, %v2656_v63 }
 0x26b   : > { %v4680_v3 = vmax.f32 %v4288_v61, 0.0  ;;  %v4679_v4 = vmax.f32 %v4287_v62, 0.0  ;;  %v2007_v5 = vpop.f32.mrb[158].mxu0 }
 0x26c   : > { %5070 = vst [vmem:[%s6207_s6 + $0x9c0] sm:$0xff] %v4678_v1  ;;  %v4681_v6 = vmax.f32 %v4289_v2, 0.0  ;;  %v4290_v7 = vadd.f32 %v6184_v23, %v2007_v5  ;;  %v2660_v8 = vpop.f32.mrb[158].mxu1  ;;  %v2009_v9 = vpop.f32.mrb[159].mxu0 }
 0x26d   : > { %5072 = vst [vmem:[%s6207_s6 + $0x9d0] sm:$0xff] %v4680_v3  ;;  %5071 = vst [vmem:[%s6207_s6 + $0x9c8] sm:$0xff] %v4679_v4  ;;  %v4292_v10 = vadd.f32 %v6190_v24, %v2660_v8  ;;  %v4291_v0 = vadd.f32 %v6192_v25, %v2009_v9  ;;  %v2662_v11 = vpop.f32.mrb[159].mxu1 }
 0x26e   : > { %5073 = vst [vmem:[%s6207_s6 + $0x9d8] sm:$0xff] %v4681_v6  ;;  %v4682_v12 = vmax.f32 %v4290_v7, 0.0  ;;  %v4293_v13 = vadd.f32 %v6196_v27, %v2662_v11 }
 0x26f   : > { %v4684_v14 = vmax.f32 %v4292_v10, 0.0  ;;  %v4683_v15 = vmax.f32 %v4291_v0, 0.0  ;;  %v2013_v16 = vpop.f32.mrb[160].mxu0 }
 0x270   : > { %5074 = vst [vmem:[%s6207_s6 + $0x9e0] sm:$0xff] %v4682_v12  ;;  %v4685_v17 = vmax.f32 %v4293_v13, 0.0  ;;  %v4294_v18 = vadd.f32 %v6184_v23, %v2013_v16  ;;  %v2666_v19 = vpop.f32.mrb[160].mxu1  ;;  %v2015_v20 = vpop.f32.mrb[161].mxu0 }
 0x271   : > { %5076 = vst [vmem:[%s6207_s6 + $0x9f0] sm:$0xff] %v4684_v14  ;;  %5075 = vst [vmem:[%s6207_s6 + $0x9e8] sm:$0xff] %v4683_v15  ;;  %v4296_v21 = vadd.f32 %v6190_v24, %v2666_v19  ;;  %v4295_v22 = vadd.f32 %v6192_v25, %v2015_v20  ;;  %v2668_v26 = vpop.f32.mrb[161].mxu1 }
 0x272   : > { %5077 = vst [vmem:[%s6207_s6 + $0x9f8] sm:$0xff] %v4685_v17  ;;  %v4686_v28 = vmax.f32 %v4294_v18, 0.0  ;;  %v4297_v29 = vadd.f32 %v6196_v27, %v2668_v26 }
 0x273   : > { %v4688_v30 = vmax.f32 %v4296_v21, 0.0  ;;  %v4687_v31 = vmax.f32 %v4295_v22, 0.0  ;;  %v2019_v32 = vpop.f32.mrb[162].mxu0 }
 0x274   : > { %5078 = vst [vmem:[%s6207_s6 + $0xa00] sm:$0xff] %v4686_v28  ;;  %v4689_v33 = vmax.f32 %v4297_v29, 0.0  ;;  %v4298_v34 = vadd.f32 %v6184_v23, %v2019_v32  ;;  %v2672_v35 = vpop.f32.mrb[162].mxu1  ;;  %v2021_v36 = vpop.f32.mrb[163].mxu0 }
 0x275   : > { %5080 = vst [vmem:[%s6207_s6 + $0xa10] sm:$0xff] %v4688_v30  ;;  %5079 = vst [vmem:[%s6207_s6 + $0xa08] sm:$0xff] %v4687_v31  ;;  %v4300_v37 = vadd.f32 %v6190_v24, %v2672_v35  ;;  %v4299_v38 = vadd.f32 %v6192_v25, %v2021_v36  ;;  %v2674_v39 = vpop.f32.mrb[163].mxu1 }
 0x276   : > { %5081 = vst [vmem:[%s6207_s6 + $0xa18] sm:$0xff] %v4689_v33  ;;  %v4690_v40 = vmax.f32 %v4298_v34, 0.0  ;;  %v4301_v41 = vadd.f32 %v6196_v27, %v2674_v39 }
 0x277   : > { %v4692_v42 = vmax.f32 %v4300_v37, 0.0  ;;  %v4691_v43 = vmax.f32 %v4299_v38, 0.0  ;;  %v2025_v44 = vpop.f32.mrb[164].mxu0 }
 0x278   : > { %5082 = vst [vmem:[%s6207_s6 + $0xa20] sm:$0xff] %v4690_v40  ;;  %v4693_v45 = vmax.f32 %v4301_v41, 0.0  ;;  %v4302_v46 = vadd.f32 %v6184_v23, %v2025_v44  ;;  %v2678_v47 = vpop.f32.mrb[164].mxu1  ;;  %v2027_v48 = vpop.f32.mrb[165].mxu0 }
 0x279   : > { %5084 = vst [vmem:[%s6207_s6 + $0xa30] sm:$0xff] %v4692_v42  ;;  %5083 = vst [vmem:[%s6207_s6 + $0xa28] sm:$0xff] %v4691_v43  ;;  %v4304_v49 = vadd.f32 %v6190_v24, %v2678_v47  ;;  %v4303_v50 = vadd.f32 %v6192_v25, %v2027_v48  ;;  %v2680_v51 = vpop.f32.mrb[165].mxu1 }
 0x27a   : > { %5085 = vst [vmem:[%s6207_s6 + $0xa38] sm:$0xff] %v4693_v45  ;;  %v4694_v52 = vmax.f32 %v4302_v46, 0.0  ;;  %v4305_v53 = vadd.f32 %v6196_v27, %v2680_v51 }
 0x27b   : > { %v4696_v54 = vmax.f32 %v4304_v49, 0.0  ;;  %v4695_v55 = vmax.f32 %v4303_v50, 0.0  ;;  %v2031_v56 = vpop.f32.mrb[166].mxu0 }
 0x27c   : > { %5086 = vst [vmem:[%s6207_s6 + $0xa40] sm:$0xff] %v4694_v52  ;;  %v4697_v57 = vmax.f32 %v4305_v53, 0.0  ;;  %v4306_v58 = vadd.f32 %v6184_v23, %v2031_v56  ;;  %v2684_v59 = vpop.f32.mrb[166].mxu1  ;;  %v2033_v60 = vpop.f32.mrb[167].mxu0 }
 0x27d   : > { %5088 = vst [vmem:[%s6207_s6 + $0xa50] sm:$0xff] %v4696_v54  ;;  %5087 = vst [vmem:[%s6207_s6 + $0xa48] sm:$0xff] %v4695_v55  ;;  %v4308_v61 = vadd.f32 %v6190_v24, %v2684_v59  ;;  %v4307_v62 = vadd.f32 %v6192_v25, %v2033_v60  ;;  %v2686_v63 = vpop.f32.mrb[167].mxu1 }
 0x27e   : > { %5089 = vst [vmem:[%s6207_s6 + $0xa58] sm:$0xff] %v4697_v57  ;;  %v4698_v1 = vmax.f32 %v4306_v58, 0.0  ;;  %v4309_v2 = vadd.f32 %v6196_v27, %v2686_v63 }
 0x27f   : > { %v4700_v3 = vmax.f32 %v4308_v61, 0.0  ;;  %v4699_v4 = vmax.f32 %v4307_v62, 0.0  ;;  %v2037_v5 = vpop.f32.mrb[168].mxu0 }
 0x280   : > { %5090 = vst [vmem:[%s6207_s6 + $0xa60] sm:$0xff] %v4698_v1  ;;  %v4701_v6 = vmax.f32 %v4309_v2, 0.0  ;;  %v4310_v7 = vadd.f32 %v6184_v23, %v2037_v5  ;;  %v2690_v8 = vpop.f32.mrb[168].mxu1  ;;  %v2039_v9 = vpop.f32.mrb[169].mxu0 }
 0x281   : > { %5092 = vst [vmem:[%s6207_s6 + $0xa70] sm:$0xff] %v4700_v3  ;;  %5091 = vst [vmem:[%s6207_s6 + $0xa68] sm:$0xff] %v4699_v4  ;;  %v4312_v10 = vadd.f32 %v6190_v24, %v2690_v8  ;;  %v4311_v0 = vadd.f32 %v6192_v25, %v2039_v9  ;;  %v2692_v11 = vpop.f32.mrb[169].mxu1 }
 0x282   : > { %5093 = vst [vmem:[%s6207_s6 + $0xa78] sm:$0xff] %v4701_v6  ;;  %v4702_v12 = vmax.f32 %v4310_v7, 0.0  ;;  %v4313_v13 = vadd.f32 %v6196_v27, %v2692_v11 }
 0x283   : > { %v4704_v14 = vmax.f32 %v4312_v10, 0.0  ;;  %v4703_v15 = vmax.f32 %v4311_v0, 0.0  ;;  %v2043_v16 = vpop.f32.mrb[170].mxu0 }
 0x284   : > { %5094 = vst [vmem:[%s6207_s6 + $0xa80] sm:$0xff] %v4702_v12  ;;  %v4705_v17 = vmax.f32 %v4313_v13, 0.0  ;;  %v4314_v18 = vadd.f32 %v6184_v23, %v2043_v16  ;;  %v2696_v19 = vpop.f32.mrb[170].mxu1  ;;  %v2045_v20 = vpop.f32.mrb[171].mxu0 }
 0x285   : > { %5096 = vst [vmem:[%s6207_s6 + $0xa90] sm:$0xff] %v4704_v14  ;;  %5095 = vst [vmem:[%s6207_s6 + $0xa88] sm:$0xff] %v4703_v15  ;;  %v4316_v21 = vadd.f32 %v6190_v24, %v2696_v19  ;;  %v4315_v22 = vadd.f32 %v6192_v25, %v2045_v20  ;;  %v2698_v26 = vpop.f32.mrb[171].mxu1 }
 0x286   : > { %5097 = vst [vmem:[%s6207_s6 + $0xa98] sm:$0xff] %v4705_v17  ;;  %v4706_v28 = vmax.f32 %v4314_v18, 0.0  ;;  %v4317_v29 = vadd.f32 %v6196_v27, %v2698_v26 }
 0x287   : > { %v4708_v30 = vmax.f32 %v4316_v21, 0.0  ;;  %v4707_v31 = vmax.f32 %v4315_v22, 0.0  ;;  %v2049_v32 = vpop.f32.mrb[172].mxu0 }
 0x288   : > { %5098 = vst [vmem:[%s6207_s6 + $0xaa0] sm:$0xff] %v4706_v28  ;;  %v4709_v33 = vmax.f32 %v4317_v29, 0.0  ;;  %v4318_v34 = vadd.f32 %v6184_v23, %v2049_v32  ;;  %v2702_v35 = vpop.f32.mrb[172].mxu1  ;;  %v2051_v36 = vpop.f32.mrb[173].mxu0 }
 0x289   : > { %5100 = vst [vmem:[%s6207_s6 + $0xab0] sm:$0xff] %v4708_v30  ;;  %5099 = vst [vmem:[%s6207_s6 + $0xaa8] sm:$0xff] %v4707_v31  ;;  %v4320_v37 = vadd.f32 %v6190_v24, %v2702_v35  ;;  %v4319_v38 = vadd.f32 %v6192_v25, %v2051_v36  ;;  %v2704_v39 = vpop.f32.mrb[173].mxu1 }
 0x28a   : > { %5101 = vst [vmem:[%s6207_s6 + $0xab8] sm:$0xff] %v4709_v33  ;;  %v4710_v40 = vmax.f32 %v4318_v34, 0.0  ;;  %v4321_v41 = vadd.f32 %v6196_v27, %v2704_v39 }
 0x28b   : > { %v4712_v42 = vmax.f32 %v4320_v37, 0.0  ;;  %v4711_v43 = vmax.f32 %v4319_v38, 0.0  ;;  %v2055_v44 = vpop.f32.mrb[174].mxu0 }
 0x28c   : > { %5102 = vst [vmem:[%s6207_s6 + $0xac0] sm:$0xff] %v4710_v40  ;;  %v4713_v45 = vmax.f32 %v4321_v41, 0.0  ;;  %v4322_v46 = vadd.f32 %v6184_v23, %v2055_v44  ;;  %v2708_v47 = vpop.f32.mrb[174].mxu1  ;;  %v2057_v48 = vpop.f32.mrb[175].mxu0 }
 0x28d   : > { %5104 = vst [vmem:[%s6207_s6 + $0xad0] sm:$0xff] %v4712_v42  ;;  %5103 = vst [vmem:[%s6207_s6 + $0xac8] sm:$0xff] %v4711_v43  ;;  %v4324_v49 = vadd.f32 %v6190_v24, %v2708_v47  ;;  %v4323_v50 = vadd.f32 %v6192_v25, %v2057_v48  ;;  %v2710_v51 = vpop.f32.mrb[175].mxu1 }
 0x28e   : > { %5105 = vst [vmem:[%s6207_s6 + $0xad8] sm:$0xff] %v4713_v45  ;;  %v4714_v52 = vmax.f32 %v4322_v46, 0.0  ;;  %v4325_v53 = vadd.f32 %v6196_v27, %v2710_v51 }
 0x28f   : > { %v4716_v54 = vmax.f32 %v4324_v49, 0.0  ;;  %v4715_v55 = vmax.f32 %v4323_v50, 0.0  ;;  %v2061_v56 = vpop.f32.mrb[176].mxu0 }
 0x290   : > { %5106 = vst [vmem:[%s6207_s6 + $0xae0] sm:$0xff] %v4714_v52  ;;  %v4717_v57 = vmax.f32 %v4325_v53, 0.0  ;;  %v4326_v58 = vadd.f32 %v6184_v23, %v2061_v56  ;;  %v2714_v59 = vpop.f32.mrb[176].mxu1  ;;  %v2063_v60 = vpop.f32.mrb[177].mxu0 }
 0x291   : > { %5108 = vst [vmem:[%s6207_s6 + $0xaf0] sm:$0xff] %v4716_v54  ;;  %5107 = vst [vmem:[%s6207_s6 + $0xae8] sm:$0xff] %v4715_v55  ;;  %v4328_v61 = vadd.f32 %v6190_v24, %v2714_v59  ;;  %v4327_v62 = vadd.f32 %v6192_v25, %v2063_v60  ;;  %v2716_v63 = vpop.f32.mrb[177].mxu1 }
 0x292   : > { %5109 = vst [vmem:[%s6207_s6 + $0xaf8] sm:$0xff] %v4717_v57  ;;  %v4718_v1 = vmax.f32 %v4326_v58, 0.0  ;;  %v4329_v2 = vadd.f32 %v6196_v27, %v2716_v63 }
 0x293   : > { %v4720_v3 = vmax.f32 %v4328_v61, 0.0  ;;  %v4719_v4 = vmax.f32 %v4327_v62, 0.0  ;;  %v2067_v5 = vpop.f32.mrb[178].mxu0 }
 0x294   : > { %5110 = vst [vmem:[%s6207_s6 + $0xb00] sm:$0xff] %v4718_v1  ;;  %v4721_v6 = vmax.f32 %v4329_v2, 0.0  ;;  %v4330_v7 = vadd.f32 %v6184_v23, %v2067_v5  ;;  %v2720_v8 = vpop.f32.mrb[178].mxu1  ;;  %v2069_v9 = vpop.f32.mrb[179].mxu0 }
 0x295   : > { %5112 = vst [vmem:[%s6207_s6 + $0xb10] sm:$0xff] %v4720_v3  ;;  %5111 = vst [vmem:[%s6207_s6 + $0xb08] sm:$0xff] %v4719_v4  ;;  %v4332_v10 = vadd.f32 %v6190_v24, %v2720_v8  ;;  %v4331_v0 = vadd.f32 %v6192_v25, %v2069_v9  ;;  %v2722_v11 = vpop.f32.mrb[179].mxu1 }
 0x296   : > { %5113 = vst [vmem:[%s6207_s6 + $0xb18] sm:$0xff] %v4721_v6  ;;  %v4722_v12 = vmax.f32 %v4330_v7, 0.0  ;;  %v4333_v13 = vadd.f32 %v6196_v27, %v2722_v11 }
 0x297   : > { %v4724_v14 = vmax.f32 %v4332_v10, 0.0  ;;  %v4723_v15 = vmax.f32 %v4331_v0, 0.0  ;;  %v2073_v16 = vpop.f32.mrb[180].mxu0 }
 0x298   : > { %5114 = vst [vmem:[%s6207_s6 + $0xb20] sm:$0xff] %v4722_v12  ;;  %v4725_v17 = vmax.f32 %v4333_v13, 0.0  ;;  %v4334_v18 = vadd.f32 %v6184_v23, %v2073_v16  ;;  %v2726_v19 = vpop.f32.mrb[180].mxu1  ;;  %v2075_v20 = vpop.f32.mrb[181].mxu0 }
 0x299   : > { %5116 = vst [vmem:[%s6207_s6 + $0xb30] sm:$0xff] %v4724_v14  ;;  %5115 = vst [vmem:[%s6207_s6 + $0xb28] sm:$0xff] %v4723_v15  ;;  %v4336_v21 = vadd.f32 %v6190_v24, %v2726_v19  ;;  %v4335_v22 = vadd.f32 %v6192_v25, %v2075_v20  ;;  %v2728_v26 = vpop.f32.mrb[181].mxu1 }
 0x29a   : > { %5117 = vst [vmem:[%s6207_s6 + $0xb38] sm:$0xff] %v4725_v17  ;;  %v4726_v28 = vmax.f32 %v4334_v18, 0.0  ;;  %v4337_v29 = vadd.f32 %v6196_v27, %v2728_v26 }
 0x29b   : > { %v4728_v30 = vmax.f32 %v4336_v21, 0.0  ;;  %v4727_v31 = vmax.f32 %v4335_v22, 0.0  ;;  %v2079_v32 = vpop.f32.mrb[182].mxu0 }
 0x29c   : > { %5118 = vst [vmem:[%s6207_s6 + $0xb40] sm:$0xff] %v4726_v28  ;;  %v4729_v33 = vmax.f32 %v4337_v29, 0.0  ;;  %v4338_v34 = vadd.f32 %v6184_v23, %v2079_v32  ;;  %v2732_v35 = vpop.f32.mrb[182].mxu1  ;;  %v2081_v36 = vpop.f32.mrb[183].mxu0 }
 0x29d   : > { %5120 = vst [vmem:[%s6207_s6 + $0xb50] sm:$0xff] %v4728_v30  ;;  %5119 = vst [vmem:[%s6207_s6 + $0xb48] sm:$0xff] %v4727_v31  ;;  %v4340_v37 = vadd.f32 %v6190_v24, %v2732_v35  ;;  %v4339_v38 = vadd.f32 %v6192_v25, %v2081_v36  ;;  %v2734_v39 = vpop.f32.mrb[183].mxu1 }
 0x29e   : > { %5121 = vst [vmem:[%s6207_s6 + $0xb58] sm:$0xff] %v4729_v33  ;;  %v4730_v40 = vmax.f32 %v4338_v34, 0.0  ;;  %v4341_v41 = vadd.f32 %v6196_v27, %v2734_v39 }
 0x29f   : > { %v4732_v42 = vmax.f32 %v4340_v37, 0.0  ;;  %v4731_v43 = vmax.f32 %v4339_v38, 0.0  ;;  %v2085_v44 = vpop.f32.mrb[184].mxu0 }
 0x2a0   : > { %5122 = vst [vmem:[%s6207_s6 + $0xb60] sm:$0xff] %v4730_v40  ;;  %v4733_v45 = vmax.f32 %v4341_v41, 0.0  ;;  %v4342_v46 = vadd.f32 %v6184_v23, %v2085_v44  ;;  %v2738_v47 = vpop.f32.mrb[184].mxu1  ;;  %v2087_v48 = vpop.f32.mrb[185].mxu0 }
 0x2a1   : > { %5124 = vst [vmem:[%s6207_s6 + $0xb70] sm:$0xff] %v4732_v42  ;;  %5123 = vst [vmem:[%s6207_s6 + $0xb68] sm:$0xff] %v4731_v43  ;;  %v4344_v49 = vadd.f32 %v6190_v24, %v2738_v47  ;;  %v4343_v50 = vadd.f32 %v6192_v25, %v2087_v48  ;;  %v2740_v51 = vpop.f32.mrb[185].mxu1 }
 0x2a2   : > { %5125 = vst [vmem:[%s6207_s6 + $0xb78] sm:$0xff] %v4733_v45  ;;  %v4734_v52 = vmax.f32 %v4342_v46, 0.0  ;;  %v4345_v53 = vadd.f32 %v6196_v27, %v2740_v51 }
 0x2a3   : > { %v4736_v54 = vmax.f32 %v4344_v49, 0.0  ;;  %v4735_v55 = vmax.f32 %v4343_v50, 0.0  ;;  %v2091_v56 = vpop.f32.mrb[186].mxu0 }
 0x2a4   : > { %5126 = vst [vmem:[%s6207_s6 + $0xb80] sm:$0xff] %v4734_v52  ;;  %v4737_v57 = vmax.f32 %v4345_v53, 0.0  ;;  %v4346_v58 = vadd.f32 %v6184_v23, %v2091_v56  ;;  %v2744_v59 = vpop.f32.mrb[186].mxu1  ;;  %v2093_v60 = vpop.f32.mrb[187].mxu0 }
 0x2a5   : > { %5128 = vst [vmem:[%s6207_s6 + $0xb90] sm:$0xff] %v4736_v54  ;;  %5127 = vst [vmem:[%s6207_s6 + $0xb88] sm:$0xff] %v4735_v55  ;;  %v4348_v61 = vadd.f32 %v6190_v24, %v2744_v59  ;;  %v4347_v62 = vadd.f32 %v6192_v25, %v2093_v60  ;;  %v2746_v63 = vpop.f32.mrb[187].mxu1 }
 0x2a6   : > { %5129 = vst [vmem:[%s6207_s6 + $0xb98] sm:$0xff] %v4737_v57  ;;  %v4738_v1 = vmax.f32 %v4346_v58, 0.0  ;;  %v4349_v2 = vadd.f32 %v6196_v27, %v2746_v63 }
 0x2a7   : > { %v4740_v3 = vmax.f32 %v4348_v61, 0.0  ;;  %v4739_v4 = vmax.f32 %v4347_v62, 0.0  ;;  %v2097_v5 = vpop.f32.mrb[188].mxu0 }
 0x2a8   : > { %5130 = vst [vmem:[%s6207_s6 + $0xba0] sm:$0xff] %v4738_v1  ;;  %v4741_v6 = vmax.f32 %v4349_v2, 0.0  ;;  %v4350_v7 = vadd.f32 %v6184_v23, %v2097_v5  ;;  %v2750_v8 = vpop.f32.mrb[188].mxu1  ;;  %v2099_v9 = vpop.f32.mrb[189].mxu0 }
 0x2a9   : > { %5132 = vst [vmem:[%s6207_s6 + $0xbb0] sm:$0xff] %v4740_v3  ;;  %5131 = vst [vmem:[%s6207_s6 + $0xba8] sm:$0xff] %v4739_v4  ;;  %v4352_v10 = vadd.f32 %v6190_v24, %v2750_v8  ;;  %v4351_v0 = vadd.f32 %v6192_v25, %v2099_v9  ;;  %v2752_v11 = vpop.f32.mrb[189].mxu1 }
 0x2aa   : > { %5133 = vst [vmem:[%s6207_s6 + $0xbb8] sm:$0xff] %v4741_v6  ;;  %v4742_v12 = vmax.f32 %v4350_v7, 0.0  ;;  %v4353_v13 = vadd.f32 %v6196_v27, %v2752_v11 }
 0x2ab   : > { %v4744_v14 = vmax.f32 %v4352_v10, 0.0  ;;  %v4743_v15 = vmax.f32 %v4351_v0, 0.0  ;;  %v2103_v16 = vpop.f32.mrb[190].mxu0 }
 0x2ac   : > { %5134 = vst [vmem:[%s6207_s6 + $0xbc0] sm:$0xff] %v4742_v12  ;;  %v4745_v17 = vmax.f32 %v4353_v13, 0.0  ;;  %v4354_v18 = vadd.f32 %v6184_v23, %v2103_v16  ;;  %v2756_v19 = vpop.f32.mrb[190].mxu1  ;;  %v2105_v20 = vpop.f32.mrb[191].mxu0 }
 0x2ad   : > { %5136 = vst [vmem:[%s6207_s6 + $0xbd0] sm:$0xff] %v4744_v14  ;;  %5135 = vst [vmem:[%s6207_s6 + $0xbc8] sm:$0xff] %v4743_v15  ;;  %v4356_v21 = vadd.f32 %v6190_v24, %v2756_v19  ;;  %v4355_v22 = vadd.f32 %v6192_v25, %v2105_v20  ;;  %v2758_v26 = vpop.f32.mrb[191].mxu1 }
 0x2ae   : > { %5137 = vst [vmem:[%s6207_s6 + $0xbd8] sm:$0xff] %v4745_v17  ;;  %v4746_v28 = vmax.f32 %v4354_v18, 0.0  ;;  %v4357_v29 = vadd.f32 %v6196_v27, %v2758_v26 }
 0x2af   : > { %v4748_v30 = vmax.f32 %v4356_v21, 0.0  ;;  %v4747_v31 = vmax.f32 %v4355_v22, 0.0  ;;  %v2109_v32 = vpop.f32.mrb[192].mxu0 }
 0x2b0   : > { %5138 = vst [vmem:[%s6207_s6 + $0xbe0] sm:$0xff] %v4746_v28  ;;  %v4749_v33 = vmax.f32 %v4357_v29, 0.0  ;;  %v4358_v34 = vadd.f32 %v6184_v23, %v2109_v32  ;;  %v2762_v35 = vpop.f32.mrb[192].mxu1  ;;  %v2111_v36 = vpop.f32.mrb[193].mxu0 }
 0x2b1   : > { %5140 = vst [vmem:[%s6207_s6 + $0xbf0] sm:$0xff] %v4748_v30  ;;  %5139 = vst [vmem:[%s6207_s6 + $0xbe8] sm:$0xff] %v4747_v31  ;;  %v4360_v37 = vadd.f32 %v6190_v24, %v2762_v35  ;;  %v4359_v38 = vadd.f32 %v6192_v25, %v2111_v36  ;;  %v2764_v39 = vpop.f32.mrb[193].mxu1 }
 0x2b2   : > { %5141 = vst [vmem:[%s6207_s6 + $0xbf8] sm:$0xff] %v4749_v33  ;;  %v4750_v40 = vmax.f32 %v4358_v34, 0.0  ;;  %v4361_v41 = vadd.f32 %v6196_v27, %v2764_v39 }
 0x2b3   : > { %v4752_v42 = vmax.f32 %v4360_v37, 0.0  ;;  %v4751_v43 = vmax.f32 %v4359_v38, 0.0  ;;  %v2115_v44 = vpop.f32.mrb[194].mxu0 }
 0x2b4   : > { %5142 = vst [vmem:[%s6207_s6 + $0xc00] sm:$0xff] %v4750_v40  ;;  %v4753_v45 = vmax.f32 %v4361_v41, 0.0  ;;  %v4362_v46 = vadd.f32 %v6184_v23, %v2115_v44  ;;  %v2768_v47 = vpop.f32.mrb[194].mxu1  ;;  %v2117_v48 = vpop.f32.mrb[195].mxu0 }
 0x2b5   : > { %5144 = vst [vmem:[%s6207_s6 + $0xc10] sm:$0xff] %v4752_v42  ;;  %5143 = vst [vmem:[%s6207_s6 + $0xc08] sm:$0xff] %v4751_v43  ;;  %v4364_v49 = vadd.f32 %v6190_v24, %v2768_v47  ;;  %v4363_v50 = vadd.f32 %v6192_v25, %v2117_v48  ;;  %v2770_v51 = vpop.f32.mrb[195].mxu1 }
 0x2b6   : > { %5145 = vst [vmem:[%s6207_s6 + $0xc18] sm:$0xff] %v4753_v45  ;;  %v4754_v52 = vmax.f32 %v4362_v46, 0.0  ;;  %v4365_v23 = vadd.f32 %v6196_v27, %v2770_v51 }
 0x2b7   : > { %v4756_v53 = vmax.f32 %v4364_v49, 0.0  ;;  %v4755_v54 = vmax.f32 %v4363_v50, 0.0 }
 0x2b8   : > { %5146 = vst [vmem:[%s6207_s6 + $0xc20] sm:$0xff] %v4754_v52  ;;  %v4757_v24 = vmax.f32 %v4365_v23, 0.0 }
 0x2b9   : > { %5148 = vst [vmem:[%s6207_s6 + $0xc30] sm:$0xff] %v4756_v53  ;;  %5147 = vst [vmem:[%s6207_s6 + $0xc28] sm:$0xff] %v4755_v54 }
 0x2ba   : > { %5149 = vst [vmem:[%s6207_s6 + $0xc38] sm:$0xff] %v4757_v24 }
 0x2bb   : > { %5664 = shalt.err (!%p5661_p6)
}
 0x2bc   : > { %s5665_s30 = scalar_lea.hbm %s7207_s10, 50176  ;;  %s5669_s5 = scalar_lea.hbm %s7266_s3, 100352 }
 0x2bd   : > { %p5666_p7 = scmp.ne.s32.totalorder %s7207_s10, %s5665_s30  ;;  %p5670_p0 = scmp.lt.u32.totalorder %s7207_s10, %s7266_s3 }
 0x2be   : > { %p5671_p4 = scmp.lt.u32.totalorder %s5669_s5, %s5665_s30  ;;  %p5673_p1 = scmp.lt.u32.totalorder %s5665_s30, %s7207_s10 }
 0x2bf   : > { %p5667_p9 = pnand %p5666_p7, %p7280_p8 }
 0x2c0   : > { %p5672_p13 = por %p5671_p4, %p5670_p0 }
 0x2c1   : > { %p5668_p12 = pneg %p5667_p9 }
 0x2c2   : > { %p5674_p10 = por %p5673_p1, %p5672_p13 }
 0x2c4   : > { %p5675_p11 = pnand %p5674_p10, %p5668_p12 }
 0x2c6   : > { %5678 = shalt.err (!%p5675_p11)
}
 0x2c7   : > { %s5746_s4 = smov 512   ;;  %s5747_s6 = smov 32  }
 0x2c8   : > { %5521 = dma.vmem_to_hbm [thread:$0]  (%p7280_p8), %s7209_s8, 50176, %s7207_s10, %s7217_s11, %s5746_s4, %s5746_s4, %s5747_s6  }
 0x2c9 PF: > { %p5538_p2 = scmp.ge.s32.totalorder %s5737_s17, 2  ;;  %s5182_s7 = sand.u32 1, %s5717_s12  }
 0x2ca   : > { %p7281_p3 = scmp.ne.s32.totalorder %s7272_s24, 0  ;;  %s5183_s15 = scalar_lea.sflag [#allocation5], %s5182_s7 }
 0x2cc   : > { %p5531_p5 = pnand %p5538_p2, %p7281_p3 }
 0x2ce   : > { %5712 = dma.done.wait (!%p5531_p5), %s5183_s15, 50176  }
 0x2cf   : > { %5714 = vsyncadd (!%p5531_p5), %s5183_s15, 4294917120  ;;  %s18_s17 = sadd.s32 1, %s5737_s17   ;;  %s7282_s12 = smov %s5721_s13 }
 0x2d0   : > { %p15_p6 = scmp.ge.s32.totalorder %s18_s17, 4   ;;  %s7283_s13 = smov %s5725_s14 }
 0x2d1   : > { %s7284_s14 = smov %s5821_s25  ;;  %s7285_s15 = smov %s5733_s16 }
 0x2d2   : > { %s7286_s16 = smov %s7288_s20  ;;  %17 = sbr.rel (!%p15_p6) target bundleno = 6 (0x6), region = 86 }
 0x2d9   :  { %5188 = vsyncpa [#allocation4], 1 }
 0x2da   :  { %5190 = vsyncpa [#allocation4 + $0x1], 1 }
 0x2db   :  { %5191 = vsyncpa [#allocation7], 1 }
 0x2dc   :  { %5192 = vsyncpa [#allocation5], 1 }
 0x2dd   :  { %5194 = vsyncpa [#allocation5 + $0x1], 1 }

</bundles_post_ra>
